<compile_context>
chip_gen: v7x
topology: tpu7x:2x2x1
jax: 0.10.0
libtpu: 0.0.40
codegen_flags: <defaults>
</compile_context>

<pallas_src>
import functools

import numpy as np
import jax
import jax.numpy as jnp
from jax.experimental import pallas as pl
from jax.experimental.pallas import tpu as pltpu

NUM_HEADS = 4
LEAKY_SLOPE = 0.2          # DGL GATConv default negative slope
MASK_VALUE = -1e30         # additive softmax mask for the absent self edge


# ------------------------- single fused kernel -------------------------

def _gat_stack_kernel(h0_ref,
                      w1_ref, al1_ref, ar1_ref, wres1_ref,
                      w2_ref, al2_ref, ar2_ref,
                      w3_ref, al3_ref, ar3_ref,
                      gw1_ref, gb1_ref, gw2_ref, gb2_ref,
                      hmean_ref, smap_ref,
                      *, heads, d, neg_slope):
    n = h0_ref.shape[0]

    # Complete graph without self loops as an additive softmax bias, built
    # in-kernel (saves one DMA stream + double buffer per layer).
    row = jax.lax.broadcasted_iota(jnp.int32, (n, n), 0)
    col = jax.lax.broadcasted_iota(jnp.int32, (n, n), 1)
    diag_bias = jnp.where(row == col, MASK_VALUE, 0.0).astype(jnp.float32)

    dn = (((1,), (1,)), ((), ()))   # contract last dims, no batch dims

    def gat_layer(h, w_ref, al_ref, ar_ref, wres_ref, apply_relu):
        h16 = h.astype(jnp.bfloat16)
        feat = jnp.dot(h16, w_ref[...], preferred_element_type=jnp.float32)   # (N, H*D)
        f16 = feat.astype(jnp.bfloat16)
        # Per-head scores via (H, H*D) block-diagonal attention masks — the two
        # orderings give exactly the broadcast layouts needed (no transposes):
        #   el_t[h, j] = <attn_l[h], feat[j, hD:(h+1)D]>,  er[i, h] likewise.
        el_t = jax.lax.dot_general(al_ref[...], f16, dn,
                                   preferred_element_type=jnp.float32)        # (H, N)
        er = jax.lax.dot_general(f16, ar_ref[...], dn,
                                 preferred_element_type=jnp.float32)          # (N, H)
        outs = []
        for hh in range(heads):                                    # static unroll, H=4
            e = er[:, hh:hh + 1] + el_t[hh:hh + 1, :]              # (N, N) dst x src
            e = jnp.where(e > 0, e, neg_slope * e)                 # LeakyReLU
            e = e + diag_bias                                      # mask self edge
            e = e - jnp.max(e, axis=-1, keepdims=True)
            p = jnp.exp(e)
            alpha = (p / jnp.sum(p, axis=-1, keepdims=True)).astype(jnp.bfloat16)
            outs.append(jnp.dot(alpha, f16[:, hh * d:(hh + 1) * d],
                                preferred_element_type=jnp.float32))          # (N, D)
        out = jnp.concatenate(outs, axis=-1)                                  # (N, H*D)
        if wres_ref is not None:
            out = out + jnp.dot(h16, wres_ref[...],
                                preferred_element_type=jnp.float32)           # linear res
        else:
            out = out + h                                                      # identity res
        if apply_relu:
            out = jnp.maximum(out, 0.0)
        return out

    h0 = h0_ref[...]
    h1 = gat_layer(h0, w1_ref, al1_ref, ar1_ref, wres1_ref, apply_relu=True)
    h2 = gat_layer(h1, w2_ref, al2_ref, ar2_ref, None, apply_relu=True)
    h3 = gat_layer(h2, w3_ref, al3_ref, ar3_ref, None, apply_relu=False)

    # Head mean (h.mean over the head axis), folded into the kernel.
    hm = h3[:, 0:d]
    for hh in range(1, heads):
        hm = hm + h3[:, hh * d:(hh + 1) * d]
    hm = hm * (1.0 / heads)                                        # (N, D) f32
    hmean_ref[...] = hm

    # All-pairs groups_score: sigmoid(W2 relu(W1 |h_i - h_j| + b1) + b2),
    # formed by broadcast (no selector-matmul gathers, no XLA edge gathers).
    diff = jnp.abs(hm[:, None, :] - hm[None, :, :]).reshape(n * n, d)   # (N*N, D)
    z = jnp.dot(diff.astype(jnp.bfloat16), gw1_ref[...],
                preferred_element_type=jnp.float32) + gb1_ref[...]
    z = jnp.maximum(z, 0.0)
    s = jnp.sum(z.reshape(n, n, d) * gw2_ref[...][None, :, :], axis=-1) + gb2_ref[...]
    smap_ref[...] = jax.nn.sigmoid(s)                               # (N, N)


def gat_stack(h0, params, *, heads, d):
    """conv1 -> conv2 -> conv3 -> head-mean -> all-pairs groups MLP, one call."""
    n, f_in = h0.shape
    hd = heads * d
    c1, c2, c3 = params["conv1"], params["conv2"], params["conv3"]
    gm = params["w_group_mlp"]

    def full(shape):
        return pl.BlockSpec(shape, lambda i: (0,) * len(shape))

    in_specs = [
        full((n, f_in)),                                             # h0
        full((f_in, hd)), full((heads, hd)), full((heads, hd)), full((f_in, hd)),  # conv1
        full((hd, hd)), full((heads, hd)), full((heads, hd)),        # conv2
        full((hd, hd)), full((heads, hd)), full((heads, hd)),        # conv3
        full((d, d)), full((1, d)), full((1, d)), full((1, 1)),      # groups MLP
    ]
    args = (h0,
            c1["w_fc16"], c1["al_mask16"], c1["ar_mask16"], c1["w_res16"],
            c2["w_fc16"], c2["al_mask16"], c2["ar_mask16"],
            c3["w_fc16"], c3["al_mask16"], c3["ar_mask16"],
            gm["w1_16"], gm["b1r"], gm["w2r"], gm["b2r"])

    return pl.pallas_call(
        functools.partial(_gat_stack_kernel, heads=heads, d=d,
                          neg_slope=LEAKY_SLOPE),
        out_shape=(jax.ShapeDtypeStruct((n, d), jnp.float32),        # head-mean h
                   jax.ShapeDtypeStruct((n, n), jnp.float32)),       # groups score map
        grid=(1,),
        in_specs=in_specs,
        out_specs=(full((n, d)), full((n, n))),
        compiler_params=pltpu.CompilerParams(
            dimension_semantics=("arbitrary",)),
    )(*args)


# ------------------------- parameter init -------------------------

def _glorot(key, shape):
    fan_in, fan_out = shape[0], shape[-1]
    lim = (6.0 / (fan_in + fan_out)) ** 0.5
    return jax.random.uniform(key, shape, jnp.float32, -lim, lim)


def _head_mask(attn, heads, d):
    """(H, H*D) block-diagonal mask: row h carries attn[h] in cols [h*D,(h+1)*D)."""
    eye = jnp.eye(heads, dtype=jnp.float32)
    return (eye[:, :, None] * attn[:, None, :]).reshape(heads, heads * d)


def _init_gat(key, in_dim, out_dim, num_heads):
    k1, k2, k3, k4 = jax.random.split(key, 4)
    w_fc = _glorot(k1, (in_dim, num_heads * out_dim))
    attn_l = _glorot(k2, (num_heads, out_dim))
    attn_r = _glorot(k3, (num_heads, out_dim))
    p = dict(
        w_fc16=w_fc.astype(jnp.bfloat16),
        al_mask16=_head_mask(attn_l, num_heads, out_dim).astype(jnp.bfloat16),
        ar_mask16=_head_mask(attn_r, num_heads, out_dim).astype(jnp.bfloat16),
    )
    # DGL residual=True: Linear res_fc when in_dim != heads*out, else Identity.
    if in_dim != num_heads * out_dim:
        p["w_res16"] = _glorot(k4, (in_dim, num_heads * out_dim)).astype(jnp.bfloat16)
    return p


def init_params(key, in_dim, hidden_dim):
    ks = jax.random.split(key, 16)
    gm_w1 = _glorot(ks[3], (hidden_dim, hidden_dim))
    gm_w2 = _glorot(ks[4], (hidden_dim, 1))
    return dict(
        conv1=_init_gat(ks[0], in_dim, hidden_dim, NUM_HEADS),
        conv2=_init_gat(ks[1], NUM_HEADS * hidden_dim, hidden_dim, NUM_HEADS),
        conv3=_init_gat(ks[2], NUM_HEADS * hidden_dim, hidden_dim, NUM_HEADS),
        w_group_mlp=dict(w1_16=gm_w1.astype(jnp.bfloat16),
                         b1r=jnp.zeros((1, hidden_dim), jnp.float32),
                         w2r=gm_w2.T.astype(jnp.float32),             # (1, hidden)
                         b2r=jnp.zeros((1, 1), jnp.float32)),
        entity_linear=dict(w=_glorot(ks[5], (hidden_dim, hidden_dim)),
                           b=jnp.zeros((hidden_dim,), jnp.float32)),
        entity_link_mlp=dict(w1=_glorot(ks[6], (hidden_dim, hidden_dim)),
                             b1=jnp.zeros((hidden_dim,), jnp.float32),
                             w2=_glorot(ks[7], (hidden_dim, 1)),
                             b2=jnp.zeros((1,), jnp.float32)),
        entity_classify=dict(w=_glorot(ks[8], (hidden_dim, 4)),
                             b=jnp.zeros((4,), jnp.float32)),
    )


# ------------------------- forward pass (training branch) -------------------------

def net_forward(params, position, w_embed, entity, *, num_entities,
                hidden_dim, num_heads):
    n = position.shape[0]

    # h = cat([position, w_embed], dim=1)
    h0 = jnp.concatenate([position, w_embed], axis=1).astype(jnp.float32)

    # Fused GAT stack + head-mean + all-pairs groups score map (one kernel).
    hm, score_map = gat_stack(h0, params, heads=num_heads, d=hidden_dim)

    # groups_score over the complete-graph edges, row-major (i, j), j != i.
    src_np, dst_np = np.nonzero(1 - np.eye(n, dtype=np.int32))
    groups_score = score_map[jnp.asarray(src_np), jnp.asarray(dst_np)]

    # ---- training branch: per-entity pooling (tiny; plain jnp, fused by XLA) ----
    onehot = (entity[None, :] == jnp.arange(num_entities)[:, None]).astype(jnp.float32)
    ent_sum = onehot @ hm                                            # sum of node states
    el_p = params["entity_linear"]
    entity_states = ent_sum @ el_p["w"] + el_p["b"]                  # (E, hidden)
    counts = jnp.maximum(onehot.sum(axis=1, keepdims=True), 1.0)     # guard empty entity
    entity_positions = (onehot @ position) / counts                  # mean position

    # knn graph over entity positions (dgl.transform.knn_graph keeps the self edge).
    # TODO(synk): the inference branch (nx.connected_components over thresholded
    # edges -> dynamic entity count) has no clean Pallas/JAX equivalent.
    k = min(num_entities, 10)
    d2 = jnp.sum((entity_positions[:, None, :] - entity_positions[None, :, :]) ** 2, -1)
    _, nn_idx = jax.lax.top_k(-d2, k)                                # (E, k) incl. self
    pair_dst = jnp.repeat(jnp.arange(num_entities), k)
    pair_src = nn_idx.reshape(-1)

    ediff = jnp.abs(entity_states[pair_src] - entity_states[pair_dst])
    lm = params["entity_link_mlp"]
    z = jnp.maximum(ediff @ lm["w1"] + lm["b1"], 0.0)
    entity_link_score = jax.nn.sigmoid(z @ lm["w2"] + lm["b2"]).reshape(-1)

    cl = params["entity_classify"]
    entity_class = jax.nn.sigmoid(entity_states @ cl["w"] + cl["b"])

    return groups_score, entity_class, entity_positions, entity_link_score


# ------------------------- demo -------------------------

if __name__ == "__main__":
    key = jax.random.PRNGKey(0)
    k_pos, k_emb, k_par = jax.random.split(key, 3)

    N = 16                       # nodes
    POS_DIM, EMB_DIM = 2, 6      # g.ndata['position'], g.ndata['w_embed']
    IN_DIM = POS_DIM + EMB_DIM
    HIDDEN = 32                  # per-head out dim; H*D = 128 (lane-dense)
    NUM_ENTITIES = 4

    position = jax.random.normal(k_pos, (N, POS_DIM), jnp.float32)
    w_embed = jax.random.normal(k_emb, (N, EMB_DIM), jnp.float32)
    entity = jnp.asarray([i // 4 for i in range(N)], jnp.int32)      # 4 entities

    params = init_params(k_par, IN_DIM, HIDDEN)

    fwd = jax.jit(functools.partial(net_forward, num_entities=NUM_ENTITIES,
                                    hidden_dim=HIDDEN, num_heads=NUM_HEADS))
    outs = jax.block_until_ready(fwd(params, position, w_embed, entity))

    groups_score, entity_class, entity_positions, entity_link_score = outs
    assert groups_score.shape == (N * (N - 1),)
    assert entity_class.shape == (NUM_ENTITIES, 4)
    assert entity_positions.shape == (NUM_ENTITIES, POS_DIM)
    assert entity_link_score.shape == (NUM_ENTITIES * min(NUM_ENTITIES, 10),)
    assert bool(jnp.all(jnp.isfinite(groups_score)))
    assert bool(jnp.all(jnp.isfinite(entity_link_score)))
    assert bool(jnp.all(jnp.isfinite(entity_class)))
    print("KERNEL_OK")
</pallas_src>

<mosaic_0001>
module attributes {stable_mosaic.version = 11 : i64} {
  func.func @_gat_stack_kernel(%arg0: i32, %arg1: memref<16x8xf32, #tpu.memory_space<vmem>>, %arg2: memref<8x128xbf16, #tpu.memory_space<vmem>>, %arg3: memref<4x128xbf16, #tpu.memory_space<vmem>>, %arg4: memref<4x128xbf16, #tpu.memory_space<vmem>>, %arg5: memref<8x128xbf16, #tpu.memory_space<vmem>>, %arg6: memref<128x128xbf16, #tpu.memory_space<vmem>>, %arg7: memref<4x128xbf16, #tpu.memory_space<vmem>>, %arg8: memref<4x128xbf16, #tpu.memory_space<vmem>>, %arg9: memref<128x128xbf16, #tpu.memory_space<vmem>>, %arg10: memref<4x128xbf16, #tpu.memory_space<vmem>>, %arg11: memref<4x128xbf16, #tpu.memory_space<vmem>>, %arg12: memref<32x32xbf16, #tpu.memory_space<vmem>>, %arg13: memref<1x32xf32, #tpu.memory_space<vmem>>, %arg14: memref<1x32xf32, #tpu.memory_space<vmem>>, %arg15: memref<1x1xf32, #tpu.memory_space<vmem>>, %arg16: memref<16x32xf32, #tpu.memory_space<vmem>>, %arg17: memref<16x16xf32, #tpu.memory_space<vmem>>) attributes {dimension_semantics = [#tpu.dimension_semantics<arbitrary>], iteration_bounds = array<i64: 1>, scalar_prefetch = 0 : i64, scratch_operands = 0 : i64, tpu.core_type = #tpu.core_type<tc>, window_params = [{pipeline_mode = #tpu.pipeline_mode<synchronous>, transform_indices = @transform_0, window_bounds = array<i64: 16, 8>}, {pipeline_mode = #tpu.pipeline_mode<synchronous>, transform_indices = @transform_1, window_bounds = array<i64: 8, 128>}, {pipeline_mode = #tpu.pipeline_mode<synchronous>, transform_indices = @transform_2, window_bounds = array<i64: 4, 128>}, {pipeline_mode = #tpu.pipeline_mode<synchronous>, transform_indices = @transform_3, window_bounds = array<i64: 4, 128>}, {pipeline_mode = #tpu.pipeline_mode<synchronous>, transform_indices = @transform_4, window_bounds = array<i64: 8, 128>}, {pipeline_mode = #tpu.pipeline_mode<synchronous>, transform_indices = @transform_5, window_bounds = array<i64: 128, 128>}, {pipeline_mode = #tpu.pipeline_mode<synchronous>, transform_indices = @transform_6, window_bounds = array<i64: 4, 128>}, {pipeline_mode = #tpu.pipeline_mode<synchronous>, transform_indices = @transform_7, window_bounds = array<i64: 4, 128>}, {pipeline_mode = #tpu.pipeline_mode<synchronous>, transform_indices = @transform_8, window_bounds = array<i64: 128, 128>}, {pipeline_mode = #tpu.pipeline_mode<synchronous>, transform_indices = @transform_9, window_bounds = array<i64: 4, 128>}, {pipeline_mode = #tpu.pipeline_mode<synchronous>, transform_indices = @transform_10, window_bounds = array<i64: 4, 128>}, {pipeline_mode = #tpu.pipeline_mode<synchronous>, transform_indices = @transform_11, window_bounds = array<i64: 32, 32>}, {pipeline_mode = #tpu.pipeline_mode<synchronous>, transform_indices = @transform_12, window_bounds = array<i64: 1, 32>}, {pipeline_mode = #tpu.pipeline_mode<synchronous>, transform_indices = @transform_13, window_bounds = array<i64: 1, 32>}, {pipeline_mode = #tpu.pipeline_mode<synchronous>, transform_indices = @transform_14, window_bounds = array<i64: 1, 1>}, {pipeline_mode = #tpu.pipeline_mode<synchronous>, transform_indices = @transform_15, window_bounds = array<i64: 16, 32>}, {pipeline_mode = #tpu.pipeline_mode<synchronous>, transform_indices = @transform_16, window_bounds = array<i64: 16, 16>}]} {
    %0 = tpu.iota {dimensions = array<i32: 0>} : vector<16x16xi32>
    %1 = tpu.iota {dimensions = array<i32: 1>} : vector<16x16xi32>
    %2 = arith.cmpi eq, %0, %1 : vector<16x16xi32>
    %cst = arith.constant -1.000000e+30 : f32
    %cst_0 = arith.constant 0.000000e+00 : f32
    %3 = vector.broadcast %cst : f32 to vector<16x16xf32>
    %4 = vector.broadcast %cst_0 : f32 to vector<16x16xf32>
    %5 = arith.select %2, %3, %4 : vector<16x16xi1>, vector<16x16xf32>
    %c0 = arith.constant 0 : index
    %c0_1 = arith.constant 0 : index
    %6 = vector.load %arg1[%c0, %c0_1] : memref<16x8xf32, #tpu.memory_space<vmem>>, vector<16x8xf32>
    %7 = arith.truncf %6 : vector<16x8xf32> to vector<16x8xbf16>
    %c0_2 = arith.constant 0 : index
    %c0_3 = arith.constant 0 : index
    %8 = vector.load %arg2[%c0_2, %c0_3] : memref<8x128xbf16, #tpu.memory_space<vmem>>, vector<8x128xbf16>
    %cst_4 = arith.constant dense<0.000000e+00> : vector<16x128xf32>
    %9 = tpu.matmul %7, %8, %cst_4 {dimension_numbers = #tpu.dot_dimension_numbers<[1], [0], [0], [1], [0, 0, 1, 1], [], []>} : vector<16x8xbf16>, vector<8x128xbf16>, vector<16x128xf32> -> vector<16x128xf32>
    %10 = arith.truncf %9 : vector<16x128xf32> to vector<16x128xbf16>
    %c0_5 = arith.constant 0 : index
    %c0_6 = arith.constant 0 : index
    %11 = vector.load %arg3[%c0_5, %c0_6] : memref<4x128xbf16, #tpu.memory_space<vmem>>, vector<4x128xbf16>
    %cst_7 = arith.constant dense<0.000000e+00> : vector<4x16xf32>
    %12 = tpu.matmul %11, %10, %cst_7 {dimension_numbers = #tpu.dot_dimension_numbers<[1], [1], [0], [0], [0, 0, 1, 0], [], []>} : vector<4x128xbf16>, vector<16x128xbf16>, vector<4x16xf32> -> vector<4x16xf32>
    %c0_8 = arith.constant 0 : index
    %c0_9 = arith.constant 0 : index
    %13 = vector.load %arg4[%c0_8, %c0_9] : memref<4x128xbf16, #tpu.memory_space<vmem>>, vector<4x128xbf16>
    %cst_10 = arith.constant dense<0.000000e+00> : vector<16x4xf32>
    %14 = tpu.matmul %10, %13, %cst_10 {dimension_numbers = #tpu.dot_dimension_numbers<[1], [1], [0], [0], [0, 0, 1, 0], [], []>} : vector<16x128xbf16>, vector<4x128xbf16>, vector<16x4xf32> -> vector<16x4xf32>
    %15 = vector.extract_strided_slice %14 {offsets = [0, 0], sizes = [16, 1], strides = [1, 1]} : vector<16x4xf32> to vector<16x1xf32>
    %16 = vector.extract_strided_slice %12 {offsets = [0, 0], sizes = [1, 16], strides = [1, 1]} : vector<4x16xf32> to vector<1x16xf32>
    %17 = vector.broadcast %15 : vector<16x1xf32> to vector<16x16xf32>
    %18 = vector.broadcast %16 : vector<1x16xf32> to vector<16x16xf32>
    %19 = arith.addf %17, %18 : vector<16x16xf32>
    %cst_11 = arith.constant 0.000000e+00 : f32
    %20 = vector.broadcast %cst_11 : f32 to vector<16x16xf32>
    %21 = arith.cmpf ogt, %19, %20 : vector<16x16xf32>
    %cst_12 = arith.constant 2.000000e-01 : f32
    %22 = vector.broadcast %cst_12 : f32 to vector<16x16xf32>
    %23 = arith.mulf %22, %19 : vector<16x16xf32>
    %24 = arith.select %21, %19, %23 : vector<16x16xi1>, vector<16x16xf32>
    %25 = arith.addf %24, %5 : vector<16x16xf32>
    %cst_13 = arith.constant dense<0xFF800000> : vector<16xf32>
    %26 = vector.multi_reduction <maximumf>, %25, %cst_13 [1] : vector<16x16xf32> to vector<16xf32>
    %27 = vector.shape_cast %26 : vector<16xf32> to vector<16x1xf32>
    %28 = vector.broadcast %27 : vector<16x1xf32> to vector<16x16xf32>
    %29 = arith.subf %25, %28 : vector<16x16xf32>
    %30 = math.exp %29 : vector<16x16xf32>
    %cst_14 = arith.constant dense<0.000000e+00> : vector<16xf32>
    %31 = vector.multi_reduction <add>, %30, %cst_14 [1] : vector<16x16xf32> to vector<16xf32>
    %32 = vector.shape_cast %31 : vector<16xf32> to vector<16x1xf32>
    %33 = vector.broadcast %32 : vector<16x1xf32> to vector<16x16xf32>
    %34 = arith.divf %30, %33 : vector<16x16xf32>
    %35 = arith.truncf %34 : vector<16x16xf32> to vector<16x16xbf16>
    %36 = vector.extract_strided_slice %10 {offsets = [0, 0], sizes = [16, 32], strides = [1, 1]} : vector<16x128xbf16> to vector<16x32xbf16>
    %cst_15 = arith.constant dense<0.000000e+00> : vector<16x32xf32>
    %37 = tpu.matmul %35, %36, %cst_15 {dimension_numbers = #tpu.dot_dimension_numbers<[1], [0], [0], [1], [0, 0, 1, 1], [], []>} : vector<16x16xbf16>, vector<16x32xbf16>, vector<16x32xf32> -> vector<16x32xf32>
    %38 = vector.extract_strided_slice %14 {offsets = [0, 1], sizes = [16, 1], strides = [1, 1]} : vector<16x4xf32> to vector<16x1xf32>
    %39 = vector.extract_strided_slice %12 {offsets = [1, 0], sizes = [1, 16], strides = [1, 1]} : vector<4x16xf32> to vector<1x16xf32>
    %40 = vector.broadcast %38 : vector<16x1xf32> to vector<16x16xf32>
    %41 = vector.broadcast %39 : vector<1x16xf32> to vector<16x16xf32>
    %42 = arith.addf %40, %41 : vector<16x16xf32>
    %cst_16 = arith.constant 0.000000e+00 : f32
    %43 = vector.broadcast %cst_16 : f32 to vector<16x16xf32>
    %44 = arith.cmpf ogt, %42, %43 : vector<16x16xf32>
    %cst_17 = arith.constant 2.000000e-01 : f32
    %45 = vector.broadcast %cst_17 : f32 to vector<16x16xf32>
    %46 = arith.mulf %45, %42 : vector<16x16xf32>
    %47 = arith.select %44, %42, %46 : vector<16x16xi1>, vector<16x16xf32>
    %48 = arith.addf %47, %5 : vector<16x16xf32>
    %cst_18 = arith.constant dense<0xFF800000> : vector<16xf32>
    %49 = vector.multi_reduction <maximumf>, %48, %cst_18 [1] : vector<16x16xf32> to vector<16xf32>
    %50 = vector.shape_cast %49 : vector<16xf32> to vector<16x1xf32>
    %51 = vector.broadcast %50 : vector<16x1xf32> to vector<16x16xf32>
    %52 = arith.subf %48, %51 : vector<16x16xf32>
    %53 = math.exp %52 : vector<16x16xf32>
    %cst_19 = arith.constant dense<0.000000e+00> : vector<16xf32>
    %54 = vector.multi_reduction <add>, %53, %cst_19 [1] : vector<16x16xf32> to vector<16xf32>
    %55 = vector.shape_cast %54 : vector<16xf32> to vector<16x1xf32>
    %56 = vector.broadcast %55 : vector<16x1xf32> to vector<16x16xf32>
    %57 = arith.divf %53, %56 : vector<16x16xf32>
    %58 = arith.truncf %57 : vector<16x16xf32> to vector<16x16xbf16>
    %59 = vector.extract_strided_slice %10 {offsets = [0, 32], sizes = [16, 32], strides = [1, 1]} : vector<16x128xbf16> to vector<16x32xbf16>
    %cst_20 = arith.constant dense<0.000000e+00> : vector<16x32xf32>
    %60 = tpu.matmul %58, %59, %cst_20 {dimension_numbers = #tpu.dot_dimension_numbers<[1], [0], [0], [1], [0, 0, 1, 1], [], []>} : vector<16x16xbf16>, vector<16x32xbf16>, vector<16x32xf32> -> vector<16x32xf32>
    %61 = vector.extract_strided_slice %14 {offsets = [0, 2], sizes = [16, 1], strides = [1, 1]} : vector<16x4xf32> to vector<16x1xf32>
    %62 = vector.extract_strided_slice %12 {offsets = [2, 0], sizes = [1, 16], strides = [1, 1]} : vector<4x16xf32> to vector<1x16xf32>
    %63 = vector.broadcast %61 : vector<16x1xf32> to vector<16x16xf32>
    %64 = vector.broadcast %62 : vector<1x16xf32> to vector<16x16xf32>
    %65 = arith.addf %63, %64 : vector<16x16xf32>
    %cst_21 = arith.constant 0.000000e+00 : f32
    %66 = vector.broadcast %cst_21 : f32 to vector<16x16xf32>
    %67 = arith.cmpf ogt, %65, %66 : vector<16x16xf32>
    %cst_22 = arith.constant 2.000000e-01 : f32
    %68 = vector.broadcast %cst_22 : f32 to vector<16x16xf32>
    %69 = arith.mulf %68, %65 : vector<16x16xf32>
    %70 = arith.select %67, %65, %69 : vector<16x16xi1>, vector<16x16xf32>
    %71 = arith.addf %70, %5 : vector<16x16xf32>
    %cst_23 = arith.constant dense<0xFF800000> : vector<16xf32>
    %72 = vector.multi_reduction <maximumf>, %71, %cst_23 [1] : vector<16x16xf32> to vector<16xf32>
    %73 = vector.shape_cast %72 : vector<16xf32> to vector<16x1xf32>
    %74 = vector.broadcast %73 : vector<16x1xf32> to vector<16x16xf32>
    %75 = arith.subf %71, %74 : vector<16x16xf32>
    %76 = math.exp %75 : vector<16x16xf32>
    %cst_24 = arith.constant dense<0.000000e+00> : vector<16xf32>
    %77 = vector.multi_reduction <add>, %76, %cst_24 [1] : vector<16x16xf32> to vector<16xf32>
    %78 = vector.shape_cast %77 : vector<16xf32> to vector<16x1xf32>
    %79 = vector.broadcast %78 : vector<16x1xf32> to vector<16x16xf32>
    %80 = arith.divf %76, %79 : vector<16x16xf32>
    %81 = arith.truncf %80 : vector<16x16xf32> to vector<16x16xbf16>
    %82 = vector.extract_strided_slice %10 {offsets = [0, 64], sizes = [16, 32], strides = [1, 1]} : vector<16x128xbf16> to vector<16x32xbf16>
    %cst_25 = arith.constant dense<0.000000e+00> : vector<16x32xf32>
    %83 = tpu.matmul %81, %82, %cst_25 {dimension_numbers = #tpu.dot_dimension_numbers<[1], [0], [0], [1], [0, 0, 1, 1], [], []>} : vector<16x16xbf16>, vector<16x32xbf16>, vector<16x32xf32> -> vector<16x32xf32>
    %84 = vector.extract_strided_slice %14 {offsets = [0, 3], sizes = [16, 1], strides = [1, 1]} : vector<16x4xf32> to vector<16x1xf32>
    %85 = vector.extract_strided_slice %12 {offsets = [3, 0], sizes = [1, 16], strides = [1, 1]} : vector<4x16xf32> to vector<1x16xf32>
    %86 = vector.broadcast %84 : vector<16x1xf32> to vector<16x16xf32>
    %87 = vector.broadcast %85 : vector<1x16xf32> to vector<16x16xf32>
    %88 = arith.addf %86, %87 : vector<16x16xf32>
    %cst_26 = arith.constant 0.000000e+00 : f32
    %89 = vector.broadcast %cst_26 : f32 to vector<16x16xf32>
    %90 = arith.cmpf ogt, %88, %89 : vector<16x16xf32>
    %cst_27 = arith.constant 2.000000e-01 : f32
    %91 = vector.broadcast %cst_27 : f32 to vector<16x16xf32>
    %92 = arith.mulf %91, %88 : vector<16x16xf32>
    %93 = arith.select %90, %88, %92 : vector<16x16xi1>, vector<16x16xf32>
    %94 = arith.addf %93, %5 : vector<16x16xf32>
    %cst_28 = arith.constant dense<0xFF800000> : vector<16xf32>
    %95 = vector.multi_reduction <maximumf>, %94, %cst_28 [1] : vector<16x16xf32> to vector<16xf32>
    %96 = vector.shape_cast %95 : vector<16xf32> to vector<16x1xf32>
    %97 = vector.broadcast %96 : vector<16x1xf32> to vector<16x16xf32>
    %98 = arith.subf %94, %97 : vector<16x16xf32>
    %99 = math.exp %98 : vector<16x16xf32>
    %cst_29 = arith.constant dense<0.000000e+00> : vector<16xf32>
    %100 = vector.multi_reduction <add>, %99, %cst_29 [1] : vector<16x16xf32> to vector<16xf32>
    %101 = vector.shape_cast %100 : vector<16xf32> to vector<16x1xf32>
    %102 = vector.broadcast %101 : vector<16x1xf32> to vector<16x16xf32>
    %103 = arith.divf %99, %102 : vector<16x16xf32>
    %104 = arith.truncf %103 : vector<16x16xf32> to vector<16x16xbf16>
    %105 = vector.extract_strided_slice %10 {offsets = [0, 96], sizes = [16, 32], strides = [1, 1]} : vector<16x128xbf16> to vector<16x32xbf16>
    %cst_30 = arith.constant dense<0.000000e+00> : vector<16x32xf32>
    %106 = tpu.matmul %104, %105, %cst_30 {dimension_numbers = #tpu.dot_dimension_numbers<[1], [0], [0], [1], [0, 0, 1, 1], [], []>} : vector<16x16xbf16>, vector<16x32xbf16>, vector<16x32xf32> -> vector<16x32xf32>
    %107 = tpu.concatenate %37, %60, %83, %106 in 1 : vector<16x32xf32>, vector<16x32xf32>, vector<16x32xf32>, vector<16x32xf32> -> vector<16x128xf32>
    %c0_31 = arith.constant 0 : index
    %c0_32 = arith.constant 0 : index
    %108 = vector.load %arg5[%c0_31, %c0_32] : memref<8x128xbf16, #tpu.memory_space<vmem>>, vector<8x128xbf16>
    %cst_33 = arith.constant dense<0.000000e+00> : vector<16x128xf32>
    %109 = tpu.matmul %7, %108, %cst_33 {dimension_numbers = #tpu.dot_dimension_numbers<[1], [0], [0], [1], [0, 0, 1, 1], [], []>} : vector<16x8xbf16>, vector<8x128xbf16>, vector<16x128xf32> -> vector<16x128xf32>
    %110 = arith.addf %107, %109 : vector<16x128xf32>
    %cst_34 = arith.constant 0.000000e+00 : f32
    %111 = vector.broadcast %cst_34 : f32 to vector<16x128xf32>
    %112 = arith.maximumf %110, %111 : vector<16x128xf32>
    %113 = arith.truncf %112 : vector<16x128xf32> to vector<16x128xbf16>
    %c0_35 = arith.constant 0 : index
    %c0_36 = arith.constant 0 : index
    %114 = vector.load %arg6[%c0_35, %c0_36] : memref<128x128xbf16, #tpu.memory_space<vmem>>, vector<128x128xbf16>
    %cst_37 = arith.constant dense<0.000000e+00> : vector<16x128xf32>
    %115 = tpu.matmul %113, %114, %cst_37 {dimension_numbers = #tpu.dot_dimension_numbers<[1], [0], [0], [1], [0, 0, 1, 1], [], []>} : vector<16x128xbf16>, vector<128x128xbf16>, vector<16x128xf32> -> vector<16x128xf32>
    %116 = arith.truncf %115 : vector<16x128xf32> to vector<16x128xbf16>
    %c0_38 = arith.constant 0 : index
    %c0_39 = arith.constant 0 : index
    %117 = vector.load %arg7[%c0_38, %c0_39] : memref<4x128xbf16, #tpu.memory_space<vmem>>, vector<4x128xbf16>
    %cst_40 = arith.constant dense<0.000000e+00> : vector<4x16xf32>
    %118 = tpu.matmul %117, %116, %cst_40 {dimension_numbers = #tpu.dot_dimension_numbers<[1], [1], [0], [0], [0, 0, 1, 0], [], []>} : vector<4x128xbf16>, vector<16x128xbf16>, vector<4x16xf32> -> vector<4x16xf32>
    %c0_41 = arith.constant 0 : index
    %c0_42 = arith.constant 0 : index
    %119 = vector.load %arg8[%c0_41, %c0_42] : memref<4x128xbf16, #tpu.memory_space<vmem>>, vector<4x128xbf16>
    %cst_43 = arith.constant dense<0.000000e+00> : vector<16x4xf32>
    %120 = tpu.matmul %116, %119, %cst_43 {dimension_numbers = #tpu.dot_dimension_numbers<[1], [1], [0], [0], [0, 0, 1, 0], [], []>} : vector<16x128xbf16>, vector<4x128xbf16>, vector<16x4xf32> -> vector<16x4xf32>
    %121 = vector.extract_strided_slice %120 {offsets = [0, 0], sizes = [16, 1], strides = [1, 1]} : vector<16x4xf32> to vector<16x1xf32>
    %122 = vector.extract_strided_slice %118 {offsets = [0, 0], sizes = [1, 16], strides = [1, 1]} : vector<4x16xf32> to vector<1x16xf32>
    %123 = vector.broadcast %121 : vector<16x1xf32> to vector<16x16xf32>
    %124 = vector.broadcast %122 : vector<1x16xf32> to vector<16x16xf32>
    %125 = arith.addf %123, %124 : vector<16x16xf32>
    %cst_44 = arith.constant 0.000000e+00 : f32
    %126 = vector.broadcast %cst_44 : f32 to vector<16x16xf32>
    %127 = arith.cmpf ogt, %125, %126 : vector<16x16xf32>
    %cst_45 = arith.constant 2.000000e-01 : f32
    %128 = vector.broadcast %cst_45 : f32 to vector<16x16xf32>
    %129 = arith.mulf %128, %125 : vector<16x16xf32>
    %130 = arith.select %127, %125, %129 : vector<16x16xi1>, vector<16x16xf32>
    %131 = arith.addf %130, %5 : vector<16x16xf32>
    %cst_46 = arith.constant dense<0xFF800000> : vector<16xf32>
    %132 = vector.multi_reduction <maximumf>, %131, %cst_46 [1] : vector<16x16xf32> to vector<16xf32>
    %133 = vector.shape_cast %132 : vector<16xf32> to vector<16x1xf32>
    %134 = vector.broadcast %133 : vector<16x1xf32> to vector<16x16xf32>
    %135 = arith.subf %131, %134 : vector<16x16xf32>
    %136 = math.exp %135 : vector<16x16xf32>
    %cst_47 = arith.constant dense<0.000000e+00> : vector<16xf32>
    %137 = vector.multi_reduction <add>, %136, %cst_47 [1] : vector<16x16xf32> to vector<16xf32>
    %138 = vector.shape_cast %137 : vector<16xf32> to vector<16x1xf32>
    %139 = vector.broadcast %138 : vector<16x1xf32> to vector<16x16xf32>
    %140 = arith.divf %136, %139 : vector<16x16xf32>
    %141 = arith.truncf %140 : vector<16x16xf32> to vector<16x16xbf16>
    %142 = vector.extract_strided_slice %116 {offsets = [0, 0], sizes = [16, 32], strides = [1, 1]} : vector<16x128xbf16> to vector<16x32xbf16>
    %cst_48 = arith.constant dense<0.000000e+00> : vector<16x32xf32>
    %143 = tpu.matmul %141, %142, %cst_48 {dimension_numbers = #tpu.dot_dimension_numbers<[1], [0], [0], [1], [0, 0, 1, 1], [], []>} : vector<16x16xbf16>, vector<16x32xbf16>, vector<16x32xf32> -> vector<16x32xf32>
    %144 = vector.extract_strided_slice %120 {offsets = [0, 1], sizes = [16, 1], strides = [1, 1]} : vector<16x4xf32> to vector<16x1xf32>
    %145 = vector.extract_strided_slice %118 {offsets = [1, 0], sizes = [1, 16], strides = [1, 1]} : vector<4x16xf32> to vector<1x16xf32>
    %146 = vector.broadcast %144 : vector<16x1xf32> to vector<16x16xf32>
    %147 = vector.broadcast %145 : vector<1x16xf32> to vector<16x16xf32>
    %148 = arith.addf %146, %147 : vector<16x16xf32>
    %cst_49 = arith.constant 0.000000e+00 : f32
    %149 = vector.broadcast %cst_49 : f32 to vector<16x16xf32>
    %150 = arith.cmpf ogt, %148, %149 : vector<16x16xf32>
    %cst_50 = arith.constant 2.000000e-01 : f32
    %151 = vector.broadcast %cst_50 : f32 to vector<16x16xf32>
    %152 = arith.mulf %151, %148 : vector<16x16xf32>
    %153 = arith.select %150, %148, %152 : vector<16x16xi1>, vector<16x16xf32>
    %154 = arith.addf %153, %5 : vector<16x16xf32>
    %cst_51 = arith.constant dense<0xFF800000> : vector<16xf32>
    %155 = vector.multi_reduction <maximumf>, %154, %cst_51 [1] : vector<16x16xf32> to vector<16xf32>
    %156 = vector.shape_cast %155 : vector<16xf32> to vector<16x1xf32>
    %157 = vector.broadcast %156 : vector<16x1xf32> to vector<16x16xf32>
    %158 = arith.subf %154, %157 : vector<16x16xf32>
    %159 = math.exp %158 : vector<16x16xf32>
    %cst_52 = arith.constant dense<0.000000e+00> : vector<16xf32>
    %160 = vector.multi_reduction <add>, %159, %cst_52 [1] : vector<16x16xf32> to vector<16xf32>
    %161 = vector.shape_cast %160 : vector<16xf32> to vector<16x1xf32>
    %162 = vector.broadcast %161 : vector<16x1xf32> to vector<16x16xf32>
    %163 = arith.divf %159, %162 : vector<16x16xf32>
    %164 = arith.truncf %163 : vector<16x16xf32> to vector<16x16xbf16>
    %165 = vector.extract_strided_slice %116 {offsets = [0, 32], sizes = [16, 32], strides = [1, 1]} : vector<16x128xbf16> to vector<16x32xbf16>
    %cst_53 = arith.constant dense<0.000000e+00> : vector<16x32xf32>
    %166 = tpu.matmul %164, %165, %cst_53 {dimension_numbers = #tpu.dot_dimension_numbers<[1], [0], [0], [1], [0, 0, 1, 1], [], []>} : vector<16x16xbf16>, vector<16x32xbf16>, vector<16x32xf32> -> vector<16x32xf32>
    %167 = vector.extract_strided_slice %120 {offsets = [0, 2], sizes = [16, 1], strides = [1, 1]} : vector<16x4xf32> to vector<16x1xf32>
    %168 = vector.extract_strided_slice %118 {offsets = [2, 0], sizes = [1, 16], strides = [1, 1]} : vector<4x16xf32> to vector<1x16xf32>
    %169 = vector.broadcast %167 : vector<16x1xf32> to vector<16x16xf32>
    %170 = vector.broadcast %168 : vector<1x16xf32> to vector<16x16xf32>
    %171 = arith.addf %169, %170 : vector<16x16xf32>
    %cst_54 = arith.constant 0.000000e+00 : f32
    %172 = vector.broadcast %cst_54 : f32 to vector<16x16xf32>
    %173 = arith.cmpf ogt, %171, %172 : vector<16x16xf32>
    %cst_55 = arith.constant 2.000000e-01 : f32
    %174 = vector.broadcast %cst_55 : f32 to vector<16x16xf32>
    %175 = arith.mulf %174, %171 : vector<16x16xf32>
    %176 = arith.select %173, %171, %175 : vector<16x16xi1>, vector<16x16xf32>
    %177 = arith.addf %176, %5 : vector<16x16xf32>
    %cst_56 = arith.constant dense<0xFF800000> : vector<16xf32>
    %178 = vector.multi_reduction <maximumf>, %177, %cst_56 [1] : vector<16x16xf32> to vector<16xf32>
    %179 = vector.shape_cast %178 : vector<16xf32> to vector<16x1xf32>
    %180 = vector.broadcast %179 : vector<16x1xf32> to vector<16x16xf32>
    %181 = arith.subf %177, %180 : vector<16x16xf32>
    %182 = math.exp %181 : vector<16x16xf32>
    %cst_57 = arith.constant dense<0.000000e+00> : vector<16xf32>
    %183 = vector.multi_reduction <add>, %182, %cst_57 [1] : vector<16x16xf32> to vector<16xf32>
    %184 = vector.shape_cast %183 : vector<16xf32> to vector<16x1xf32>
    %185 = vector.broadcast %184 : vector<16x1xf32> to vector<16x16xf32>
    %186 = arith.divf %182, %185 : vector<16x16xf32>
    %187 = arith.truncf %186 : vector<16x16xf32> to vector<16x16xbf16>
    %188 = vector.extract_strided_slice %116 {offsets = [0, 64], sizes = [16, 32], strides = [1, 1]} : vector<16x128xbf16> to vector<16x32xbf16>
    %cst_58 = arith.constant dense<0.000000e+00> : vector<16x32xf32>
    %189 = tpu.matmul %187, %188, %cst_58 {dimension_numbers = #tpu.dot_dimension_numbers<[1], [0], [0], [1], [0, 0, 1, 1], [], []>} : vector<16x16xbf16>, vector<16x32xbf16>, vector<16x32xf32> -> vector<16x32xf32>
    %190 = vector.extract_strided_slice %120 {offsets = [0, 3], sizes = [16, 1], strides = [1, 1]} : vector<16x4xf32> to vector<16x1xf32>
    %191 = vector.extract_strided_slice %118 {offsets = [3, 0], sizes = [1, 16], strides = [1, 1]} : vector<4x16xf32> to vector<1x16xf32>
    %192 = vector.broadcast %190 : vector<16x1xf32> to vector<16x16xf32>
    %193 = vector.broadcast %191 : vector<1x16xf32> to vector<16x16xf32>
    %194 = arith.addf %192, %193 : vector<16x16xf32>
    %cst_59 = arith.constant 0.000000e+00 : f32
    %195 = vector.broadcast %cst_59 : f32 to vector<16x16xf32>
    %196 = arith.cmpf ogt, %194, %195 : vector<16x16xf32>
    %cst_60 = arith.constant 2.000000e-01 : f32
    %197 = vector.broadcast %cst_60 : f32 to vector<16x16xf32>
    %198 = arith.mulf %197, %194 : vector<16x16xf32>
    %199 = arith.select %196, %194, %198 : vector<16x16xi1>, vector<16x16xf32>
    %200 = arith.addf %199, %5 : vector<16x16xf32>
    %cst_61 = arith.constant dense<0xFF800000> : vector<16xf32>
    %201 = vector.multi_reduction <maximumf>, %200, %cst_61 [1] : vector<16x16xf32> to vector<16xf32>
    %202 = vector.shape_cast %201 : vector<16xf32> to vector<16x1xf32>
    %203 = vector.broadcast %202 : vector<16x1xf32> to vector<16x16xf32>
    %204 = arith.subf %200, %203 : vector<16x16xf32>
    %205 = math.exp %204 : vector<16x16xf32>
    %cst_62 = arith.constant dense<0.000000e+00> : vector<16xf32>
    %206 = vector.multi_reduction <add>, %205, %cst_62 [1] : vector<16x16xf32> to vector<16xf32>
    %207 = vector.shape_cast %206 : vector<16xf32> to vector<16x1xf32>
    %208 = vector.broadcast %207 : vector<16x1xf32> to vector<16x16xf32>
    %209 = arith.divf %205, %208 : vector<16x16xf32>
    %210 = arith.truncf %209 : vector<16x16xf32> to vector<16x16xbf16>
    %211 = vector.extract_strided_slice %116 {offsets = [0, 96], sizes = [16, 32], strides = [1, 1]} : vector<16x128xbf16> to vector<16x32xbf16>
    %cst_63 = arith.constant dense<0.000000e+00> : vector<16x32xf32>
    %212 = tpu.matmul %210, %211, %cst_63 {dimension_numbers = #tpu.dot_dimension_numbers<[1], [0], [0], [1], [0, 0, 1, 1], [], []>} : vector<16x16xbf16>, vector<16x32xbf16>, vector<16x32xf32> -> vector<16x32xf32>
    %213 = tpu.concatenate %143, %166, %189, %212 in 1 : vector<16x32xf32>, vector<16x32xf32>, vector<16x32xf32>, vector<16x32xf32> -> vector<16x128xf32>
    %214 = arith.addf %213, %112 : vector<16x128xf32>
    %cst_64 = arith.constant 0.000000e+00 : f32
    %215 = vector.broadcast %cst_64 : f32 to vector<16x128xf32>
    %216 = arith.maximumf %214, %215 : vector<16x128xf32>
    %217 = arith.truncf %216 : vector<16x128xf32> to vector<16x128xbf16>
    %c0_65 = arith.constant 0 : index
    %c0_66 = arith.constant 0 : index
    %218 = vector.load %arg9[%c0_65, %c0_66] : memref<128x128xbf16, #tpu.memory_space<vmem>>, vector<128x128xbf16>
    %cst_67 = arith.constant dense<0.000000e+00> : vector<16x128xf32>
    %219 = tpu.matmul %217, %218, %cst_67 {dimension_numbers = #tpu.dot_dimension_numbers<[1], [0], [0], [1], [0, 0, 1, 1], [], []>} : vector<16x128xbf16>, vector<128x128xbf16>, vector<16x128xf32> -> vector<16x128xf32>
    %220 = arith.truncf %219 : vector<16x128xf32> to vector<16x128xbf16>
    %c0_68 = arith.constant 0 : index
    %c0_69 = arith.constant 0 : index
    %221 = vector.load %arg10[%c0_68, %c0_69] : memref<4x128xbf16, #tpu.memory_space<vmem>>, vector<4x128xbf16>
    %cst_70 = arith.constant dense<0.000000e+00> : vector<4x16xf32>
    %222 = tpu.matmul %221, %220, %cst_70 {dimension_numbers = #tpu.dot_dimension_numbers<[1], [1], [0], [0], [0, 0, 1, 0], [], []>} : vector<4x128xbf16>, vector<16x128xbf16>, vector<4x16xf32> -> vector<4x16xf32>
    %c0_71 = arith.constant 0 : index
    %c0_72 = arith.constant 0 : index
    %223 = vector.load %arg11[%c0_71, %c0_72] : memref<4x128xbf16, #tpu.memory_space<vmem>>, vector<4x128xbf16>
    %cst_73 = arith.constant dense<0.000000e+00> : vector<16x4xf32>
    %224 = tpu.matmul %220, %223, %cst_73 {dimension_numbers = #tpu.dot_dimension_numbers<[1], [1], [0], [0], [0, 0, 1, 0], [], []>} : vector<16x128xbf16>, vector<4x128xbf16>, vector<16x4xf32> -> vector<16x4xf32>
    %225 = vector.extract_strided_slice %224 {offsets = [0, 0], sizes = [16, 1], strides = [1, 1]} : vector<16x4xf32> to vector<16x1xf32>
    %226 = vector.extract_strided_slice %222 {offsets = [0, 0], sizes = [1, 16], strides = [1, 1]} : vector<4x16xf32> to vector<1x16xf32>
    %227 = vector.broadcast %225 : vector<16x1xf32> to vector<16x16xf32>
    %228 = vector.broadcast %226 : vector<1x16xf32> to vector<16x16xf32>
    %229 = arith.addf %227, %228 : vector<16x16xf32>
    %cst_74 = arith.constant 0.000000e+00 : f32
    %230 = vector.broadcast %cst_74 : f32 to vector<16x16xf32>
    %231 = arith.cmpf ogt, %229, %230 : vector<16x16xf32>
    %cst_75 = arith.constant 2.000000e-01 : f32
    %232 = vector.broadcast %cst_75 : f32 to vector<16x16xf32>
    %233 = arith.mulf %232, %229 : vector<16x16xf32>
    %234 = arith.select %231, %229, %233 : vector<16x16xi1>, vector<16x16xf32>
    %235 = arith.addf %234, %5 : vector<16x16xf32>
    %cst_76 = arith.constant dense<0xFF800000> : vector<16xf32>
    %236 = vector.multi_reduction <maximumf>, %235, %cst_76 [1] : vector<16x16xf32> to vector<16xf32>
    %237 = vector.shape_cast %236 : vector<16xf32> to vector<16x1xf32>
    %238 = vector.broadcast %237 : vector<16x1xf32> to vector<16x16xf32>
    %239 = arith.subf %235, %238 : vector<16x16xf32>
    %240 = math.exp %239 : vector<16x16xf32>
    %cst_77 = arith.constant dense<0.000000e+00> : vector<16xf32>
    %241 = vector.multi_reduction <add>, %240, %cst_77 [1] : vector<16x16xf32> to vector<16xf32>
    %242 = vector.shape_cast %241 : vector<16xf32> to vector<16x1xf32>
    %243 = vector.broadcast %242 : vector<16x1xf32> to vector<16x16xf32>
    %244 = arith.divf %240, %243 : vector<16x16xf32>
    %245 = arith.truncf %244 : vector<16x16xf32> to vector<16x16xbf16>
    %246 = vector.extract_strided_slice %220 {offsets = [0, 0], sizes = [16, 32], strides = [1, 1]} : vector<16x128xbf16> to vector<16x32xbf16>
    %cst_78 = arith.constant dense<0.000000e+00> : vector<16x32xf32>
    %247 = tpu.matmul %245, %246, %cst_78 {dimension_numbers = #tpu.dot_dimension_numbers<[1], [0], [0], [1], [0, 0, 1, 1], [], []>} : vector<16x16xbf16>, vector<16x32xbf16>, vector<16x32xf32> -> vector<16x32xf32>
    %248 = vector.extract_strided_slice %224 {offsets = [0, 1], sizes = [16, 1], strides = [1, 1]} : vector<16x4xf32> to vector<16x1xf32>
    %249 = vector.extract_strided_slice %222 {offsets = [1, 0], sizes = [1, 16], strides = [1, 1]} : vector<4x16xf32> to vector<1x16xf32>
    %250 = vector.broadcast %248 : vector<16x1xf32> to vector<16x16xf32>
    %251 = vector.broadcast %249 : vector<1x16xf32> to vector<16x16xf32>
    %252 = arith.addf %250, %251 : vector<16x16xf32>
    %cst_79 = arith.constant 0.000000e+00 : f32
    %253 = vector.broadcast %cst_79 : f32 to vector<16x16xf32>
    %254 = arith.cmpf ogt, %252, %253 : vector<16x16xf32>
    %cst_80 = arith.constant 2.000000e-01 : f32
    %255 = vector.broadcast %cst_80 : f32 to vector<16x16xf32>
    %256 = arith.mulf %255, %252 : vector<16x16xf32>
    %257 = arith.select %254, %252, %256 : vector<16x16xi1>, vector<16x16xf32>
    %258 = arith.addf %257, %5 : vector<16x16xf32>
    %cst_81 = arith.constant dense<0xFF800000> : vector<16xf32>
    %259 = vector.multi_reduction <maximumf>, %258, %cst_81 [1] : vector<16x16xf32> to vector<16xf32>
    %260 = vector.shape_cast %259 : vector<16xf32> to vector<16x1xf32>
    %261 = vector.broadcast %260 : vector<16x1xf32> to vector<16x16xf32>
    %262 = arith.subf %258, %261 : vector<16x16xf32>
    %263 = math.exp %262 : vector<16x16xf32>
    %cst_82 = arith.constant dense<0.000000e+00> : vector<16xf32>
    %264 = vector.multi_reduction <add>, %263, %cst_82 [1] : vector<16x16xf32> to vector<16xf32>
    %265 = vector.shape_cast %264 : vector<16xf32> to vector<16x1xf32>
    %266 = vector.broadcast %265 : vector<16x1xf32> to vector<16x16xf32>
    %267 = arith.divf %263, %266 : vector<16x16xf32>
    %268 = arith.truncf %267 : vector<16x16xf32> to vector<16x16xbf16>
    %269 = vector.extract_strided_slice %220 {offsets = [0, 32], sizes = [16, 32], strides = [1, 1]} : vector<16x128xbf16> to vector<16x32xbf16>
    %cst_83 = arith.constant dense<0.000000e+00> : vector<16x32xf32>
    %270 = tpu.matmul %268, %269, %cst_83 {dimension_numbers = #tpu.dot_dimension_numbers<[1], [0], [0], [1], [0, 0, 1, 1], [], []>} : vector<16x16xbf16>, vector<16x32xbf16>, vector<16x32xf32> -> vector<16x32xf32>
    %271 = vector.extract_strided_slice %224 {offsets = [0, 2], sizes = [16, 1], strides = [1, 1]} : vector<16x4xf32> to vector<16x1xf32>
    %272 = vector.extract_strided_slice %222 {offsets = [2, 0], sizes = [1, 16], strides = [1, 1]} : vector<4x16xf32> to vector<1x16xf32>
    %273 = vector.broadcast %271 : vector<16x1xf32> to vector<16x16xf32>
    %274 = vector.broadcast %272 : vector<1x16xf32> to vector<16x16xf32>
    %275 = arith.addf %273, %274 : vector<16x16xf32>
    %cst_84 = arith.constant 0.000000e+00 : f32
    %276 = vector.broadcast %cst_84 : f32 to vector<16x16xf32>
    %277 = arith.cmpf ogt, %275, %276 : vector<16x16xf32>
    %cst_85 = arith.constant 2.000000e-01 : f32
    %278 = vector.broadcast %cst_85 : f32 to vector<16x16xf32>
    %279 = arith.mulf %278, %275 : vector<16x16xf32>
    %280 = arith.select %277, %275, %279 : vector<16x16xi1>, vector<16x16xf32>
    %281 = arith.addf %280, %5 : vector<16x16xf32>
    %cst_86 = arith.constant dense<0xFF800000> : vector<16xf32>
    %282 = vector.multi_reduction <maximumf>, %281, %cst_86 [1] : vector<16x16xf32> to vector<16xf32>
    %283 = vector.shape_cast %282 : vector<16xf32> to vector<16x1xf32>
    %284 = vector.broadcast %283 : vector<16x1xf32> to vector<16x16xf32>
    %285 = arith.subf %281, %284 : vector<16x16xf32>
    %286 = math.exp %285 : vector<16x16xf32>
    %cst_87 = arith.constant dense<0.000000e+00> : vector<16xf32>
    %287 = vector.multi_reduction <add>, %286, %cst_87 [1] : vector<16x16xf32> to vector<16xf32>
    %288 = vector.shape_cast %287 : vector<16xf32> to vector<16x1xf32>
    %289 = vector.broadcast %288 : vector<16x1xf32> to vector<16x16xf32>
    %290 = arith.divf %286, %289 : vector<16x16xf32>
    %291 = arith.truncf %290 : vector<16x16xf32> to vector<16x16xbf16>
    %292 = vector.extract_strided_slice %220 {offsets = [0, 64], sizes = [16, 32], strides = [1, 1]} : vector<16x128xbf16> to vector<16x32xbf16>
    %cst_88 = arith.constant dense<0.000000e+00> : vector<16x32xf32>
    %293 = tpu.matmul %291, %292, %cst_88 {dimension_numbers = #tpu.dot_dimension_numbers<[1], [0], [0], [1], [0, 0, 1, 1], [], []>} : vector<16x16xbf16>, vector<16x32xbf16>, vector<16x32xf32> -> vector<16x32xf32>
    %294 = vector.extract_strided_slice %224 {offsets = [0, 3], sizes = [16, 1], strides = [1, 1]} : vector<16x4xf32> to vector<16x1xf32>
    %295 = vector.extract_strided_slice %222 {offsets = [3, 0], sizes = [1, 16], strides = [1, 1]} : vector<4x16xf32> to vector<1x16xf32>
    %296 = vector.broadcast %294 : vector<16x1xf32> to vector<16x16xf32>
    %297 = vector.broadcast %295 : vector<1x16xf32> to vector<16x16xf32>
    %298 = arith.addf %296, %297 : vector<16x16xf32>
    %cst_89 = arith.constant 0.000000e+00 : f32
    %299 = vector.broadcast %cst_89 : f32 to vector<16x16xf32>
    %300 = arith.cmpf ogt, %298, %299 : vector<16x16xf32>
    %cst_90 = arith.constant 2.000000e-01 : f32
    %301 = vector.broadcast %cst_90 : f32 to vector<16x16xf32>
    %302 = arith.mulf %301, %298 : vector<16x16xf32>
    %303 = arith.select %300, %298, %302 : vector<16x16xi1>, vector<16x16xf32>
    %304 = arith.addf %303, %5 : vector<16x16xf32>
    %cst_91 = arith.constant dense<0xFF800000> : vector<16xf32>
    %305 = vector.multi_reduction <maximumf>, %304, %cst_91 [1] : vector<16x16xf32> to vector<16xf32>
    %306 = vector.shape_cast %305 : vector<16xf32> to vector<16x1xf32>
    %307 = vector.broadcast %306 : vector<16x1xf32> to vector<16x16xf32>
    %308 = arith.subf %304, %307 : vector<16x16xf32>
    %309 = math.exp %308 : vector<16x16xf32>
    %cst_92 = arith.constant dense<0.000000e+00> : vector<16xf32>
    %310 = vector.multi_reduction <add>, %309, %cst_92 [1] : vector<16x16xf32> to vector<16xf32>
    %311 = vector.shape_cast %310 : vector<16xf32> to vector<16x1xf32>
    %312 = vector.broadcast %311 : vector<16x1xf32> to vector<16x16xf32>
    %313 = arith.divf %309, %312 : vector<16x16xf32>
    %314 = arith.truncf %313 : vector<16x16xf32> to vector<16x16xbf16>
    %315 = vector.extract_strided_slice %220 {offsets = [0, 96], sizes = [16, 32], strides = [1, 1]} : vector<16x128xbf16> to vector<16x32xbf16>
    %cst_93 = arith.constant dense<0.000000e+00> : vector<16x32xf32>
    %316 = tpu.matmul %314, %315, %cst_93 {dimension_numbers = #tpu.dot_dimension_numbers<[1], [0], [0], [1], [0, 0, 1, 1], [], []>} : vector<16x16xbf16>, vector<16x32xbf16>, vector<16x32xf32> -> vector<16x32xf32>
    %317 = tpu.concatenate %247, %270, %293, %316 in 1 : vector<16x32xf32>, vector<16x32xf32>, vector<16x32xf32>, vector<16x32xf32> -> vector<16x128xf32>
    %318 = arith.addf %317, %216 : vector<16x128xf32>
    %319 = vector.extract_strided_slice %318 {offsets = [0, 0], sizes = [16, 32], strides = [1, 1]} : vector<16x128xf32> to vector<16x32xf32>
    %320 = vector.extract_strided_slice %318 {offsets = [0, 32], sizes = [16, 32], strides = [1, 1]} : vector<16x128xf32> to vector<16x32xf32>
    %321 = arith.addf %319, %320 : vector<16x32xf32>
    %322 = vector.extract_strided_slice %318 {offsets = [0, 64], sizes = [16, 32], strides = [1, 1]} : vector<16x128xf32> to vector<16x32xf32>
    %323 = arith.addf %321, %322 : vector<16x32xf32>
    %324 = vector.extract_strided_slice %318 {offsets = [0, 96], sizes = [16, 32], strides = [1, 1]} : vector<16x128xf32> to vector<16x32xf32>
    %325 = arith.addf %323, %324 : vector<16x32xf32>
    %cst_94 = arith.constant 2.500000e-01 : f32
    %326 = vector.broadcast %cst_94 : f32 to vector<16x32xf32>
    %327 = arith.mulf %325, %326 : vector<16x32xf32>
    %c0_95 = arith.constant 0 : index
    %c0_96 = arith.constant 0 : index
    %328 = vector.load %arg16[%c0_95, %c0_96] : memref<16x32xf32, #tpu.memory_space<vmem>>, vector<16x32xf32>
    tpu.vector_store %arg16[%c0_95, %c0_96], %327 {strides = array<i32>} : memref<16x32xf32, #tpu.memory_space<vmem>>, vector<16x32xf32>,
    %329 = vector.shape_cast %327 : vector<16x32xf32> to vector<16x1x32xf32>
    %330 = vector.shape_cast %327 : vector<16x32xf32> to vector<1x16x32xf32>
    %331 = vector.broadcast %329 : vector<16x1x32xf32> to vector<16x16x32xf32>
    %332 = vector.broadcast %330 : vector<1x16x32xf32> to vector<16x16x32xf32>
    %333 = arith.subf %331, %332 : vector<16x16x32xf32>
    %334 = math.absf %333 : vector<16x16x32xf32>
    %335 = vector.shape_cast %334 : vector<16x16x32xf32> to vector<256x32xf32>
    %336 = arith.truncf %335 : vector<256x32xf32> to vector<256x32xbf16>
    %c0_97 = arith.constant 0 : index
    %c0_98 = arith.constant 0 : index
    %337 = vector.load %arg12[%c0_97, %c0_98] : memref<32x32xbf16, #tpu.memory_space<vmem>>, vector<32x32xbf16>
    %cst_99 = arith.constant dense<0.000000e+00> : vector<256x32xf32>
    %338 = tpu.matmul %336, %337, %cst_99 {dimension_numbers = #tpu.dot_dimension_numbers<[1], [0], [0], [1], [0, 0, 1, 1], [], []>} : vector<256x32xbf16>, vector<32x32xbf16>, vector<256x32xf32> -> vector<256x32xf32>
    %c0_100 = arith.constant 0 : index
    %c0_101 = arith.constant 0 : index
    %339 = vector.load %arg13[%c0_100, %c0_101] : memref<1x32xf32, #tpu.memory_space<vmem>>, vector<1x32xf32>
    %340 = vector.broadcast %339 : vector<1x32xf32> to vector<256x32xf32>
    %341 = arith.addf %338, %340 : vector<256x32xf32>
    %cst_102 = arith.constant 0.000000e+00 : f32
    %342 = vector.broadcast %cst_102 : f32 to vector<256x32xf32>
    %343 = arith.maximumf %341, %342 : vector<256x32xf32>
    %344 = vector.shape_cast %343 : vector<256x32xf32> to vector<16x16x32xf32>
    %c0_103 = arith.constant 0 : index
    %c0_104 = arith.constant 0 : index
    %345 = vector.load %arg14[%c0_103, %c0_104] : memref<1x32xf32, #tpu.memory_space<vmem>>, vector<1x32xf32>
    %346 = vector.shape_cast %345 : vector<1x32xf32> to vector<1x1x32xf32>
    %347 = vector.broadcast %346 : vector<1x1x32xf32> to vector<16x16x32xf32>
    %348 = arith.mulf %344, %347 : vector<16x16x32xf32>
    %cst_105 = arith.constant dense<0.000000e+00> : vector<16x16xf32>
    %349 = vector.multi_reduction <add>, %348, %cst_105 [2] : vector<16x16x32xf32> to vector<16x16xf32>
    %c0_106 = arith.constant 0 : index
    %c0_107 = arith.constant 0 : index
    %350 = vector.load %arg15[%c0_106, %c0_107] : memref<1x1xf32, #tpu.memory_space<vmem>>, vector<1x1xf32>
    %351 = vector.broadcast %350 : vector<1x1xf32> to vector<16x16xf32>
    %352 = arith.addf %349, %351 : vector<16x16xf32>
    %353 = arith.negf %352 : vector<16x16xf32>
    %354 = math.exp %353 : vector<16x16xf32>
    %cst_108 = arith.constant 1.000000e+00 : f32
    %355 = vector.broadcast %cst_108 : f32 to vector<16x16xf32>
    %356 = arith.addf %355, %354 : vector<16x16xf32>
    %357 = arith.divf %355, %356 : vector<16x16xf32>
    %c0_109 = arith.constant 0 : index
    %c0_110 = arith.constant 0 : index
    %358 = vector.load %arg17[%c0_109, %c0_110] : memref<16x16xf32, #tpu.memory_space<vmem>>, vector<16x16xf32>
    tpu.vector_store %arg17[%c0_109, %c0_110], %357 {strides = array<i32>} : memref<16x16xf32, #tpu.memory_space<vmem>>, vector<16x16xf32>,
    return
  }
  func.func @transform_0(%arg0: i32) -> (i32, i32) {
    %c0_i32 = arith.constant 0 : i32
    %c0_i32_0 = arith.constant 0 : i32
    %c0_i32_1 = arith.constant 0 : i32
    return %c0_i32, %c0_i32_0 : i32, i32
  }
  func.func @transform_1(%arg0: i32) -> (i32, i32) {
    %c0_i32 = arith.constant 0 : i32
    %c0_i32_0 = arith.constant 0 : i32
    %c0_i32_1 = arith.constant 0 : i32
    return %c0_i32, %c0_i32_0 : i32, i32
  }
  func.func @transform_2(%arg0: i32) -> (i32, i32) {
    %c0_i32 = arith.constant 0 : i32
    %c0_i32_0 = arith.constant 0 : i32
    %c0_i32_1 = arith.constant 0 : i32
    return %c0_i32, %c0_i32_0 : i32, i32
  }
  func.func @transform_3(%arg0: i32) -> (i32, i32) {
    %c0_i32 = arith.constant 0 : i32
    %c0_i32_0 = arith.constant 0 : i32
    %c0_i32_1 = arith.constant 0 : i32
    return %c0_i32, %c0_i32_0 : i32, i32
  }
  func.func @transform_4(%arg0: i32) -> (i32, i32) {
    %c0_i32 = arith.constant 0 : i32
    %c0_i32_0 = arith.constant 0 : i32
    %c0_i32_1 = arith.constant 0 : i32
    return %c0_i32, %c0_i32_0 : i32, i32
  }
  func.func @transform_5(%arg0: i32) -> (i32, i32) {
    %c0_i32 = arith.constant 0 : i32
    %c0_i32_0 = arith.constant 0 : i32
    %c0_i32_1 = arith.constant 0 : i32
    return %c0_i32, %c0_i32_0 : i32, i32
  }
  func.func @transform_6(%arg0: i32) -> (i32, i32) {
    %c0_i32 = arith.constant 0 : i32
    %c0_i32_0 = arith.constant 0 : i32
    %c0_i32_1 = arith.constant 0 : i32
    return %c0_i32, %c0_i32_0 : i32, i32
  }
  func.func @transform_7(%arg0: i32) -> (i32, i32) {
    %c0_i32 = arith.constant 0 : i32
    %c0_i32_0 = arith.constant 0 : i32
    %c0_i32_1 = arith.constant 0 : i32
    return %c0_i32, %c0_i32_0 : i32, i32
  }
  func.func @transform_8(%arg0: i32) -> (i32, i32) {
    %c0_i32 = arith.constant 0 : i32
    %c0_i32_0 = arith.constant 0 : i32
    %c0_i32_1 = arith.constant 0 : i32
    return %c0_i32, %c0_i32_0 : i32, i32
  }
  func.func @transform_9(%arg0: i32) -> (i32, i32) {
    %c0_i32 = arith.constant 0 : i32
    %c0_i32_0 = arith.constant 0 : i32
    %c0_i32_1 = arith.constant 0 : i32
    return %c0_i32, %c0_i32_0 : i32, i32
  }
  func.func @transform_10(%arg0: i32) -> (i32, i32) {
    %c0_i32 = arith.constant 0 : i32
    %c0_i32_0 = arith.constant 0 : i32
    %c0_i32_1 = arith.constant 0 : i32
    return %c0_i32, %c0_i32_0 : i32, i32
  }
  func.func @transform_11(%arg0: i32) -> (i32, i32) {
    %c0_i32 = arith.constant 0 : i32
    %c0_i32_0 = arith.constant 0 : i32
    %c0_i32_1 = arith.constant 0 : i32
    return %c0_i32, %c0_i32_0 : i32, i32
  }
  func.func @transform_12(%arg0: i32) -> (i32, i32) {
    %c0_i32 = arith.constant 0 : i32
    %c0_i32_0 = arith.constant 0 : i32
    %c0_i32_1 = arith.constant 0 : i32
    return %c0_i32, %c0_i32_0 : i32, i32
  }
  func.func @transform_13(%arg0: i32) -> (i32, i32) {
    %c0_i32 = arith.constant 0 : i32
    %c0_i32_0 = arith.constant 0 : i32
    %c0_i32_1 = arith.constant 0 : i32
    return %c0_i32, %c0_i32_0 : i32, i32
  }
  func.func @transform_14(%arg0: i32) -> (i32, i32) {
    %c0_i32 = arith.constant 0 : i32
    %c0_i32_0 = arith.constant 0 : i32
    %c0_i32_1 = arith.constant 0 : i32
    return %c0_i32, %c0_i32_0 : i32, i32
  }
  func.func @transform_15(%arg0: i32) -> (i32, i32) {
    %c0_i32 = arith.constant 0 : i32
    %c0_i32_0 = arith.constant 0 : i32
    %c0_i32_1 = arith.constant 0 : i32
    return %c0_i32, %c0_i32_0 : i32, i32
  }
  func.func @transform_16(%arg0: i32) -> (i32, i32) {
    %c0_i32 = arith.constant 0 : i32
    %c0_i32_0 = arith.constant 0 : i32
    %c0_i32_1 = arith.constant 0 : i32
    return %c0_i32, %c0_i32_0 : i32, i32
  }
}

</mosaic_0001>

<bundles_post_ra>
// kernel: neg.3
= control target key start
LH: loop header
LB: loop body
LE: loop exit
PB: predicated region body
PF: predicated region fallthrough
CT: control target
= control target key end

     0   :  { %s24_s0 = inlined_call_operand.vmem [shape: f32[4,4], index: 0, kind: input, shape index: {}]   ;;  %s25_s1 = inlined_call_operand.vmem [shape: f32[4,4], index: 1, kind: output, shape index: {}]  }
   0x1   :  { %v2_v0 = vld [vmem:[%s24_s0] sm:$0xf] }
   0x2   :  { %v5_v1 = vxor.u32 2147483648, %v2_v0 }
   0x4   :  { %7 = vst [vmem:[%s25_s1] sm:$0xf] %v5_v1 }

// kernel: net_forward.1
= control target key start
LH: loop header
LB: loop body
LE: loop exit
PB: predicated region body
PF: predicated region fallthrough
CT: control target
= control target key end

     0   :  { %s4768_s0 = inlined_call_operand.vmem [shape: f32[16,8], index: 0, kind: input, shape index: {}]   ;;  %s4769_s1 = inlined_call_operand.vmem [shape: bf16[8,128], index: 1, kind: input, shape index: {}]   ;;  %s4770_s2 = inlined_call_operand.vmem [shape: bf16[4,128], index: 2, kind: input, shape index: {}]   ;;  %s4771_s3 = inlined_call_operand.vmem [shape: bf16[4,128], index: 3, kind: input, shape index: {}]   ;;  %s4772_s4 = inlined_call_operand.vmem [shape: bf16[8,128], index: 4, kind: input, shape index: {}]   ;;  %s4773_s5 = inlined_call_operand.vmem [shape: bf16[128,128], index: 5, kind: input, shape index: {}]   ;;  %s4774_s6 = inlined_call_operand.vmem [shape: bf16[4,128], index: 6, kind: input, shape index: {}]   ;;  %s4775_s7 = inlined_call_operand.vmem [shape: bf16[4,128], index: 7, kind: input, shape index: {}]   ;;  %s4776_s8 = inlined_call_operand.vmem [shape: bf16[128,128], index: 8, kind: input, shape index: {}]   ;;  %s4777_s9 = inlined_call_operand.hbm [shape: bf16[4,128], index: 9, kind: input, shape index: {}]   ;;  %s4778_s10 = inlined_call_operand.hbm [shape: bf16[4,128], index: 10, kind: input, shape index: {}]   ;;  %s4779_s11 = inlined_call_operand.hbm [shape: bf16[32,32], index: 11, kind: input, shape index: {}]   ;;  %s4780_s12 = inlined_call_operand.hbm [shape: f32[1,32], index: 12, kind: input, shape index: {}]   ;;  %s4781_s13 = inlined_call_operand.hbm [shape: f32[1,32], index: 13, kind: input, shape index: {}]   ;;  %s4782_s14 = inlined_call_operand.<no memory space> [shape: f32[1,1], index: 14, kind: input, shape index: {}]   ;;  %s4783_s15 = inlined_call_operand.vmem [shape: f32[16,32], index: 15, kind: output, shape index: {0}]   ;;  %s4784_s16 = inlined_call_operand.vmem [shape: f32[16,16], index: 16, kind: output, shape index: {1}]  }
   0x1   :  { %4786 = sst [smem:[#allocation14_spill]] %s4768_s0  ;;  %v22_v0 = vstv %s4782_s14 }
   0x2   :  { %23 = vst [vmem:[#allocation2] sm:$0x1] %v22_v0 }
   0x3   :  { %24 = vsyncpa [#allocation4], 0 }
   0x4   :  { %25 = vsyncpa [#allocation6], 0 }
   0x5   :  { %26 = vsyncpa [#allocation9], 0  ;;  %s3781_s23 = smov [#allocation5]   ;;  %s3782_s25 = smov [#allocation8]  }
   0x6   :  { %s61_s24 = sshll.u32 %s3781_s23, 4  ;;  %s83_s26 = sshll.u32 %s3782_s25, 4  ;;  %s62_s24 = int_to_ptr.vmem [resolvable:$true] %s61_s24  ;;  %s84_s26 = int_to_ptr.vmem [resolvable:$true] %s83_s26 }
   0x7   :  { %s3665_s29 = scalar_lea.hbm %s4778_s10, 32 }
   0x8   :  { %p3666_p0 = scmp.ne.s32.totalorder %s4778_s10, %s3665_s29  ;;  %p3669_p1 = scmp.lt.u32.totalorder %s3665_s29, %s4778_s10 }
   0xa   :  { %p3671_p2 = pnand %p3669_p1, %p3666_p0 }
   0xc   :  { %3674 = shalt.err (!%p3671_p2)
}
   0xd   :  { %s3675_s18 = scalar_lea.vmem %s62_s24, 32  ;;  %p3680_p4 = scmp.lt.s32.totalorder %s62_s24, %s62_s24 }
   0xe   :  { %p3676_p3 = scmp.ne.s32.totalorder %s62_s24, %s3675_s18  ;;  %p3681_p5 = scmp.lt.s32.totalorder %s3675_s18, %s3675_s18 }
  0x10   :  { %p3682_p6 = por %p3681_p5, %p3680_p4 }
  0x12   :  { %p3683_p7 = pnand %p3682_p6, %p3676_p3 }
  0x14   :  { %3686 = shalt.err (!%p3683_p7)
}
  0x15   :  { %64 = dma.hbm_to_vmem [thread:$0]  %s4778_s10, 32, %s62_s24, [#allocation6]  }
  0x16   :  { %s3687_s23 = scalar_lea.hbm %s4780_s12, 16 }
  0x17   :  { %p3688_p8 = scmp.ne.s32.totalorder %s4780_s12, %s3687_s23  ;;  %p3691_p9 = scmp.lt.u32.totalorder %s3687_s23, %s4780_s12 }
  0x19   :  { %p3693_p10 = pnand %p3691_p9, %p3688_p8 }
  0x1b   :  { %3696 = shalt.err (!%p3693_p10)
}
  0x1c   :  { %s3697_s30 = scalar_lea.vmem %s84_s26, 16  ;;  %s3701_s0 = scalar_lea.vmem %s84_s26, 32 }
  0x1d   :  { %p3698_p11 = scmp.ne.s32.totalorder %s84_s26, %s3697_s30  ;;  %p3702_p12 = scmp.lt.s32.totalorder %s84_s26, %s84_s26 }
  0x1e   :  { %p3703_p13 = scmp.lt.s32.totalorder %s3701_s0, %s3697_s30 }
  0x20   :  { %p3704_p0 = por %p3703_p13, %p3702_p12 }
  0x22   :  { %p3705_p1 = pnand %p3704_p0, %p3698_p11 }
  0x24   :  { %3708 = shalt.err (!%p3705_p1)
}
  0x25   :  { %86 = dma.hbm_to_vmem [thread:$0]  %s4780_s12, 16, %s84_s26, [#allocation9]  }
  0x26   :  { %s3783_s17 = smov [#allocation3]   ;;  %s3784_s18 = smov [#allocation7]  }
  0x27   :  { %s51_s14 = sshll.u32 %s3783_s17, 4  ;;  %s70_s19 = sshll.u32 %s3784_s18, 4  ;;  %s52_s14 = int_to_ptr.vmem [resolvable:$true] %s51_s14  ;;  %s3909_s19 = int_to_ptr.vmem [resolvable:$true] %s70_s19 }
  0x28   :  { %s3709_s22 = scalar_lea.hbm %s4777_s9, 32 }
  0x29   :  { %p3710_p2 = scmp.ne.s32.totalorder %s4777_s9, %s3709_s22  ;;  %p3713_p3 = scmp.lt.u32.totalorder %s3709_s22, %s4777_s9 }
  0x2b   :  { %p3715_p4 = pnand %p3713_p3, %p3710_p2 }
  0x2d   :  { %3718 = shalt.err (!%p3715_p4)
}
  0x2e   :  { %s3719_s12 = scalar_lea.vmem %s52_s14, 32  ;;  %p3724_p6 = scmp.lt.s32.totalorder %s52_s14, %s52_s14 }
  0x2f   :  { %p3720_p5 = scmp.ne.s32.totalorder %s52_s14, %s3719_s12  ;;  %p3725_p7 = scmp.lt.s32.totalorder %s3719_s12, %s3719_s12 }
  0x31   :  { %p3726_p8 = por %p3725_p7, %p3724_p6 }
  0x33   :  { %p3727_p9 = pnand %p3726_p8, %p3720_p5 }
  0x35   :  { %3730 = shalt.err (!%p3727_p9)
}
  0x36   :  { %54 = dma.hbm_to_vmem [thread:$0]  %s4777_s9, 32, %s52_s14, [#allocation4]  }
  0x37   :  { %s3731_s10 = scalar_lea.hbm %s4779_s11, 256 }
  0x38   :  { %p3732_p10 = scmp.ne.s32.totalorder %s4779_s11, %s3731_s10  ;;  %p3735_p11 = scmp.lt.u32.totalorder %s3731_s10, %s4779_s11 }
  0x3a   :  { %p3737_p12 = pnand %p3735_p11, %p3732_p10 }
  0x3c   :  { %3740 = shalt.err (!%p3737_p12)
}
  0x3d   :  { %s3741_s21 = scalar_lea.vmem %s3909_s19, 256  ;;  %p3746_p0 = scmp.lt.s32.totalorder %s3909_s19, %s3909_s19 }
  0x3e   :  { %p3742_p13 = scmp.ne.s32.totalorder %s3909_s19, %s3741_s21  ;;  %p3747_p1 = scmp.lt.s32.totalorder %s3741_s21, %s3741_s21 }
  0x40   :  { %p3748_p2 = por %p3747_p1, %p3746_p0 }
  0x42   :  { %p3749_p3 = pnand %p3748_p2, %p3742_p13 }
  0x44   :  { %3752 = shalt.err (!%p3749_p3)
}
  0x45   :  { %s3785_s9 = smov 64   ;;  %s3786_s14 = smov 4  }
  0x46   :  { %76 = dma.hbm_to_vmem [thread:$0]  %s4779_s11, 256, %s3909_s19, [#allocation6], %s3785_s9, %s3785_s9, %s3786_s14  }
  0x47   :  { %s3787_s25 = smov [#allocation10]   ;;  %s3753_s26 = scalar_lea.hbm %s4781_s13, 16 }
  0x48   :  { %s93_s27 = sshll.u32 %s3787_s25, 4  ;;  %p3754_p4 = scmp.ne.s32.totalorder %s4781_s13, %s3753_s26  ;;  %s94_s27 = int_to_ptr.vmem [resolvable:$true] %s93_s27 }
  0x49   :  { %p3757_p5 = scmp.lt.u32.totalorder %s3753_s26, %s4781_s13 }
  0x4b   :  { %p3759_p6 = pnand %p3757_p5, %p3754_p4 }
  0x4d   :  { %3762 = shalt.err (!%p3759_p6)
}
  0x4e   :  { %s3763_s24 = scalar_lea.vmem %s94_s27, 16  ;;  %s3767_s11 = scalar_lea.vmem %s94_s27, 32 }
  0x4f   :  { %p3764_p7 = scmp.ne.s32.totalorder %s94_s27, %s3763_s24  ;;  %p3768_p8 = scmp.lt.s32.totalorder %s94_s27, %s94_s27 }
  0x50   :  { %p3769_p9 = scmp.lt.s32.totalorder %s3767_s11, %s3763_s24 }
  0x52   :  { %p3770_p10 = por %p3769_p9, %p3768_p8 }
  0x54   :  { %p3771_p11 = pnand %p3770_p10, %p3764_p7 }
  0x56   :  { %3774 = shalt.err (!%p3771_p11)
}
  0x57   :  { %96 = dma.hbm_to_vmem [thread:$0]  %s4781_s13, 16, %s94_s27, [#allocation9]  }
  0x58   :  { %3775 = dma.done.wait [#allocation4], 32  }
  0x59   :  { %3776 = vsyncadd [#allocation4], 4294967264 }
  0x5a   :  { %3777 = dma.done.wait [#allocation6], 288  }
  0x5b   :  { %3778 = vsyncadd [#allocation6], 4294967008 }
  0x5c   :  { %3779 = dma.done.wait [#allocation9], 32  }
  0x5d   :  { %3780 = vsyncadd [#allocation9], 4294967264  ;;  %v3788_v1 = vmov 0.0   ;;  %vm3789_vm0 = vmmov 0   ;;  %vm132_vm1 = vcmask 1043456   ;;  %s4787_s14 = sld [smem:[#allocation14_spill]]  ;;  %v115_v26 = vlaneseq }
  0x5e   :  { %3190 = vmatprep.subr.bf16.mxu0 %v3788_v1  ;;  %3192 = vmatprep.mubr.msk.bf16.mxu0 %vm3789_vm0, %v3788_v1  ;;  %v127_v2 = vld [vmem:[%s4769_s1] sm:$0xf]  ;;  %vm128_vm2 = vcmask 64512   ;;  %v3790_v8 = vmov 1   ;;  %v3791_v9 = vmov 0   ;;  %v3792_v22 = vmov 2  }
  0x5f   :  { %3196 = vmatprep.subr.bf16.mxu1 %v3788_v1  ;;  %3198 = vmatprep.mubr.msk.bf16.mxu1 %vm3789_vm0, %v3788_v1  ;;  %v134_v4 = vsel %vm132_vm1, %v127_v2, 0  ;;  %v219_v7 = vld [vmem:[%s4771_s3] sm:$0x3]  ;;  %v3793_v25 = vmov 3   ;;  %v4005_v27 = vshrl.u32 %v115_v26, 7  ;;  %v4013_v30 = vand.u32 127, %v115_v26 }
  0x60   :  { %3191 = vmatpush3.bf16.msra.mxu0 %v134_v4  ;;  %3403 = vset.pattern.permute.xlu1 %v3790_v8  ;;  %v178_v15 = vld [vmem:[%s4770_s2] sm:$0x3]  ;;  %vm285_vm7 = vcmask 130048   ;;  %s3794_s2 = smov 96   ;;  %s3795_s28 = smov 32   ;;  %vm654_vm14 = vcmask 261120  }
  0x61   :  { %3202 = vmatprep.subr.bf16.mxu0 %v3788_v1  ;;  %3402 = vset.pattern.permute.xlu0 %v3791_v9  ;;  %v4008_v28 = vsub.s32 0, %v4005_v27  ;;  %v4011_v29 = vsub.s32 1, %v4005_v27  ;;  %v117_v33 = vadd.s32 8, %v4005_v27  ;;  %vm120_vm3 = vcmp.eq.s32.totalorder %v4005_v27, %v4013_v30 }
  0x62   :  { %v4023_v38 = vsel %vm120_vm3, -1e+30, %v3788_v1  ;;  %v4027_v43 = vsub.s32 2, %v4005_v27  ;;  %v4040_v58 = vsub.s32 3, %v4005_v27  ;;  %vm657_vm15 = vcmask 523264  }
  0x63   :  { %v124_v3 = vld [vmem:[%s4787_s14] sm:$0xff]  ;;  %v125_v5 = vld [vmem:[%s4787_s14 + $0x8] sm:$0xff]  ;;  %vm121_vm4 = vcmp.eq.s32.totalorder %v117_v33, %v4013_v30 }
  0x64   :  { %v3970_v6 = vpack.c.bf16 %v125_v5, %v124_v3  ;;  %v4034_v50 = vsel %vm121_vm4, -1e+30, %v3788_v1 }
  0x66   :  { %3193 = vmatmul.mubr.msk.bf16.vlgmr.msra.gmra.mrb[0].mxu0 %vm128_vm2, %v3970_v6 }
  0x67   :  { %3204 = vmatprep.mubr.msk.bf16.mxu0 %vm3789_vm0, %v3788_v1 }
  0x69   :  { %3203 = vmatpush3.bf16.xpose.msra.mxu0 %v219_v7 }
  0x6a   :  { %3214 = vmatprep.subr.bf16.mxu0 %v3788_v1 }
 0x139   :  { %v170_v10 = vpop.f32.mrb[0].mxu0 }
 0x13a   :  { %v3194_v11 = vpop.f32.mrb[1].mxu0 }
 0x13b   :  { %v173_v12 = vpop.f32.mrb[2].mxu0 }
 0x13c   :  { %v3983_v13 = vpack.c.bf16 %v173_v12, %v170_v10  ;;  %v3195_v14 = vpop.f32.mrb[3].mxu0 }
 0x13e   :  { %3197 = vmatpush3.bf16.xpose.msra.mxu1 %v3983_v13  ;;  %3205 = vmatmul.mubr.bf16.vlgmr.msra.gmra.mrb[4].mxu0 %v3983_v13 }
 0x13f   :  { %3208 = vmatprep.subr.bf16.mxu1 %v3788_v1  ;;  %3216 = vmatprep.mubr.msk.bf16.mxu0 %vm3789_vm0, %v3788_v1 }
 0x145   :  { %3199 = vmatmul.mubr.bf16.vlgmr.msra.gmra.mrb[0].mxu1 %v178_v15 }
 0x146   :  { %3209 = vmatpush3.bf16.msra.mxu1 %v3983_v13  ;;  %3210 = vmatprep.mubr.msk.bf16.mxu1 %vm3789_vm0, %v3788_v1 }
 0x147   :  { %3220 = vmatprep.subr.bf16.mxu1 %v3788_v1 }
 0x211   :  { %v254_v16 = vpop.f32.mrb[4].mxu0 }
 0x212   :  { %354 = vperm.xlu1 %3403, %v254_v16   ;;  %263 = vperm.xlu0 %3402, %v254_v16   ;;  %v3206_v17 = vpop.f32.mrb[5].mxu0 }
 0x213   :  { %v257_v18 = vpop.f32.mrb[6].mxu0 }
 0x214   :  { %v3207_v19 = vpop.f32.mrb[7].mxu0 }
 0x216   :  { %358 = vperm.xlu1 %3403, %v257_v18   ;;  %268 = vperm.xlu0 %3402, %v257_v18  }
 0x218   :  { %v3997_v20 = vpop.f32.mrb[0].mxu1 }
 0x219   :  { %v3200_v21 = vpop.f32.mrb[1].mxu1  ;;  %v364_v31 = vrot.slane %v3997_v20, %v4011_v29  ;;  %v274_v32 = vrot.slane %v3997_v20, %v4008_v28  ;;  %v457_v54 = vrot.slane %v3997_v20, %v4027_v43  ;;  %v549_v5 = vrot.slane %v3997_v20, %v4040_v58 }
 0x21a   :  { %3405 = vset.pattern.permute.xlu1 %v3792_v22  ;;  %3404 = vset.pattern.permute.xlu0 %v3792_v22  ;;  %v216_v23 = vpop.f32.mrb[2].mxu1 }
 0x21b   :  { %451 = vperm.xlu1 %3405, %v257_v18   ;;  %447 = vperm.xlu0 %3404, %v254_v16   ;;  %v3201_v24 = vpop.f32.mrb[3].mxu1 }
 0x21f   :  { %3406 = vset.pattern.permute.xlu1 %v3793_v25  ;;  %3407 = vset.pattern.permute.xlu0 %v3793_v25 }
 0x220   :  { %539 = vperm.xlu1 %3406, %v254_v16   ;;  %543 = vperm.xlu0 %3407, %v257_v18  }
 0x224   :  { %3408 = vset.pattern.permute.xlu1 %v3791_v9  ;;  %3410 = vset.pattern.permute.xlu0 %v3791_v9 }
 0x291   :  { %v355_v34 = vpop.permute.xlu1 %354  ;;  %v264_v35 = vpop.permute.xlu0 %263 }
 0x292   :  { %v365_v36 = vadd.f32 %v364_v31, %v355_v34  ;;  %v275_v37 = vadd.f32 %v274_v32, %v264_v35 }
 0x294   :  { %v369_v39 = vmul.f32 0.2, %v365_v36  ;;  %v279_v40 = vmul.f32 0.2, %v275_v37  ;;  %vm277_vm5 = vcmp.gt.f32.partialorder %v275_v37, 0.0  ;;  %vm367_vm6 = vcmp.gt.f32.partialorder %v365_v36, 0.0 }
 0x295   :  { %v359_v41 = vpop.permute.xlu1 %358  ;;  %v269_v42 = vpop.permute.xlu0 %268 }
 0x296   :  { %v366_v44 = vadd.f32 %v364_v31, %v359_v41  ;;  %v276_v45 = vadd.f32 %v274_v32, %v269_v42  ;;  %v281_v46 = vsel %vm277_vm5, %v275_v37, %v279_v40  ;;  %v371_v47 = vsel %vm367_vm6, %v365_v36, %v369_v39 }
 0x297   :  { %v283_v48 = vadd.f32 %v281_v46, %v4023_v38  ;;  %v4031_v49 = vadd.f32 %v371_v47, %v4023_v38 }
 0x298   :  { %v370_v51 = vmul.f32 0.2, %v366_v44  ;;  %v280_v52 = vmul.f32 0.2, %v276_v45  ;;  %vm278_vm8 = vcmp.gt.f32.partialorder %v276_v45, 0.0  ;;  %vm368_vm9 = vcmp.gt.f32.partialorder %v366_v44, 0.0 }
 0x299   :  { %v286_v53 = vsel %vm285_vm7, %v283_v48, -inf  ;;  %v375_v63 = vsel %vm285_vm7, %v4031_v49, -inf }
 0x29a   :  { %287 = vmax.xlane.f32.xlu1 %v286_v53  ;;  %v452_v55 = vpop.permute.xlu1 %451  ;;  %v448_v56 = vpop.permute.xlu0 %447  ;;  %v282_v57 = vsel %vm278_vm8, %v276_v45, %v280_v52  ;;  %v372_v59 = vsel %vm368_vm9, %v366_v44, %v370_v51 }
 0x29b   :  { %v459_v60 = vadd.f32 %v457_v54, %v452_v55  ;;  %v458_v61 = vadd.f32 %v457_v54, %v448_v56  ;;  %v284_v62 = vadd.f32 %v282_v57, %v4034_v50  ;;  %v374_v4 = vadd.f32 %v372_v59, %v4034_v50 }
 0x29d   :  { %v463_v0 = vmul.f32 0.2, %v459_v60  ;;  %v462_v2 = vmul.f32 0.2, %v458_v61  ;;  %v289_v3 = vsel %vm285_vm7, %v284_v62, -inf  ;;  %vm460_vm10 = vcmp.gt.f32.partialorder %v458_v61, 0.0 }
 0x29e   :  { %376 = vmax.xlane.f32.xlu1 %v375_v63  ;;  %290 = vmax.xlane.f32.xlu0 %v289_v3  ;;  %vm461_vm11 = vcmp.gt.f32.partialorder %v459_v60, 0.0  ;;  %v378_v17 = vsel %vm285_vm7, %v374_v4, -inf }
 0x29f   :  { %v540_v7 = vpop.permute.xlu1 %539  ;;  %v544_v10 = vpop.permute.xlu0 %543  ;;  %v464_v11 = vsel %vm460_vm10, %v458_v61, %v462_v2  ;;  %v465_v12 = vsel %vm461_vm11, %v459_v60, %v463_v0 }
 0x2a0   :  { %v550_v14 = vadd.f32 %v549_v5, %v540_v7  ;;  %v551_v15 = vadd.f32 %v549_v5, %v544_v10  ;;  %v466_v16 = vadd.f32 %v464_v11, %v4023_v38  ;;  %v467_v18 = vadd.f32 %v465_v12, %v4034_v50 }
 0x2a2   :  { %v554_v19 = vmul.f32 0.2, %v550_v14  ;;  %v555_v21 = vmul.f32 0.2, %v551_v15  ;;  %379 = vmax.xlane.f32.xlu0 %v378_v17  ;;  %v468_v23 = vsel %vm285_vm7, %v466_v16, -inf  ;;  %vm552_vm12 = vcmp.gt.f32.partialorder %v550_v14, 0.0 }
 0x2a3   :  { %469 = vmax.xlane.f32.xlu1 %v468_v23  ;;  %vm553_vm13 = vcmp.gt.f32.partialorder %v551_v15, 0.0  ;;  %v471_v26 = vsel %vm285_vm7, %v467_v18, -inf }
 0x2a4   :  { %v556_v20 = vsel %vm552_vm12, %v550_v14, %v554_v19  ;;  %v557_v24 = vsel %vm553_vm13, %v551_v15, %v555_v21 }
 0x2a5   :  { %v558_v31 = vadd.f32 %v556_v20, %v4023_v38  ;;  %v559_v32 = vadd.f32 %v557_v24, %v4034_v50 }
 0x2a6   :  { %472 = vmax.xlane.f32.xlu0 %v471_v26 }
 0x2a7   :  { %v560_v33 = vsel %vm285_vm7, %v558_v31, -inf  ;;  %v563_v34 = vsel %vm285_vm7, %v559_v32, -inf }
 0x2a8   :  { %561 = vmax.xlane.f32.xlu1 %v560_v33 }
 0x2aa   :  { %564 = vmax.xlane.f32.xlu0 %v563_v34 }
 0x2b9   :  { %399 = vrot.lane.b32.xlu1 %v3983_v13, %s3794_s2 }
 0x327   :  { %v288_v35 = vpop.xlane.xlu1 %287 }
 0x328   :  { %v292_v36 = vsub.f32 %v283_v48, %v288_v35 }
 0x32a   :  { %v294_v37 = vmul.f32 1.442695, %v292_v36 }
 0x32b   :  { %v377_v39 = vpop.xlane.xlu1 %376  ;;  %v291_v40 = vpop.xlane.xlu0 %290 }
 0x32c   :  { %3441 = vpow2.f32 %v294_v37  ;;  %v381_v41 = vsub.f32 %v4031_v49, %v377_v39  ;;  %v293_v42 = vsub.f32 %v284_v62, %v291_v40 }
 0x32e   :  { %v383_v44 = vmul.f32 1.442695, %v381_v41  ;;  %v296_v45 = vmul.f32 1.442695, %v293_v42 }
 0x32f   :  { %v380_v46 = vpop.xlane.xlu0 %379 }
 0x330   :  { %3443 = vpow2.f32 %v383_v44  ;;  %v382_v47 = vsub.f32 %v374_v4, %v380_v46  ;;  %v470_v51 = vpop.xlane.xlu1 %469 }
 0x331   :  { %3445 = vpow2.f32 %v296_v45  ;;  %v474_v52 = vsub.f32 %v466_v16, %v470_v51 }
 0x332   :  { %v385_v53 = vmul.f32 1.442695, %v382_v47 }
 0x333   :  { %v476_v54 = vmul.f32 1.442695, %v474_v52  ;;  %v473_v55 = vpop.xlane.xlu0 %472  ;;  %v663_v52 = vld [vmem:[%s4772_s4] sm:$0xf] }
 0x334   :  { %3447 = vpow2.f32 %v385_v53  ;;  %v475_v48 = vsub.f32 %v467_v18, %v473_v55 }
 0x335   :  { %3449 = vpow2.f32 %v476_v54  ;;  %v562_v56 = vpop.xlane.xlu1 %561 }
 0x336   :  { %v3442_v57 = vpop.eup %3441  ;;  %v478_v59 = vmul.f32 1.442695, %v475_v48  ;;  %v566_v60 = vsub.f32 %v558_v31, %v562_v56  ;;  %v665_v56 = vsel %vm132_vm1, %v663_v52, 0  ;;  %vm660_vm1 = vcmask 785408  }
 0x337   :  { %v565_v49 = vpop.xlane.xlu0 %564  ;;  %v298_v61 = vsel %vm285_vm7, %v3442_v57, 0.0 }
 0x338   :  { %3451 = vpow2.f32 %v478_v59  ;;  %v568_v62 = vmul.f32 1.442695, %v566_v60  ;;  %v567_v63 = vsub.f32 %v559_v32, %v565_v49  ;;  %299 = vadd.xlane.f32.xlu1 %v298_v61 }
 0x339   :  { %v400_v0 = vpop.permute.xlu1 %399 }
 0x33a   :  { %v3444_v2 = vpop.eup %3443  ;;  %3453 = vpow2.f32 %v568_v62  ;;  %v570_v3 = vmul.f32 1.442695, %v567_v63  ;;  %3215 = vmatpush3.bf16.msra.mxu0 %v400_v0  ;;  %v3423_v62 = vld [vmem:[%s4773_s5] sm:$0xff]   ;;  %v3424_v63 = vld [vmem:[%s4773_s5 + $0x8] sm:$0xff]   ;;  %v3425_v0 = vld [vmem:[%s4773_s5 + $0x10] sm:$0xff]  }
 0x33b   :  { %v3446_v4 = vpop.eup %3445  ;;  %v387_v5 = vsel %vm285_vm7, %v3444_v2, 0.0  ;;  %3226 = vmatprep.subr.bf16.mxu0 %v3788_v1 }
 0x33c   :  { %3455 = vpow2.f32 %v570_v3  ;;  %388 = vadd.xlane.f32.xlu1 %v387_v5  ;;  %v301_v7 = vsel %vm285_vm7, %v3446_v4, 0.0  ;;  %v3428_v3 = vld [vmem:[%s4773_s5 + $0x28] sm:$0xff]  }
 0x33d   :  { %302 = vadd.xlane.f32.xlu0 %v301_v7  ;;  %v3429_v7 = vld [vmem:[%s4773_s5 + $0x30] sm:$0xff]  }
 0x33e   :  { %v3448_v10 = vpop.eup %3447 }
 0x33f   :  { %v3450_v11 = vpop.eup %3449  ;;  %v390_v12 = vsel %vm285_vm7, %v3448_v10, 0.0 }
 0x340   :  { %v480_v14 = vsel %vm285_vm7, %v3450_v11, 0.0 }
 0x341   :  { %391 = vadd.xlane.f32.xlu0 %v390_v12  ;;  %481 = vadd.xlane.f32.xlu1 %v480_v14 }
 0x342   :  { %v3452_v15 = vpop.eup %3451 }
 0x343   :  { %v483_v16 = vsel %vm285_vm7, %v3452_v15, 0.0 }
 0x344   :  { %v3454_v17 = vpop.eup %3453 }
 0x345   :  { %484 = vadd.xlane.f32.xlu0 %v483_v16  ;;  %v572_v18 = vsel %vm285_vm7, %v3454_v17, 0.0 }
 0x346   :  { %v3456_v19 = vpop.eup %3455  ;;  %573 = vadd.xlane.f32.xlu1 %v572_v18 }
 0x347   :  { %v575_v21 = vsel %vm285_vm7, %v3456_v19, 0.0 }
 0x349   :  { %576 = vadd.xlane.f32.xlu0 %v575_v21 }
 0x357   :  { %583 = vrot.lane.b32.xlu1 %v3983_v13, %s3795_s28 }
 0x35f   :  { %491 = vrot.lane.b32.xlu0 %v3983_v13, %s3785_s9 }
 0x3c5   :  { %v300_v23 = vpop.xlane.xlu1 %299 }
 0x3c6   :  { %3457 = vrcp.f32 %v300_v23 }
 0x3c9   :  { %v389_v20 = vpop.xlane.xlu1 %388 }
 0x3ca   :  { %v303_v24 = vpop.xlane.xlu0 %302 }
 0x3cb   :  { %3459 = vrcp.f32 %v303_v24 }
 0x3cc   :  { %3461 = vrcp.f32 %v389_v20 }
 0x3ce   :  { %v392_v26 = vpop.xlane.xlu0 %391  ;;  %v482_v31 = vpop.xlane.xlu1 %481 }
 0x3cf   :  { %3463 = vrcp.f32 %v392_v26 }
 0x3d0   :  { %3465 = vrcp.f32 %v482_v31  ;;  %v3458_v33 = vpop.eup %3457 }
 0x3d1   :  { %v305_v36 = vmul.f32 %v3458_v33, %v3442_v57 }
 0x3d2   :  { %v485_v32 = vpop.xlane.xlu0 %484 }
 0x3d3   :  { %3467 = vrcp.f32 %v485_v32  ;;  %v574_v34 = vpop.xlane.xlu1 %573 }
 0x3d4   :  { %3469 = vrcp.f32 %v574_v34 }
 0x3d5   :  { %v3460_v35 = vpop.eup %3459 }
 0x3d6   :  { %v307_v37 = vmul.f32 %v3460_v35, %v3446_v4  ;;  %v577_v39 = vpop.xlane.xlu0 %576  ;;  %v3462_v13 = vpop.eup %3461 }
 0x3d7   :  { %3471 = vrcp.f32 %v577_v39  ;;  %v394_v42 = vmul.f32 %v3462_v13, %v3444_v2  ;;  %v584_v55 = vpop.permute.xlu1 %583  ;;  %v3427_v2 = vld [vmem:[%s4773_s5 + $0x20] sm:$0xff]  }
 0x3d8   :  { %v308_v40 = vpack.c.bf16 %v307_v37, %v305_v36 }
 0x3d9   :  { %v3464_v41 = vpop.eup %3463 }
 0x3da   :  { %v396_v44 = vmul.f32 %v3464_v41, %v3448_v10  ;;  %3211 = vmatmul.mubr.msk.bf16.vlgmr.msra.gmra.mrb[4].mxu1 %vm285_vm7, %v308_v40  ;;  %v492_v45 = vpop.permute.xlu0 %491  ;;  %v3466_v46 = vpop.eup %3465 }
 0x3db   :  { %3221 = vmatpush3.bf16.msra.mxu1 %v492_v45  ;;  %3222 = vmatprep.mubr.msk.bf16.mxu1 %vm3789_vm0, %v3788_v1  ;;  %v487_v53 = vmul.f32 %v3466_v46, %v3450_v11 }
 0x3dc   :  { %v397_v47 = vpack.c.bf16 %v396_v44, %v394_v42  ;;  %3232 = vmatprep.subr.bf16.mxu1 %v3788_v1 }
 0x3dd   :  { %v3468_v51 = vpop.eup %3467 }
 0x3de   :  { %v489_v54 = vmul.f32 %v3468_v51, %v3452_v15  ;;  %3217 = vmatmul.mubr.msk.bf16.vlgmr.msra.gmra.mrb[8].mxu0 %vm285_vm7, %v397_v47  ;;  %v3470_v48 = vpop.eup %3469  ;;  %v3430_v15 = vld [vmem:[%s4773_s5 + $0x38] sm:$0xff]  }
 0x3df   :  { %3227 = vmatpush3.bf16.msra.mxu0 %v584_v55  ;;  %3228 = vmatprep.mubr.msk.bf16.mxu0 %vm3789_vm0, %v3788_v1  ;;  %v579_v60 = vmul.f32 %v3470_v48, %v3454_v17 }
 0x3e0   :  { %v490_v57 = vpack.c.bf16 %v489_v54, %v487_v53  ;;  %3282 = vmatprep.subr.bf16.mxu0 %v3788_v1 }
 0x3e1   :  { %v3472_v59 = vpop.eup %3471 }
 0x3e2   :  { %v581_v49 = vmul.f32 %v3472_v59, %v3456_v19  ;;  %3223 = vmatmul.mubr.msk.bf16.vlgmr.msra.gmra.mrb[8].mxu1 %vm285_vm7, %v490_v57 }
 0x3e3   :  { %3233 = vmatpush3.bf16.msra.mxu1 %v665_v56  ;;  %3234 = vmatprep.mubr.msk.bf16.mxu1 %vm3789_vm0, %v3788_v1 }
 0x3e4   :  { %v582_v61 = vpack.c.bf16 %v581_v49, %v579_v60  ;;  %3238 = vmatprep.subr.bf16.mxu1 %v3788_v1 }
 0x3e6   :  { %3229 = vmatmul.mubr.msk.bf16.vlgmr.msra.gmra.mrb[12].mxu0 %vm285_vm7, %v582_v61  ;;  %v819_v61 = vld [vmem:[%s4774_s6] sm:$0x3] }
 0x3e7   :  { %3284 = vmatprep.mubr.msk.bf16.mxu0 %vm3789_vm0, %v3788_v1 }
 0x3ea   :  { %3235 = vmatmul.mubr.msk.bf16.vlgmr.msra.gmra.mrb[12].mxu1 %vm128_vm2, %v3970_v6  ;;  %v3426_v6 = vld [vmem:[%s4773_s5 + $0x18] sm:$0xff]  }
 0x3eb   :  { %3254 = vmatprep.mubr.msk.bf16.mxu1 %vm3789_vm0, %v3788_v1  ;;  %3239 = vmatpush3.bf16.msra.mxu1 %v3423_v62  ;;  %v860_v62 = vld [vmem:[%s4775_s7] sm:$0x3] }
 0x3ec   :  { %3240 = vmatprep.subr.bf16.mxu1 %v3788_v1 }
 0x3ef   :  { %3241 = vmatpush3.bf16.msra.mxu1 %v3424_v63 }
 0x3f0   :  { %3242 = vmatprep.subr.bf16.mxu1 %v3788_v1 }
 0x3f3   :  { %3243 = vmatpush3.bf16.msra.mxu1 %v3425_v0 }
 0x3f4   :  { %3244 = vmatprep.subr.bf16.mxu1 %v3788_v1 }
 0x3f7   :  { %3245 = vmatpush3.bf16.msra.mxu1 %v3426_v6 }
 0x3f8   :  { %3246 = vmatprep.subr.bf16.mxu1 %v3788_v1 }
 0x3fb   :  { %3247 = vmatpush3.bf16.msra.mxu1 %v3427_v2 }
 0x3fc   :  { %3248 = vmatprep.subr.bf16.mxu1 %v3788_v1 }
 0x3ff   :  { %3249 = vmatpush3.bf16.msra.mxu1 %v3428_v3 }
 0x400   :  { %3250 = vmatprep.subr.bf16.mxu1 %v3788_v1 }
 0x403   :  { %3251 = vmatpush3.bf16.msra.mxu1 %v3429_v7 }
 0x404   :  { %3252 = vmatprep.subr.bf16.mxu1 %v3788_v1 }
 0x407   :  { %3253 = vmatpush3.bf16.msra.mxu1 %v3430_v15 }
 0x408   :  { %3258 = vmatprep.subr.bf16.mxu1 %v3788_v1 }
 0x4ad   :  { %v346_v4 = vpop.f32.mrb[4].mxu1 }
 0x4ae   :  { %v3212_v5 = vpop.f32.mrb[5].mxu1 }
 0x4af   :  { %v349_v10 = vpop.f32.mrb[6].mxu1 }
 0x4b0   :  { %v3213_v11 = vpop.f32.mrb[7].mxu1 }
 0x4b1   :  { %v439_v12 = vpop.f32.mrb[8].mxu0 }
 0x4b2   :  { %632 = vrot.lane.b32.xlu1 %v439_v12, %s3795_s28  ;;  %v3218_v14 = vpop.f32.mrb[9].mxu0 }
 0x4b3   :  { %v442_v16 = vpop.f32.mrb[10].mxu0 }
 0x4b4   :  { %634 = vrot.lane.b32.xlu0 %v442_v16, %s3795_s28  ;;  %v3219_v17 = vpop.f32.mrb[11].mxu0 }
 0x4b5   :  { %v531_v18 = vpop.f32.mrb[8].mxu1 }
 0x4b6   :  { %v3224_v19 = vpop.f32.mrb[9].mxu1  ;;  %640 = vrot.lane.b32.xlu1 %v531_v18, %s3785_s9 }
 0x4b7   :  { %v534_v21 = vpop.f32.mrb[10].mxu1 }
 0x4b8   :  { %v3225_v23 = vpop.f32.mrb[11].mxu1  ;;  %642 = vrot.lane.b32.xlu0 %v534_v21, %s3785_s9 }
 0x4b9   :  { %v623_v20 = vpop.f32.mrb[12].mxu0 }
 0x4ba   :  { %648 = vrot.lane.b32.xlu1 %v623_v20, %s3794_s2  ;;  %v3230_v24 = vpop.f32.mrb[13].mxu0 }
 0x4bb   :  { %v626_v26 = vpop.f32.mrb[14].mxu0 }
 0x4bc   :  { %650 = vrot.lane.b32.xlu0 %v626_v26, %s3794_s2  ;;  %v3231_v31 = vpop.f32.mrb[15].mxu0 }
 0x4bd   :  { %v701_v32 = vpop.f32.mrb[12].mxu1 }
 0x4be   :  { %v3236_v33 = vpop.f32.mrb[13].mxu1 }
 0x4bf   :  { %v704_v34 = vpop.f32.mrb[14].mxu1 }
 0x4c0   :  { %v3237_v35 = vpop.f32.mrb[15].mxu1 }
 0x524   :  { %v633_v36 = vpop.permute.xlu1 %632 }
 0x525   :  { %v655_v40 = vsel %vm654_vm14, %v346_v4, %v633_v36 }
 0x526   :  { %v635_v37 = vpop.permute.xlu0 %634 }
 0x527   :  { %v656_v44 = vsel %vm654_vm14, %v349_v10, %v635_v37 }
 0x528   :  { %v641_v39 = vpop.permute.xlu1 %640 }
 0x529   :  { %v658_v41 = vsel %vm657_vm15, %v655_v40, %v641_v39 }
 0x52a   :  { %v643_v13 = vpop.permute.xlu0 %642 }
 0x52b   :  { %v659_v46 = vsel %vm657_vm15, %v656_v44, %v643_v13 }
 0x52c   :  { %v649_v42 = vpop.permute.xlu1 %648 }
 0x52d   :  { %v661_v45 = vsel %vm660_vm1, %v658_v41, %v649_v42 }
 0x52e   :  { %v4140_v47 = vadd.f32 %v701_v32, %v661_v45  ;;  %v651_v51 = vpop.permute.xlu0 %650 }
 0x52f   :  { %v662_v52 = vsel %vm660_vm1, %v659_v46, %v651_v51 }
 0x530   :  { %v4143_v53 = vadd.f32 %v704_v34, %v662_v52  ;;  %v710_v54 = vmax.f32 %v4140_v47, 0.0 }
 0x532   :  { %v711_v55 = vmax.f32 %v4143_v53, 0.0 }
 0x534   :  { %v712_v48 = vpack.c.bf16 %v711_v55, %v710_v54 }
 0x536   :  { %3255 = vmatmul.mubr.bf16.vlgmr.msra.gmra.mrb[16].mxu1 %v712_v48 }
 0x537   :  { %3260 = vmatprep.mubr.msk.bf16.mxu1 %vm3789_vm0, %v3788_v1 }
 0x609   :  { %v811_v56 = vpop.f32.mrb[16].mxu1 }
 0x60a   :  { %v3256_v57 = vpop.f32.mrb[17].mxu1 }
 0x60b   :  { %v814_v59 = vpop.f32.mrb[18].mxu1 }
 0x60c   :  { %v4153_v60 = vpack.c.bf16 %v814_v59, %v811_v56  ;;  %v3257_v49 = vpop.f32.mrb[19].mxu1 }
 0x60e   :  { %3259 = vmatpush3.bf16.xpose.msra.mxu1 %v4153_v60 }
 0x60f   :  { %3264 = vmatprep.subr.bf16.mxu1 %v3788_v1 }
 0x615   :  { %3261 = vmatmul.mubr.bf16.vlgmr.msra.gmra.mrb[20].mxu1 %v819_v61 }
 0x616   :  { %3265 = vmatpush3.bf16.xpose.msra.mxu1 %v860_v62  ;;  %3266 = vmatprep.mubr.msk.bf16.mxu1 %vm3789_vm0, %v3788_v1 }
 0x617   :  { %3270 = vmatprep.subr.bf16.mxu1 %v3788_v1 }
 0x61d   :  { %3267 = vmatmul.mubr.bf16.vlgmr.msra.gmra.mrb[24].mxu1 %v4153_v60 }
 0x61e   :  { %3271 = vmatpush3.bf16.msra.mxu1 %v4153_v60  ;;  %3272 = vmatprep.mubr.msk.bf16.mxu1 %vm3789_vm0, %v3788_v1 }
 0x61f   :  { %3276 = vmatprep.subr.bf16.mxu1 %v3788_v1 }
 0x6e8   :  { %v854_v63 = vpop.f32.mrb[20].mxu1 }
 0x6e9   :  { %v3262_v0 = vpop.f32.mrb[21].mxu1  ;;  %v915_v10 = vrot.slane %v854_v63, %v4008_v28  ;;  %v1004_v17 = vrot.slane %v854_v63, %v4011_v29  ;;  %v1097_v20 = vrot.slane %v854_v63, %v4027_v43  ;;  %v1189_v40 = vrot.slane %v854_v63, %v4040_v58 }
 0x6ea   :  { %v857_v6 = vpop.f32.mrb[22].mxu1 }
 0x6eb   :  { %v3263_v2 = vpop.f32.mrb[23].mxu1 }
 0x6f0   :  { %v895_v3 = vpop.f32.mrb[24].mxu1 }
 0x6f1   :  { %904 = vperm.xlu1 %3408, %v895_v3   ;;  %v3268_v4 = vpop.f32.mrb[25].mxu1 }
 0x6f2   :  { %v898_v5 = vpop.f32.mrb[26].mxu1 }
 0x6f3   :  { %909 = vperm.xlu0 %3410, %v898_v5   ;;  %v3269_v7 = vpop.f32.mrb[27].mxu1 }
 0x6f5   :  { %3409 = vset.pattern.permute.xlu1 %v3790_v8 }
 0x6f6   :  { %994 = vperm.xlu1 %3409, %v895_v3  }
 0x6f7   :  { %3411 = vset.pattern.permute.xlu0 %v3792_v22 }
 0x6f8   :  { %1087 = vperm.xlu0 %3411, %v895_v3  }
 0x6fa   :  { %998 = vperm.xlu1 %3409, %v898_v5  }
 0x6fc   :  { %3414 = vset.pattern.permute.xlu0 %v3793_v25 }
 0x6fd   :  { %1183 = vperm.xlu0 %3414, %v898_v5  }
 0x6fe   :  { %3412 = vset.pattern.permute.xlu1 %v3792_v22 }
 0x6ff   :  { %1091 = vperm.xlu1 %3412, %v898_v5  }
 0x701   :  { %3417 = vset.pattern.permute.xlu0 %v3791_v9 }
 0x703   :  { %3413 = vset.pattern.permute.xlu1 %v3793_v25 }
 0x704   :  { %1179 = vperm.xlu1 %3413, %v895_v3  }
 0x708   :  { %3415 = vset.pattern.permute.xlu1 %v3791_v9 }
 0x770   :  { %v905_v11 = vpop.permute.xlu1 %904 }
 0x771   :  { %v916_v12 = vadd.f32 %v915_v10, %v905_v11 }
 0x772   :  { %v910_v14 = vpop.permute.xlu0 %909 }
 0x773   :  { %v920_v15 = vmul.f32 0.2, %v916_v12  ;;  %v917_v16 = vadd.f32 %v915_v10, %v910_v14  ;;  %vm918_vm2 = vcmp.gt.f32.partialorder %v916_v12, 0.0 }
 0x775   :  { %v921_v18 = vmul.f32 0.2, %v917_v16  ;;  %v995_v19 = vpop.permute.xlu1 %994  ;;  %v922_v21 = vsel %vm918_vm2, %v916_v12, %v920_v15  ;;  %vm919_vm3 = vcmp.gt.f32.partialorder %v917_v16, 0.0 }
 0x776   :  { %v1005_v23 = vadd.f32 %v1004_v17, %v995_v19  ;;  %v924_v24 = vadd.f32 %v922_v21, %v4023_v38 }
 0x777   :  { %v1088_v26 = vpop.permute.xlu0 %1087  ;;  %v923_v31 = vsel %vm919_vm3, %v917_v16, %v921_v18 }
 0x778   :  { %v1009_v32 = vmul.f32 0.2, %v1005_v23  ;;  %v1098_v33 = vadd.f32 %v1097_v20, %v1088_v26  ;;  %v926_v34 = vsel %vm285_vm7, %v924_v24, -inf  ;;  %v925_v35 = vadd.f32 %v923_v31, %v4034_v50 }
 0x779   :  { %927 = vmax.xlane.f32.xlu1 %v926_v34  ;;  %v999_v36 = vpop.permute.xlu1 %998  ;;  %vm1007_vm4 = vcmp.gt.f32.partialorder %v1005_v23, 0.0 }
 0x77a   :  { %vm1100_vm5 = vcmp.gt.f32.partialorder %v1098_v33, 0.0  ;;  %v1102_v37 = vmul.f32 0.2, %v1098_v33  ;;  %v1006_v39 = vadd.f32 %v1004_v17, %v999_v36  ;;  %v929_v13 = vsel %vm285_vm7, %v925_v35, -inf }
 0x77b   :  { %930 = vmax.xlane.f32.xlu0 %v929_v13  ;;  %v1011_v41 = vsel %vm1007_vm4, %v1005_v23, %v1009_v32 }
 0x77c   :  { %v1010_v42 = vmul.f32 0.2, %v1006_v39  ;;  %v1184_v44 = vpop.permute.xlu0 %1183  ;;  %v1013_v45 = vadd.f32 %v1011_v41, %v4023_v38  ;;  %vm1008_vm6 = vcmp.gt.f32.partialorder %v1006_v39, 0.0  ;;  %v1104_v46 = vsel %vm1100_vm5, %v1098_v33, %v1102_v37 }
 0x77d   :  { %v1191_v51 = vadd.f32 %v1189_v40, %v1184_v44  ;;  %v1106_v57 = vadd.f32 %v1104_v46, %v4023_v38 }
 0x77e   :  { %v1015_v52 = vsel %vm285_vm7, %v1013_v45, -inf  ;;  %v1092_v48 = vpop.permute.xlu1 %1091  ;;  %v1012_v56 = vsel %vm1008_vm6, %v1006_v39, %v1010_v42 }
 0x77f   :  { %v1195_v59 = vmul.f32 0.2, %v1191_v51  ;;  %1016 = vmax.xlane.f32.xlu1 %v1015_v52  ;;  %v1099_v49 = vadd.f32 %v1097_v20, %v1092_v48  ;;  %v1014_v61 = vadd.f32 %v1012_v56, %v4034_v50  ;;  %vm1193_vm8 = vcmp.gt.f32.partialorder %v1191_v51, 0.0 }
 0x780   :  { %v1108_v0 = vsel %vm285_vm7, %v1106_v57, -inf }
 0x781   :  { %v1103_v62 = vmul.f32 0.2, %v1099_v49  ;;  %v1018_v63 = vsel %vm285_vm7, %v1014_v61, -inf  ;;  %vm1101_vm9 = vcmp.gt.f32.partialorder %v1099_v49, 0.0  ;;  %v1197_v3 = vsel %vm1193_vm8, %v1191_v51, %v1195_v59 }
 0x782   :  { %1019 = vmax.xlane.f32.xlu0 %v1018_v63  ;;  %v1199_v11 = vadd.f32 %v1197_v3, %v4034_v50  ;;  %vm3001_vm8 = vcmask 1044484  }
 0x783   :  { %1109 = vmax.xlane.f32.xlu1 %v1108_v0  ;;  %v1180_v6 = vpop.permute.xlu1 %1179  ;;  %v1105_v2 = vsel %vm1101_vm9, %v1099_v49, %v1103_v62  ;;  %vm3003_vm9 = vcmask 1045509  }
 0x784   :  { %v1190_v4 = vadd.f32 %v1189_v40, %v1180_v6  ;;  %v1107_v5 = vadd.f32 %v1105_v2, %v4034_v50  ;;  %v1203_v15 = vsel %vm285_vm7, %v1199_v11, -inf }
 0x786   :  { %v1194_v7 = vmul.f32 0.2, %v1190_v4  ;;  %v1111_v10 = vsel %vm285_vm7, %v1107_v5, -inf  ;;  %vm1192_vm10 = vcmp.gt.f32.partialorder %v1190_v4, 0.0 }
 0x787   :  { %1112 = vmax.xlane.f32.xlu0 %v1111_v10 }
 0x788   :  { %v1196_v12 = vsel %vm1192_vm10, %v1190_v4, %v1194_v7  ;;  %vm3005_vm10 = vcmask 1046534  }
 0x789   :  { %v1198_v14 = vadd.f32 %v1196_v12, %v4023_v38 }
 0x78b   :  { %1204 = vmax.xlane.f32.xlu0 %v1203_v15  ;;  %v1200_v16 = vsel %vm285_vm7, %v1198_v14, -inf }
 0x78c   :  { %1201 = vmax.xlane.f32.xlu1 %v1200_v16 }
 0x79d   :  { %1039 = vrot.lane.b32.xlu1 %v4153_v60, %s3794_s2 }
 0x806   :  { %v928_v17 = vpop.xlane.xlu1 %927 }
 0x807   :  { %v932_v18 = vsub.f32 %v924_v24, %v928_v17 }
 0x808   :  { %v931_v19 = vpop.xlane.xlu0 %930 }
 0x809   :  { %v934_v21 = vmul.f32 1.442695, %v932_v18  ;;  %v933_v23 = vsub.f32 %v925_v35, %v931_v19 }
 0x80b   :  { %3473 = vpow2.f32 %v934_v21  ;;  %v936_v20 = vmul.f32 1.442695, %v933_v23 }
 0x80c   :  { %v1017_v26 = vpop.xlane.xlu1 %1016 }
 0x80d   :  { %3475 = vpow2.f32 %v936_v20  ;;  %v1021_v31 = vsub.f32 %v1013_v45, %v1017_v26 }
 0x80f   :  { %v1023_v32 = vmul.f32 1.442695, %v1021_v31  ;;  %v1020_v33 = vpop.xlane.xlu0 %1019 }
 0x810   :  { %v1110_v34 = vpop.xlane.xlu1 %1109  ;;  %v1022_v36 = vsub.f32 %v1014_v61, %v1020_v33 }
 0x811   :  { %3477 = vpow2.f32 %v1023_v32  ;;  %v1114_v37 = vsub.f32 %v1106_v57, %v1110_v34 }
 0x812   :  { %v1025_v39 = vmul.f32 1.442695, %v1022_v36 }
 0x813   :  { %v1116_v13 = vmul.f32 1.442695, %v1114_v37 }
 0x814   :  { %3479 = vpow2.f32 %v1025_v39  ;;  %v1113_v40 = vpop.xlane.xlu0 %1112 }
 0x815   :  { %v3474_v41 = vpop.eup %3473  ;;  %3481 = vpow2.f32 %v1116_v13  ;;  %v1115_v24 = vsub.f32 %v1107_v5, %v1113_v40 }
 0x816   :  { %v938_v35 = vsel %vm285_vm7, %v3474_v41, 0.0 }
 0x817   :  { %v3476_v42 = vpop.eup %3475  ;;  %v1118_v44 = vmul.f32 1.442695, %v1115_v24  ;;  %939 = vadd.xlane.f32.xlu1 %v938_v35 }
 0x818   :  { %v1205_v46 = vpop.xlane.xlu0 %1204  ;;  %v941_v45 = vsel %vm285_vm7, %v3476_v42, 0.0 }
 0x819   :  { %3483 = vpow2.f32 %v1118_v44  ;;  %v1207_v51 = vsub.f32 %v1199_v11, %v1205_v46  ;;  %v1202_v52 = vpop.xlane.xlu1 %1201  ;;  %942 = vadd.xlane.f32.xlu0 %v941_v45 }
 0x81a   :  { %v1206_v48 = vsub.f32 %v1198_v14, %v1202_v52  ;;  %v3431_v52 = vld [vmem:[%s4776_s8] sm:$0xff]  }
 0x81b   :  { %v3478_v56 = vpop.eup %3477  ;;  %v1210_v57 = vmul.f32 1.442695, %v1207_v51 }
 0x81c   :  { %v1208_v59 = vmul.f32 1.442695, %v1206_v48  ;;  %v1027_v49 = vsel %vm285_vm7, %v3478_v56, 0.0  ;;  %v3432_v48 = vld [vmem:[%s4776_s8 + $0x8] sm:$0xff]  }
 0x81d   :  { %3485 = vpow2.f32 %v1210_v57  ;;  %1028 = vadd.xlane.f32.xlu1 %v1027_v49  ;;  %v1040_v10 = vpop.permute.xlu1 %1039  ;;  %v3434_v57 = vld [vmem:[%s4776_s8 + $0x18] sm:$0xff]  }
 0x81e   :  { %v3480_v61 = vpop.eup %3479  ;;  %3487 = vpow2.f32 %v1208_v59 }
 0x81f   :  { %v3482_v62 = vpop.eup %3481  ;;  %v1030_v63 = vsel %vm285_vm7, %v3480_v61, 0.0 }
 0x820   :  { %v1120_v0 = vsel %vm285_vm7, %v3482_v62, 0.0  ;;  %1031 = vadd.xlane.f32.xlu0 %v1030_v63 }
 0x821   :  { %1121 = vadd.xlane.f32.xlu1 %v1120_v0  ;;  %v3436_v0 = vld [vmem:[%s4776_s8 + $0x28] sm:$0xff]  }
 0x823   :  { %v3484_v6 = vpop.eup %3483 }
 0x824   :  { %v1123_v2 = vsel %vm285_vm7, %v3484_v6, 0.0 }
 0x825   :  { %1124 = vadd.xlane.f32.xlu0 %v1123_v2 }
 0x827   :  { %v3486_v3 = vpop.eup %3485 }
 0x828   :  { %v3488_v4 = vpop.eup %3487  ;;  %v1215_v5 = vsel %vm285_vm7, %v3486_v3, 0.0 }
 0x829   :  { %1216 = vadd.xlane.f32.xlu0 %v1215_v5  ;;  %v1212_v7 = vsel %vm285_vm7, %v3488_v4, 0.0 }
 0x82a   :  { %1213 = vadd.xlane.f32.xlu1 %v1212_v7 }
 0x83b   :  { %1223 = vrot.lane.b32.xlu1 %v4153_v60, %s3795_s28 }
 0x83f   :  { %1131 = vrot.lane.b32.xlu0 %v4153_v60, %s3785_s9 }
 0x8a4   :  { %v940_v11 = vpop.xlane.xlu1 %939 }
 0x8a5   :  { %3489 = vrcp.f32 %v940_v11  ;;  %v3438_v11 = vld [vmem:[%s4776_s8 + $0x38] sm:$0xff]  }
 0x8a6   :  { %v943_v12 = vpop.xlane.xlu0 %942 }
 0x8a7   :  { %3491 = vrcp.f32 %v943_v12 }
 0x8aa   :  { %v1029_v14 = vpop.xlane.xlu1 %1028 }
 0x8ab   :  { %3493 = vrcp.f32 %v1029_v14 }
 0x8ad   :  { %v1032_v15 = vpop.xlane.xlu0 %1031 }
 0x8ae   :  { %v1122_v16 = vpop.xlane.xlu1 %1121  ;;  %3495 = vrcp.f32 %v1032_v15 }
 0x8af   :  { %v3490_v17 = vpop.eup %3489  ;;  %3497 = vrcp.f32 %v1122_v16 }
 0x8b0   :  { %v945_v19 = vmul.f32 %v3490_v17, %v3474_v41 }
 0x8b1   :  { %v3492_v18 = vpop.eup %3491 }
 0x8b2   :  { %v947_v21 = vmul.f32 %v3492_v18, %v3476_v42  ;;  %v1125_v23 = vpop.xlane.xlu0 %1124 }
 0x8b3   :  { %3499 = vrcp.f32 %v1125_v23 }
 0x8b4   :  { %v948_v20 = vpack.c.bf16 %v947_v21, %v945_v19 }
 0x8b5   :  { %v3494_v26 = vpop.eup %3493 }
 0x8b6   :  { %3273 = vmatmul.mubr.msk.bf16.vlgmr.msra.gmra.mrb[28].mxu1 %vm285_vm7, %v948_v20  ;;  %v1217_v60 = vpop.xlane.xlu0 %1216  ;;  %v1034_v33 = vmul.f32 %v3494_v26, %v3478_v56  ;;  %v3433_v56 = vld [vmem:[%s4776_s8 + $0x10] sm:$0xff]  }
 0x8b7   :  { %3277 = vmatpush3.bf16.msra.mxu1 %v1040_v10  ;;  %3501 = vrcp.f32 %v1217_v60  ;;  %v1214_v31 = vpop.xlane.xlu1 %1213  ;;  %3278 = vmatprep.mubr.msk.bf16.mxu1 %vm3789_vm0, %v3788_v1 }
 0x8b8   :  { %v3496_v32 = vpop.eup %3495  ;;  %3503 = vrcp.f32 %v1214_v31  ;;  %3288 = vmatprep.subr.bf16.mxu1 %v3788_v1 }
 0x8b9   :  { %v1036_v34 = vmul.f32 %v3496_v32, %v3480_v61  ;;  %v3498_v37 = vpop.eup %3497  ;;  %v3435_v61 = vld [vmem:[%s4776_s8 + $0x20] sm:$0xff]  }
 0x8ba   :  { %v1132_v36 = vpop.permute.xlu0 %1131  ;;  %v1127_v40 = vmul.f32 %v3498_v37, %v3482_v62 }
 0x8bb   :  { %3283 = vmatpush3.bf16.msra.mxu0 %v1132_v36  ;;  %v1037_v39 = vpack.c.bf16 %v1036_v34, %v1034_v33  ;;  %v1224_v24 = vpop.permute.xlu1 %1223 }
 0x8bc   :  { %3294 = vmatprep.subr.bf16.mxu0 %v3788_v1 }
 0x8bd   :  { %v3500_v13 = vpop.eup %3499 }
 0x8be   :  { %v1129_v41 = vmul.f32 %v3500_v13, %v3484_v6  ;;  %3279 = vmatmul.mubr.msk.bf16.vlgmr.msra.gmra.mrb[32].mxu1 %vm285_vm7, %v1037_v39 }
 0x8bf   :  { %3289 = vmatpush3.bf16.msra.mxu1 %v1224_v24  ;;  %3290 = vmatprep.mubr.msk.bf16.mxu1 %vm3789_vm0, %v3788_v1 }
 0x8c0   :  { %v1130_v35 = vpack.c.bf16 %v1129_v41, %v1127_v40  ;;  %3314 = vmatprep.subr.bf16.mxu1 %v3788_v1 }
 0x8c1   :  { %v3502_v42 = vpop.eup %3501 }
 0x8c2   :  { %v3504_v44 = vpop.eup %3503  ;;  %v1221_v46 = vmul.f32 %v3502_v42, %v3486_v3  ;;  %3285 = vmatmul.mubr.msk.bf16.vlgmr.msra.gmra.mrb[16].mxu0 %vm285_vm7, %v1130_v35  ;;  %v3437_v3 = vld [vmem:[%s4776_s8 + $0x30] sm:$0xff]  }
 0x8c3   :  { %v1219_v45 = vmul.f32 %v3504_v44, %v3488_v4  ;;  %3310 = vmatprep.mubr.msk.bf16.mxu0 %vm3789_vm0, %v3788_v1  ;;  %3295 = vmatpush3.bf16.msra.mxu0 %v3431_v52  ;;  %v1452_v44 = vld [vmem:[#allocation5] sm:$0x3] }
 0x8c4   :  { %3296 = vmatprep.subr.bf16.mxu0 %v3788_v1 }
 0x8c5   :  { %v1222_v51 = vpack.c.bf16 %v1221_v46, %v1219_v45 }
 0x8c7   :  { %3291 = vmatmul.mubr.msk.bf16.vlgmr.msra.gmra.mrb[36].mxu1 %vm285_vm7, %v1222_v51  ;;  %3297 = vmatpush3.bf16.msra.mxu0 %v3432_v48 }
 0x8c8   :  { %3316 = vmatprep.mubr.msk.bf16.mxu1 %vm3789_vm0, %v3788_v1  ;;  %3298 = vmatprep.subr.bf16.mxu0 %v3788_v1 }
 0x8cb   :  { %3299 = vmatpush3.bf16.msra.mxu0 %v3433_v56 }
 0x8cc   :  { %3300 = vmatprep.subr.bf16.mxu0 %v3788_v1 }
 0x8cf   :  { %3301 = vmatpush3.bf16.msra.mxu0 %v3434_v57 }
 0x8d0   :  { %3302 = vmatprep.subr.bf16.mxu0 %v3788_v1 }
 0x8d3   :  { %3303 = vmatpush3.bf16.msra.mxu0 %v3435_v61 }
 0x8d4   :  { %3304 = vmatprep.subr.bf16.mxu0 %v3788_v1 }
 0x8d7   :  { %3305 = vmatpush3.bf16.msra.mxu0 %v3436_v0 }
 0x8d8   :  { %3306 = vmatprep.subr.bf16.mxu0 %v3788_v1 }
 0x8db   :  { %3307 = vmatpush3.bf16.msra.mxu0 %v3437_v3 }
 0x8dc   :  { %3308 = vmatprep.subr.bf16.mxu0 %v3788_v1 }
 0x8df   :  { %3309 = vmatpush3.bf16.msra.mxu0 %v3438_v11 }
 0x8e0   :  { %3338 = vmatprep.subr.bf16.mxu0 %v3788_v1 }
 0x989   :  { %v986_v59 = vpop.f32.mrb[28].mxu1 }
 0x98a   :  { %v3274_v49 = vpop.f32.mrb[29].mxu1 }
 0x98b   :  { %v989_v62 = vpop.f32.mrb[30].mxu1 }
 0x98c   :  { %v3275_v63 = vpop.f32.mrb[31].mxu1 }
 0x991   :  { %v1079_v6 = vpop.f32.mrb[32].mxu1 }
 0x992   :  { %v3280_v2 = vpop.f32.mrb[33].mxu1 }
 0x993   :  { %v1082_v4 = vpop.f32.mrb[34].mxu1 }
 0x994   :  { %v3281_v5 = vpop.f32.mrb[35].mxu1 }
 0x995   :  { %v1171_v7 = vpop.f32.mrb[16].mxu0 }
 0x996   :  { %1280 = vrot.lane.b32.xlu1 %v1171_v7, %s3785_s9  ;;  %v3286_v10 = vpop.f32.mrb[17].mxu0 }
 0x997   :  { %v1174_v12 = vpop.f32.mrb[18].mxu0 }
 0x998   :  { %1282 = vrot.lane.b32.xlu0 %v1174_v12, %s3785_s9  ;;  %v3287_v14 = vpop.f32.mrb[19].mxu0 }
 0x99a   :  { %v1263_v15 = vpop.f32.mrb[36].mxu1  ;;  %1272 = vrot.lane.b32.xlu1 %v1079_v6, %s3795_s28 }
 0x99b   :  { %v3292_v16 = vpop.f32.mrb[37].mxu1 }
 0x99c   :  { %v1266_v17 = vpop.f32.mrb[38].mxu1  ;;  %1274 = vrot.lane.b32.xlu0 %v1082_v4, %s3795_s28 }
 0x99d   :  { %v3293_v18 = vpop.f32.mrb[39].mxu1 }
 0x99e   :  { %1288 = vrot.lane.b32.xlu1 %v1263_v15, %s3794_s2 }
 0x9a0   :  { %1290 = vrot.lane.b32.xlu0 %v1266_v17, %s3794_s2 }
 0xa08   :  { %v1281_v19 = vpop.permute.xlu1 %1280 }
 0xa0a   :  { %v1283_v21 = vpop.permute.xlu0 %1282 }
 0xa0c   :  { %v1273_v23 = vpop.permute.xlu1 %1272 }
 0xa0d   :  { %v1294_v20 = vsel %vm654_vm14, %v986_v59, %v1273_v23 }
 0xa0e   :  { %v1275_v26 = vpop.permute.xlu0 %1274  ;;  %v1296_v31 = vsel %vm657_vm15, %v1294_v20, %v1281_v19 }
 0xa0f   :  { %v1295_v60 = vsel %vm654_vm14, %v989_v62, %v1275_v26 }
 0xa10   :  { %v1289_v32 = vpop.permute.xlu1 %1288  ;;  %v1297_v36 = vsel %vm657_vm15, %v1295_v60, %v1283_v21 }
 0xa11   :  { %v1298_v33 = vsel %vm660_vm1, %v1296_v31, %v1289_v32 }
 0xa12   :  { %v4271_v34 = vadd.f32 %v1298_v33, %v710_v54  ;;  %v1291_v37 = vpop.permute.xlu0 %1290 }
 0xa13   :  { %v1299_v39 = vsel %vm660_vm1, %v1297_v36, %v1291_v37 }
 0xa14   :  { %v4277_v13 = vadd.f32 %v1299_v39, %v711_v55  ;;  %v1302_v40 = vmax.f32 %v4271_v34, 0.0  ;;  %v1411_v55 = vld [vmem:[#allocation3] sm:$0x3]  ;;  %v3796_v34 = vmov 1966171168  }
 0xa16   :  { %v1303_v41 = vmax.f32 %v4277_v13, 0.0 }
 0xa18   :  { %v1304_v47 = vpack.c.bf16 %v1303_v41, %v1302_v40 }
 0xa1a   :  { %3311 = vmatmul.mubr.bf16.vlgmr.msra.gmra.mrb[20].mxu0 %v1304_v47 }
 0xa1b   :  { %3340 = vmatprep.mubr.msk.bf16.mxu0 %vm3789_vm0, %v3788_v1 }
 0xaed   :  { %v1403_v54 = vpop.f32.mrb[20].mxu0 }
 0xaee   :  { %v3312_v24 = vpop.f32.mrb[21].mxu0 }
 0xaef   :  { %v1406_v35 = vpop.f32.mrb[22].mxu0 }
 0xaf0   :  { %v4287_v42 = vpack.c.bf16 %v1406_v35, %v1403_v54  ;;  %v3313_v53 = vpop.f32.mrb[23].mxu0 }
 0xaf2   :  { %3315 = vmatpush3.bf16.xpose.msra.mxu1 %v4287_v42 }
 0xaf3   :  { %3320 = vmatprep.subr.bf16.mxu1 %v3788_v1 }
 0xaf9   :  { %3317 = vmatmul.mubr.bf16.vlgmr.msra.gmra.mrb[40].mxu1 %v1411_v55 }
 0xafa   :  { %3321 = vmatpush3.bf16.xpose.msra.mxu1 %v1452_v44  ;;  %3322 = vmatprep.mubr.msk.bf16.mxu1 %vm3789_vm0, %v3788_v1 }
 0xafb   :  { %3326 = vmatprep.subr.bf16.mxu1 %v3788_v1 }
 0xb01   :  { %3323 = vmatmul.mubr.bf16.vlgmr.msra.gmra.mrb[44].mxu1 %v4287_v42 }
 0xb02   :  { %3327 = vmatpush3.bf16.msra.mxu1 %v4287_v42  ;;  %3328 = vmatprep.mubr.msk.bf16.mxu1 %vm3789_vm0, %v3788_v1 }
 0xb03   :  { %3332 = vmatprep.subr.bf16.mxu1 %v3788_v1 }
 0xbcc   :  { %v1446_v46 = vpop.f32.mrb[40].mxu1 }
 0xbcd   :  { %v3318_v45 = vpop.f32.mrb[41].mxu1  ;;  %v1507_v49 = vrot.slane %v1446_v46, %v4008_v28  ;;  %v1596_v6 = vrot.slane %v1446_v46, %v4011_v29 }
 0xbce   :  { %v1449_v51 = vpop.f32.mrb[42].mxu1 }
 0xbcf   :  { %v3319_v52 = vpop.f32.mrb[43].mxu1 }
 0xbd4   :  { %v1487_v48 = vpop.f32.mrb[44].mxu1 }
 0xbd5   :  { %1496 = vperm.xlu1 %3415, %v1487_v48   ;;  %v3324_v56 = vpop.f32.mrb[45].mxu1 }
 0xbd6   :  { %v1490_v57 = vpop.f32.mrb[46].mxu1 }
 0xbd7   :  { %1501 = vperm.xlu0 %3417, %v1490_v57   ;;  %v3325_v59 = vpop.f32.mrb[47].mxu1 }
 0xbd9   :  { %3416 = vset.pattern.permute.xlu1 %v3790_v8 }
 0xbda   :  { %1586 = vperm.xlu1 %3416, %v1487_v48  }
 0xbdb   :  { %3418 = vset.pattern.permute.xlu0 %v3792_v22 }
 0xbdc   :  { %1679 = vperm.xlu0 %3418, %v1487_v48  }
 0xbde   :  { %1590 = vperm.xlu1 %3416, %v1490_v57  }
 0xbe0   :  { %3421 = vset.pattern.permute.xlu0 %v3793_v25 }
 0xbe1   :  { %1775 = vperm.xlu0 %3421, %v1490_v57  }
 0xbe2   :  { %3419 = vset.pattern.permute.xlu1 %v3792_v22 }
 0xbe3   :  { %1683 = vperm.xlu1 %3419, %v1490_v57  }
 0xbe5   :  { %3422 = vset.pattern.permute.xlu0 %v3791_v9  ;;  %v1689_v9 = vrot.slane %v1446_v46, %v4027_v43  ;;  %v1781_v43 = vrot.slane %v1446_v46, %v4040_v58 }
 0xbe7   :  { %3420 = vset.pattern.permute.xlu1 %v3793_v25 }
 0xbe8   :  { %1771 = vperm.xlu1 %3420, %v1487_v48  }
 0xc54   :  { %v1497_v61 = vpop.permute.xlu1 %1496 }
 0xc55   :  { %v1508_v8 = vadd.f32 %v1507_v49, %v1497_v61 }
 0xc56   :  { %v1502_v62 = vpop.permute.xlu0 %1501 }
 0xc57   :  { %vm1510_vm11 = vcmp.gt.f32.partialorder %v1508_v8, 0.0  ;;  %v1512_v63 = vmul.f32 0.2, %v1508_v8  ;;  %v1509_v0 = vadd.f32 %v1507_v49, %v1502_v62 }
 0xc59   :  { %vm1511_vm12 = vcmp.gt.f32.partialorder %v1509_v0, 0.0  ;;  %v1513_v2 = vmul.f32 0.2, %v1509_v0  ;;  %v1587_v3 = vpop.permute.xlu1 %1586  ;;  %v1514_v22 = vsel %vm1510_vm11, %v1508_v8, %v1512_v63  ;;  %vm3007_vm11 = vcmask 1047559  }
 0xc5a   :  { %v1597_v4 = vadd.f32 %v1596_v6, %v1587_v3  ;;  %v1516_v25 = vadd.f32 %v1514_v22, %v4023_v38 }
 0xc5b   :  { %v1680_v5 = vpop.permute.xlu0 %1679  ;;  %v1515_v7 = vsel %vm1511_vm12, %v1509_v0, %v1513_v2 }
 0xc5c   :  { %vm1599_vm13 = vcmp.gt.f32.partialorder %v1597_v4, 0.0  ;;  %v1601_v10 = vmul.f32 0.2, %v1597_v4  ;;  %v1690_v11 = vadd.f32 %v1689_v9, %v1680_v5  ;;  %v1518_v12 = vsel %vm285_vm7, %v1516_v25, -inf }
 0xc5d   :  { %1519 = vmax.xlane.f32.xlu1 %v1518_v12  ;;  %v1591_v14 = vpop.permute.xlu1 %1590  ;;  %v1517_v29 = vadd.f32 %v1515_v7, %v4034_v50 }
 0xc5e   :  { %vm1692_vm2 = vcmp.gt.f32.partialorder %v1690_v11, 0.0  ;;  %v1694_v15 = vmul.f32 0.2, %v1690_v11  ;;  %v1598_v16 = vadd.f32 %v1596_v6, %v1591_v14  ;;  %v1603_v17 = vsel %vm1599_vm13, %v1597_v4, %v1601_v10 }
 0xc5f   :  { %v1521_v18 = vsel %vm285_vm7, %v1517_v29, -inf  ;;  %v1605_v19 = vadd.f32 %v1603_v17, %v4023_v38 }
 0xc60   :  { %vm1600_vm3 = vcmp.gt.f32.partialorder %v1598_v16, 0.0  ;;  %v1602_v21 = vmul.f32 0.2, %v1598_v16  ;;  %1522 = vmax.xlane.f32.xlu0 %v1521_v18  ;;  %v1776_v23 = vpop.permute.xlu0 %1775  ;;  %v1696_v20 = vsel %vm1692_vm2, %v1690_v11, %v1694_v15 }
 0xc61   :  { %v1783_v26 = vadd.f32 %v1781_v43, %v1776_v23  ;;  %v1607_v60 = vsel %vm285_vm7, %v1605_v19, -inf  ;;  %v1698_v31 = vadd.f32 %v1696_v20, %v4023_v38 }
 0xc62   :  { %1608 = vmax.xlane.f32.xlu1 %v1607_v60  ;;  %v1684_v32 = vpop.permute.xlu1 %1683  ;;  %v1604_v33 = vsel %vm1600_vm3, %v1598_v16, %v1602_v21 }
 0xc63   :  { %v1787_v36 = vmul.f32 0.2, %v1783_v26  ;;  %v1691_v37 = vadd.f32 %v1689_v9, %v1684_v32  ;;  %v1606_v39 = vadd.f32 %v1604_v33, %v4034_v50  ;;  %vm1785_vm4 = vcmp.gt.f32.partialorder %v1783_v26, 0.0 }
 0xc64   :  { %v1700_v54 = vsel %vm285_vm7, %v1698_v31, -inf }
 0xc65   :  { %vm1693_vm5 = vcmp.gt.f32.partialorder %v1691_v37, 0.0  ;;  %v1695_v58 = vmul.f32 0.2, %v1691_v37  ;;  %v1610_v47 = vsel %vm285_vm7, %v1606_v39, -inf  ;;  %v1789_v53 = vsel %vm1785_vm4, %v1783_v26, %v1787_v36 }
 0xc66   :  { %1611 = vmax.xlane.f32.xlu0 %v1610_v47  ;;  %1701 = vmax.xlane.f32.xlu1 %v1700_v54  ;;  %v1791_v51 = vadd.f32 %v1789_v53, %v4034_v50 }
 0xc67   :  { %v1772_v24 = vpop.permute.xlu1 %1771  ;;  %v1697_v35 = vsel %vm1693_vm5, %v1691_v37, %v1695_v58 }
 0xc68   :  { %v1782_v55 = vadd.f32 %v1781_v43, %v1772_v24  ;;  %v1699_v44 = vadd.f32 %v1697_v35, %v4034_v50  ;;  %v1795_v56 = vsel %vm285_vm7, %v1791_v51, -inf }
 0xc6a   :  { %vm1784_vm6 = vcmp.gt.f32.partialorder %v1782_v55, 0.0  ;;  %v1786_v46 = vmul.f32 0.2, %v1782_v55  ;;  %v1703_v45 = vsel %vm285_vm7, %v1699_v44, -inf }
 0xc6b   :  { %1704 = vmax.xlane.f32.xlu0 %v1703_v45 }
 0xc6c   :  { %v1788_v52 = vsel %vm1784_vm6, %v1782_v55, %v1786_v46 }
 0xc6d   :  { %v1790_v48 = vadd.f32 %v1788_v52, %v4023_v38 }
 0xc6f   :  { %1796 = vmax.xlane.f32.xlu0 %v1795_v56  ;;  %v1792_v57 = vsel %vm285_vm7, %v1790_v48, -inf }
 0xc70   :  { %1793 = vmax.xlane.f32.xlu1 %v1792_v57 }
 0xc81   :  { %1631 = vrot.lane.b32.xlu1 %v4287_v42, %s3794_s2 }
 0xcea   :  { %v1520_v59 = vpop.xlane.xlu1 %1519 }
 0xceb   :  { %v1524_v49 = vsub.f32 %v1516_v25, %v1520_v59 }
 0xced   :  { %v1526_v61 = vmul.f32 1.442695, %v1524_v49  ;;  %v1523_v8 = vpop.xlane.xlu0 %1522 }
 0xcee   :  { %v1525_v62 = vsub.f32 %v1517_v29, %v1523_v8 }
 0xcef   :  { %3505 = vpow2.f32 %v1526_v61  ;;  %v1609_v50 = vpop.xlane.xlu1 %1608 }
 0xcf0   :  { %v1528_v63 = vmul.f32 1.442695, %v1525_v62  ;;  %v1613_v0 = vsub.f32 %v1605_v19, %v1609_v50 }
 0xcf2   :  { %3507 = vpow2.f32 %v1528_v63  ;;  %v1615_v38 = vmul.f32 1.442695, %v1613_v0 }
 0xcf3   :  { %v1702_v6 = vpop.xlane.xlu1 %1701  ;;  %v1612_v2 = vpop.xlane.xlu0 %1611 }
 0xcf4   :  { %3509 = vpow2.f32 %v1615_v38  ;;  %v1706_v3 = vsub.f32 %v1698_v31, %v1702_v6  ;;  %v1614_v22 = vsub.f32 %v1606_v39, %v1612_v2 }
 0xcf6   :  { %v1708_v4 = vmul.f32 1.442695, %v1706_v3  ;;  %v1617_v9 = vmul.f32 1.442695, %v1614_v22 }
 0xcf8   :  { %3511 = vpow2.f32 %v1708_v4  ;;  %v1705_v5 = vpop.xlane.xlu0 %1704 }
 0xcf9   :  { %v3506_v7 = vpop.eup %3505  ;;  %3513 = vpow2.f32 %v1617_v9  ;;  %v1707_v25 = vsub.f32 %v1699_v44, %v1705_v5 }
 0xcfa   :  { %v1530_v10 = vsel %vm285_vm7, %v3506_v7, 0.0 }
 0xcfb   :  { %v1710_v11 = vmul.f32 1.442695, %v1707_v25  ;;  %1531 = vadd.xlane.f32.xlu1 %v1530_v10 }
 0xcfc   :  { %v3508_v12 = vpop.eup %3507  ;;  %v1797_v14 = vpop.xlane.xlu0 %1796 }
 0xcfd   :  { %3515 = vpow2.f32 %v1710_v11  ;;  %v1799_v29 = vsub.f32 %v1791_v51, %v1797_v14  ;;  %v1794_v15 = vpop.xlane.xlu1 %1793  ;;  %v1533_v16 = vsel %vm285_vm7, %v3508_v12, 0.0 }
 0xcfe   :  { %v3510_v17 = vpop.eup %3509  ;;  %v1798_v18 = vsub.f32 %v1790_v48, %v1794_v15  ;;  %1534 = vadd.xlane.f32.xlu0 %v1533_v16 }
 0xcff   :  { %v1802_v43 = vmul.f32 1.442695, %v1799_v29  ;;  %v1619_v19 = vsel %vm285_vm7, %v3510_v17, 0.0 }
 0xd00   :  { %v1800_v21 = vmul.f32 1.442695, %v1798_v18  ;;  %1620 = vadd.xlane.f32.xlu1 %v1619_v19 }
 0xd01   :  { %3517 = vpow2.f32 %v1802_v43  ;;  %v1632_v58 = vpop.permute.xlu1 %1631 }
 0xd02   :  { %v3512_v23 = vpop.eup %3511  ;;  %3519 = vpow2.f32 %v1800_v21 }
 0xd03   :  { %v3514_v20 = vpop.eup %3513  ;;  %v1712_v26 = vsel %vm285_vm7, %v3512_v23, 0.0 }
 0xd04   :  { %1713 = vadd.xlane.f32.xlu1 %v1712_v26  ;;  %v1622_v60 = vsel %vm285_vm7, %v3514_v20, 0.0 }
 0xd05   :  { %1623 = vadd.xlane.f32.xlu0 %v1622_v60 }
 0xd07   :  { %v3516_v31 = vpop.eup %3515 }
 0xd08   :  { %v1715_v32 = vsel %vm285_vm7, %v3516_v31, 0.0 }
 0xd09   :  { %1716 = vadd.xlane.f32.xlu0 %v1715_v32 }
 0xd0b   :  { %v3518_v33 = vpop.eup %3517 }
 0xd0c   :  { %v3520_v36 = vpop.eup %3519  ;;  %v1807_v37 = vsel %vm285_vm7, %v3518_v33, 0.0 }
 0xd0d   :  { %1808 = vadd.xlane.f32.xlu0 %v1807_v37  ;;  %v1804_v39 = vsel %vm285_vm7, %v3520_v36, 0.0 }
 0xd0e   :  { %1805 = vadd.xlane.f32.xlu1 %v1804_v39 }
 0xd1f   :  { %1815 = vrot.lane.b32.xlu1 %v4287_v42, %s3795_s28 }
 0xd23   :  { %1723 = vrot.lane.b32.xlu0 %v4287_v42, %s3785_s9 }
 0xd88   :  { %v1532_v47 = vpop.xlane.xlu1 %1531 }
 0xd89   :  { %3521 = vrcp.f32 %v1532_v47 }
 0xd8b   :  { %v1535_v54 = vpop.xlane.xlu0 %1534 }
 0xd8c   :  { %3523 = vrcp.f32 %v1535_v54  ;;  %v3439_v54 = vld [vmem:[#allocation7] sm:$0xff]  }
 0xd8d   :  { %v1621_v24 = vpop.xlane.xlu1 %1620 }
 0xd8e   :  { %3525 = vrcp.f32 %v1621_v24  ;;  %v3440_v24 = vld [vmem:[#allocation7 + $0x8] sm:$0xff]  }
 0xd91   :  { %v1714_v35 = vpop.xlane.xlu1 %1713 }
 0xd92   :  { %v1624_v53 = vpop.xlane.xlu0 %1623 }
 0xd93   :  { %3527 = vrcp.f32 %v1624_v53  ;;  %v3522_v55 = vpop.eup %3521 }
 0xd94   :  { %3529 = vrcp.f32 %v1714_v35  ;;  %v1537_v45 = vmul.f32 %v3522_v55, %v3506_v7 }
 0xd96   :  { %v3524_v44 = vpop.eup %3523  ;;  %v1717_v46 = vpop.xlane.xlu0 %1716 }
 0xd97   :  { %v1539_v51 = vmul.f32 %v3524_v44, %v3508_v12  ;;  %3531 = vrcp.f32 %v1717_v46 }
 0xd98   :  { %v3526_v42 = vpop.eup %3525 }
 0xd99   :  { %v1540_v52 = vpack.c.bf16 %v1539_v51, %v1537_v45  ;;  %v1626_v59 = vmul.f32 %v3526_v42, %v3510_v17 }
 0xd9a   :  { %v1809_v48 = vpop.xlane.xlu0 %1808 }
 0xd9b   :  { %3329 = vmatmul.mubr.msk.bf16.vlgmr.msra.gmra.mrb[48].mxu1 %vm285_vm7, %v1540_v52  ;;  %3533 = vrcp.f32 %v1809_v48  ;;  %v1806_v56 = vpop.xlane.xlu1 %1805 }
 0xd9c   :  { %3333 = vmatpush3.bf16.msra.mxu1 %v1632_v58  ;;  %3535 = vrcp.f32 %v1806_v56  ;;  %3334 = vmatprep.mubr.msk.bf16.mxu1 %vm3789_vm0, %v3788_v1 }
 0xd9d   :  { %v3528_v57 = vpop.eup %3527  ;;  %3344 = vmatprep.subr.bf16.mxu1 %v3788_v1 }
 0xd9e   :  { %v1628_v49 = vmul.f32 %v3528_v57, %v3514_v20  ;;  %v1724_v61 = vpop.permute.xlu0 %1723  ;;  %v3530_v8 = vpop.eup %3529 }
 0xd9f   :  { %3339 = vmatpush3.bf16.msra.mxu0 %v1724_v61  ;;  %v1719_v63 = vmul.f32 %v3530_v8, %v3512_v23  ;;  %v1816_v38 = vpop.permute.xlu1 %1815 }
 0xda0   :  { %v1629_v62 = vpack.c.bf16 %v1628_v49, %v1626_v59  ;;  %3350 = vmatprep.subr.bf16.mxu0 %v3439_v54 }
 0xda1   :  { %v3532_v50 = vpop.eup %3531 }
 0xda2   :  { %v1721_v0 = vmul.f32 %v3532_v50, %v3516_v31 }
 0xda3   :  { %3335 = vmatmul.mubr.msk.bf16.vlgmr.msra.gmra.mrb[52].mxu1 %vm285_vm7, %v1629_v62 }
 0xda4   :  { %3345 = vmatpush3.bf16.msra.mxu1 %v1816_v38  ;;  %v1722_v6 = vpack.c.bf16 %v1721_v0, %v1719_v63  ;;  %3346 = vmatprep.mubr.msk.bf16.mxu1 %vm3789_vm0, %v3788_v1  ;;  %vm2858_vm0 = vcmask 130112  }
 0xda5   :  { %v3534_v2 = vpop.eup %3533 }
 0xda6   :  { %v3536_v3 = vpop.eup %3535  ;;  %v1813_v22 = vmul.f32 %v3534_v2, %v3518_v33  ;;  %3341 = vmatmul.mubr.msk.bf16.vlgmr.msra.gmra.mrb[24].mxu0 %vm285_vm7, %v1722_v6 }
 0xda7   :  { %v1811_v4 = vmul.f32 %v3536_v3, %v3520_v36  ;;  %3351 = vmatpush3.bf16.msra.mxu0 %v3439_v54 }
 0xda8   :  { %3352 = vmatprep.subr.bf16.mxu0 %v3440_v24 }
 0xda9   :  { %v1814_v9 = vpack.c.bf16 %v1813_v22, %v1811_v4 }
 0xdab   :  { %3347 = vmatmul.mubr.msk.bf16.vlgmr.msra.gmra.mrb[56].mxu1 %vm285_vm7, %v1814_v9  ;;  %3353 = vmatpush3.bf16.msra.mxu0 %v3440_v24 }
 0xe6e   :  { %v1578_v5 = vpop.f32.mrb[48].mxu1 }
 0xe6f   :  { %v3330_v7 = vpop.f32.mrb[49].mxu1 }
 0xe70   :  { %v1581_v25 = vpop.f32.mrb[50].mxu1 }
 0xe71   :  { %v3331_v10 = vpop.f32.mrb[51].mxu1 }
 0xe76   :  { %v1671_v11 = vpop.f32.mrb[52].mxu1 }
 0xe77   :  { %1864 = vrot.lane.b32.xlu1 %v1671_v11, %s3795_s28  ;;  %v3336_v12 = vpop.f32.mrb[53].mxu1 }
 0xe78   :  { %v1674_v14 = vpop.f32.mrb[54].mxu1 }
 0xe79   :  { %v3337_v29 = vpop.f32.mrb[55].mxu1  ;;  %v1763_v1 = vpop.f32.mrb[24].mxu0 }
 0xe7a   :  { %1872 = vrot.lane.b32.xlu0 %v1763_v1, %s3785_s9  ;;  %v3342_v15 = vpop.f32.mrb[25].mxu0 }
 0xe7b   :  { %v1766_v16 = vpop.f32.mrb[26].mxu0 }
 0xe7c   :  { %v3343_v17 = vpop.f32.mrb[27].mxu0 }
 0xe7e   :  { %v1855_v18 = vpop.f32.mrb[56].mxu1  ;;  %1866 = vrot.lane.b32.xlu0 %v1674_v14, %s3795_s28 }
 0xe7f   :  { %1880 = vrot.lane.b32.xlu1 %v1855_v18, %s3794_s2  ;;  %v3348_v43 = vpop.f32.mrb[57].mxu1 }
 0xe80   :  { %v1858_v19 = vpop.f32.mrb[58].mxu1 }
 0xe81   :  { %v3349_v21 = vpop.f32.mrb[59].mxu1 }
 0xe82   :  { %1882 = vrot.lane.b32.xlu0 %v1858_v19, %s3794_s2 }
 0xe83   :  { %1874 = vrot.lane.b32.xlu1 %v1766_v16, %s3785_s9 }
 0xee9   :  { %v1865_v20 = vpop.permute.xlu1 %1864 }
 0xeea   :  { %v1886_v26 = vsel %vm654_vm14, %v1578_v5, %v1865_v20 }
 0xeec   :  { %v1873_v23 = vpop.permute.xlu0 %1872 }
 0xeed   :  { %v1888_v31 = vsel %vm657_vm15, %v1886_v26, %v1873_v23 }
 0xef0   :  { %v1867_v60 = vpop.permute.xlu0 %1866 }
 0xef1   :  { %v1881_v32 = vpop.permute.xlu1 %1880  ;;  %v1887_v37 = vsel %vm654_vm14, %v1581_v25, %v1867_v60 }
 0xef2   :  { %v1890_v33 = vsel %vm660_vm1, %v1888_v31, %v1881_v32 }
 0xef3   :  { %v1892_v36 = vadd.f32 %v1890_v33, %v1302_v40  ;;  %v1928_v40 = vunpack.c.l.s4 %v3796_v34 }
 0xef4   :  { %v1883_v58 = vpop.permute.xlu0 %1882 }
 0xef5   :  { %1904 = vrot.lane.b32.xlu0 %v1892_v36, %s3785_s9  ;;  %1896 = vrot.lane.b32.xlu1 %v1892_v36, %s3794_s2  ;;  %v1875_v39 = vpop.permute.xlu1 %1874  ;;  %v1929_v45 = vunpack.c.0.s8 %v1928_v40 }
 0xef6   :  { %v1889_v47 = vsel %vm657_vm15, %v1887_v37, %v1875_v39  ;;  %vm2997_vm15 = vcmask 1042434  }
 0xef7   :  { %v1891_v35 = vsel %vm660_vm1, %v1889_v47, %v1883_v58  ;;  %v4371_v48 = vsub.s32 %v1929_v45, %v4005_v27  ;;  %vm2999_vm1 = vcmask 1043459  }
 0xef8   :  { %v1893_v53 = vadd.f32 %v1891_v35, %v1303_v41 }
 0xef9   :  { %1912 = vrot.lane.b32.xlu1 %v1892_v36, %s3795_s28 }
 0xefa   :  { %1898 = vrot.lane.b32.xlu0 %v1893_v53, %s3794_s2 }
 0xefd   :  { %1906 = vrot.lane.b32.xlu1 %v1893_v53, %s3785_s9 }
 0xefe   :  { %1914 = vrot.lane.b32.xlu0 %v1893_v53, %s3795_s28 }
 0xf67   :  { %v1905_v55 = vpop.permute.xlu0 %1904  ;;  %v1897_v44 = vpop.permute.xlu1 %1896 }
 0xf68   :  { %v1902_v46 = vadd.f32 %v1897_v44, %v1892_v36 }
 0xf6a   :  { %v1910_v13 = vadd.f32 %v1905_v55, %v1902_v46 }
 0xf6b   :  { %v1913_v41 = vpop.permute.xlu1 %1912 }
 0xf6c   :  { %v1918_v51 = vadd.f32 %v1913_v41, %v1910_v13  ;;  %v1899_v52 = vpop.permute.xlu0 %1898 }
 0xf6d   :  { %v1903_v42 = vadd.f32 %v1899_v52, %v1893_v53 }
 0xf6e   :  { %v4373_v56 = vmul.f32 0.25, %v1918_v51 }
 0xf6f   :  { %v1907_v57 = vpop.permute.xlu1 %1906 }
 0xf70   :  { %1922 = vst.msk [vmem:[%s4783_s15] sm:$0xff] %vm654_vm14, %v4373_v56  ;;  %v1911_v59 = vadd.f32 %v1907_v57, %v1903_v42  ;;  %v1915_v49 = vpop.permute.xlu0 %1914  ;;  %v1933_v61 = vrot.slane %v4373_v56, %v4371_v48  ;;  %v1926_v8 = vcombine.high %v4373_v56, %v4373_v56 }
 0xf72   :  { %v1919_v62 = vadd.f32 %v1915_v49, %v1911_v59  ;;  %v1941_v50 = vcombine.high %v1933_v61, %v1933_v61  ;;  %v1949_v63 = vrot.slane %v1933_v61, %v4371_v48  ;;  %v1940_v0 = vrot.slane %v1926_v8, %v4371_v48 }
 0xf74   :  { %v4386_v38 = vmul.f32 0.25, %v1919_v62  ;;  %v2027_v6 = vrot.slane %v1949_v63, %v4008_v28  ;;  %v1963_v2 = vrot.slane %v1941_v50, %v4371_v48  ;;  %v1971_v3 = vcombine.high %v1949_v63, %v1949_v63 }
 0xf75   :  { %v1956_v22 = vrot.slane %v1940_v0, %v4371_v48  ;;  %v1942_v10 = vcombine.high %v1940_v0, %v1940_v0 }
 0xf76   :  { %1923 = vst.msk [vmem:[%s4783_s15 + $0x8] sm:$0xff] %vm654_vm14, %v4386_v38  ;;  %v2104_v4 = vsub.f32 %v2027_v6, %v4373_v56  ;;  %v2105_v9 = vsub.f32 %v2027_v6, %v4386_v38  ;;  %v2031_v5 = vrot.slane %v1963_v2, %v4008_v28  ;;  %v2035_v7 = vrot.slane %v1971_v3, %v4008_v28 }
 0xf77   :  { %v1973_v25 = vcombine.high %v1963_v2, %v1963_v2  ;;  %v2043_v17 = vrot.slane %v1956_v22, %v4008_v28  ;;  %v1970_v31 = vrot.slane %v1942_v10, %v4371_v48  ;;  %v1972_v37 = vcombine.high %v1956_v22, %v1956_v22 }
 0xf78   :  { %v2136_v11 = vand.u32 2147483647, %v2104_v4  ;;  %v2137_v12 = vand.u32 2147483647, %v2105_v9  ;;  %v2106_v14 = vsub.f32 %v2031_v5, %v4373_v56  ;;  %v2107_v29 = vsub.f32 %v2031_v5, %v4386_v38 }
 0xf79   :  { %v2108_v1 = vsub.f32 %v2035_v7, %v4373_v56  ;;  %v2109_v15 = vsub.f32 %v2035_v7, %v4386_v38  ;;  %v2039_v16 = vrot.slane %v1973_v25, %v4008_v28  ;;  %v2112_v33 = vsub.f32 %v2043_v17, %v4373_v56 }
 0xf7a   :  { %v2168_v18 = vpack.c.bf16 %v2137_v12, %v2136_v11  ;;  %v2138_v43 = vand.u32 2147483647, %v2106_v14  ;;  %v2139_v19 = vand.u32 2147483647, %v2107_v29  ;;  %v2113_v36 = vsub.f32 %v2043_v17, %v4386_v38 }
 0xf7b   :  { %v2140_v21 = vand.u32 2147483647, %v2108_v1  ;;  %v2141_v23 = vand.u32 2147483647, %v2109_v15  ;;  %v2110_v26 = vsub.f32 %v2039_v16, %v4373_v56  ;;  %v2111_v60 = vsub.f32 %v2039_v16, %v4386_v38 }
 0xf7c   :  { %3354 = vmatprep.mubr.msk.bf16.mxu0 %vm654_vm14, %v2168_v18  ;;  %v2169_v20 = vpack.c.bf16 %v2139_v19, %v2138_v43  ;;  %v2047_v47 = vrot.slane %v1970_v31, %v4008_v28  ;;  %v2144_v54 = vand.u32 2147483647, %v2112_v33  ;;  %v2145_v24 = vand.u32 2147483647, %v2113_v36 }
 0xf7d   :  { %v2170_v32 = vpack.c.bf16 %v2141_v23, %v2140_v21  ;;  %v2142_v39 = vand.u32 2147483647, %v2110_v26  ;;  %v2143_v58 = vand.u32 2147483647, %v2111_v60  ;;  %v2051_v35 = vrot.slane %v1972_v37, %v4008_v28 }
 0xf7e   :  { %3355 = vmatmul.mubr.msk.bf16.vlgmr.msra.gmra.mrb[28].mxu0 %vm654_vm14, %v2169_v20  ;;  %v1982_v53 = vrot.slane %v4386_v38, %v4371_v48  ;;  %v2114_v40 = vsub.f32 %v2047_v47, %v4373_v56  ;;  %v2115_v55 = vsub.f32 %v2047_v47, %v4386_v38  ;;  %v1974_v44 = vcombine.high %v1970_v31, %v1970_v31 }
 0xf7f   :  { %3358 = vmatprep.mubr.msk.bf16.mxu0 %vm654_vm14, %v2170_v32  ;;  %v2171_v34 = vpack.c.bf16 %v2143_v58, %v2142_v39  ;;  %v2172_v46 = vpack.c.bf16 %v2145_v24, %v2144_v54  ;;  %v2116_v45 = vsub.f32 %v2051_v35, %v4373_v56  ;;  %v2117_v13 = vsub.f32 %v2051_v35, %v4386_v38 }
 0xf80   :  { %v1998_v41 = vrot.slane %v1982_v53, %v4371_v48  ;;  %v2146_v51 = vand.u32 2147483647, %v2114_v40  ;;  %v2147_v52 = vand.u32 2147483647, %v2115_v55  ;;  %v2055_v42 = vrot.slane %v1974_v44, %v4008_v28 }
 0xf81   :  { %v1990_v57 = vcombine.high %v1982_v53, %v1982_v53  ;;  %v2148_v59 = vand.u32 2147483647, %v2116_v45  ;;  %v2149_v49 = vand.u32 2147483647, %v2117_v13  ;;  %v1975_v8 = vcombine.high %v4386_v38, %v4386_v38 }
 0xf82   :  { %v2059_v61 = vrot.slane %v1998_v41, %v4008_v28  ;;  %v2173_v62 = vpack.c.bf16 %v2147_v52, %v2146_v51  ;;  %v2118_v50 = vsub.f32 %v2055_v42, %v4373_v56  ;;  %v2119_v63 = vsub.f32 %v2055_v42, %v4386_v38 }
 0xf83   :  { %v2012_v0 = vrot.slane %v1990_v57, %v4371_v48  ;;  %v2174_v6 = vpack.c.bf16 %v2149_v49, %v2148_v59  ;;  %v2020_v22 = vcombine.high %v1998_v41, %v1998_v41  ;;  %v1989_v11 = vrot.slane %v1975_v8, %v4371_v48 }
 0xf84   :  { %v2120_v2 = vsub.f32 %v2059_v61, %v4373_v56  ;;  %v2121_v3 = vsub.f32 %v2059_v61, %v4386_v38  ;;  %v2150_v4 = vand.u32 2147483647, %v2118_v50  ;;  %v2151_v9 = vand.u32 2147483647, %v2119_v63 }
 0xf85   :  { %v2063_v5 = vrot.slane %v2012_v0, %v4008_v28  ;;  %v2067_v10 = vrot.slane %v2020_v22, %v4008_v28  ;;  %v2022_v1 = vcombine.high %v2012_v0, %v2012_v0  ;;  %v2005_v18 = vrot.slane %v1989_v11, %v4371_v48  ;;  %v4472_v22 = vld [vmem:[#allocation10] ss:$0 sm:$0xff] }
 0xf86   :  { %3359 = vmatmul.mubr.msk.bf16.gmra.mrb[32].mxu0 %vm654_vm14, %v2171_v34  ;;  %v2152_v7 = vand.u32 2147483647, %v2120_v2  ;;  %v2153_v25 = vand.u32 2147483647, %v2121_v3  ;;  %v2175_v12 = vpack.c.bf16 %v2151_v9, %v2150_v4  ;;  %v1991_v23 = vcombine.high %v1989_v11, %v1989_v11 }
 0xf87   :  { %3362 = vmatprep.mubr.msk.bf16.mxu0 %vm654_vm14, %v2172_v46  ;;  %v2122_v14 = vsub.f32 %v2063_v5, %v4373_v56  ;;  %v2123_v29 = vsub.f32 %v2063_v5, %v4386_v38  ;;  %v2124_v16 = vsub.f32 %v2067_v10, %v4373_v56  ;;  %v2125_v17 = vsub.f32 %v2067_v10, %v4386_v38 }
 0xf88   :  { %v2176_v15 = vpack.c.bf16 %v2153_v25, %v2152_v7  ;;  %v2071_v21 = vrot.slane %v2022_v1, %v4008_v28  ;;  %v2075_v60 = vrot.slane %v2005_v18, %v4008_v28  ;;  %v2019_v36 = vrot.slane %v1991_v23, %v4371_v48 }
 0xf89   :  { %v2154_v43 = vand.u32 2147483647, %v2122_v14  ;;  %v2155_v19 = vand.u32 2147483647, %v2123_v29  ;;  %v2156_v20 = vand.u32 2147483647, %v2124_v16  ;;  %v2021_v47 = vcombine.high %v2005_v18, %v2005_v18 }
 0xf8a   :  { %v2157_v26 = vand.u32 2147483647, %v2125_v17  ;;  %v2126_v32 = vsub.f32 %v2071_v21, %v4373_v56  ;;  %v2127_v33 = vsub.f32 %v2071_v21, %v4386_v38  ;;  %v2128_v39 = vsub.f32 %v2075_v60, %v4373_v56 }
 0xf8b   :  { %v2177_v31 = vpack.c.bf16 %v2155_v19, %v2154_v43  ;;  %v2129_v58 = vsub.f32 %v2075_v60, %v4386_v38  ;;  %v2079_v35 = vrot.slane %v2019_v36, %v4008_v28  ;;  %v2083_v40 = vrot.slane %v2021_v47, %v4008_v28 }
 0xf8c   :  { %v2178_v37 = vpack.c.bf16 %v2157_v26, %v2156_v20  ;;  %v2158_v54 = vand.u32 2147483647, %v2126_v32  ;;  %v2159_v24 = vand.u32 2147483647, %v2127_v33  ;;  %v2160_v53 = vand.u32 2147483647, %v2128_v39 }
 0xf8d   :  { %v2161_v34 = vand.u32 2147483647, %v2129_v58  ;;  %v2130_v48 = vsub.f32 %v2079_v35, %v4373_v56  ;;  %v2131_v44 = vsub.f32 %v2079_v35, %v4386_v38  ;;  %v2023_v46 = vcombine.high %v2019_v36, %v2019_v36 }
 0xf8e   :  { %3363 = vmatmul.mubr.msk.bf16.gmra.mrb[36].mxu0 %vm654_vm14, %v2173_v62  ;;  %v2179_v55 = vpack.c.bf16 %v2159_v24, %v2158_v54  ;;  %v2132_v13 = vsub.f32 %v2083_v40, %v4373_v56  ;;  %v2133_v41 = vsub.f32 %v2083_v40, %v4386_v38 }
 0xf8f   :  { %3366 = vmatprep.mubr.msk.bf16.mxu0 %vm654_vm14, %v2174_v6  ;;  %v2180_v45 = vpack.c.bf16 %v2161_v34, %v2160_v53  ;;  %v2162_v51 = vand.u32 2147483647, %v2130_v48  ;;  %v2163_v52 = vand.u32 2147483647, %v2131_v44  ;;  %v2087_v42 = vrot.slane %v2023_v46, %v4008_v28  ;;  %v4469_v6 = vld [vmem:[#allocation8] ss:$0 sm:$0xff] }
 0xf90   :  { %v2164_v57 = vand.u32 2147483647, %v2132_v13  ;;  %v2165_v59 = vand.u32 2147483647, %v2133_v41 }
 0xf91   :  { %v2181_v49 = vpack.c.bf16 %v2163_v52, %v2162_v51  ;;  %v2134_v61 = vsub.f32 %v2087_v42, %v4373_v56  ;;  %v2135_v8 = vsub.f32 %v2087_v42, %v4386_v38 }
 0xf92   :  { %v2182_v62 = vpack.c.bf16 %v2165_v59, %v2164_v57 }
 0xf93   :  { %v2166_v50 = vand.u32 2147483647, %v2134_v61  ;;  %v2167_v63 = vand.u32 2147483647, %v2135_v8 }
 0xf95   :  { %v2183_v0 = vpack.c.bf16 %v2167_v63, %v2166_v50 }
 0xf96   :  { %3367 = vmatmul.mubr.msk.bf16.gmra.mrb[40].mxu0 %vm654_vm14, %v2175_v12 }
 0xf97   :  { %3370 = vmatprep.mubr.msk.bf16.mxu0 %vm654_vm14, %v2176_v15 }
 0xf9e   :  { %3371 = vmatmul.mubr.msk.bf16.gmra.mrb[44].mxu0 %vm654_vm14, %v2177_v31 }
 0xf9f   :  { %3374 = vmatprep.mubr.msk.bf16.mxu0 %vm654_vm14, %v2178_v37 }
 0xfa6   :  { %3375 = vmatmul.mubr.msk.bf16.gmra.mrb[48].mxu0 %vm654_vm14, %v2179_v55 }
 0xfa7   :  { %3378 = vmatprep.mubr.msk.bf16.mxu0 %vm654_vm14, %v2180_v45 }
 0xfae   :  { %3379 = vmatmul.mubr.msk.bf16.gmra.mrb[52].mxu0 %vm654_vm14, %v2181_v49 }
 0xfaf   :  { %3382 = vmatprep.mubr.msk.bf16.mxu0 %vm654_vm14, %v2182_v62 }
 0xfb6   :  { %3383 = vmatmul.mubr.msk.bf16.gmra.mrb[56].mxu0 %vm654_vm14, %v2183_v0 }
0x1051   :  { %v3356_v28 = vpop.f32.mrb[28].mxu0 }
0x1052   :  { %v2298_v2 = vadd.f32 %v3356_v28, %v4469_v6  ;;  %v2289_v3 = vpop.f32.mrb[29].mxu0 }
0x1053   :  { %v2290_v56 = vadd.f32 %v4469_v6, %v2289_v3  ;;  %v3357_v38 = vpop.f32.mrb[30].mxu0 }
0x1054   :  { %v2418_v4 = vmax.f32 %v2298_v2, 0.0  ;;  %v2301_v9 = vadd.f32 %v3357_v38, %v4469_v6  ;;  %v2292_v5 = vpop.f32.mrb[31].mxu0 }
0x1055   :  { %v2416_v7 = vmax.f32 %v2290_v56, 0.0  ;;  %v2293_v25 = vadd.f32 %v4469_v6, %v2292_v5 }
0x1056   :  { %v2457_v10 = vmul.f32 %v4472_v22, %v2418_v4  ;;  %v2419_v11 = vmax.f32 %v2301_v9, 0.0 }
0x1057   :  { %v2455_v12 = vmul.f32 %v4472_v22, %v2416_v7  ;;  %v2417_v14 = vmax.f32 %v2293_v25, 0.0 }
0x1058   :  { %v2493_v29 = vsel %vm654_vm14, %v2457_v10, 0.0  ;;  %v2458_v1 = vmul.f32 %v4472_v22, %v2419_v11 }
0x1059   :  { %v2456_v15 = vmul.f32 %v4472_v22, %v2417_v14  ;;  %2494 = vadd.xlane.f32.xlu0 %v2493_v29  ;;  %v3360_v16 = vpop.f32.mrb[32].mxu0  ;;  %v2487_v17 = vsel %vm654_vm14, %v2455_v12, 0.0 }
0x105a   :  { %v2314_v18 = vadd.f32 %v3360_v16, %v4469_v6  ;;  %v2305_v43 = vpop.f32.mrb[33].mxu0  ;;  %2488 = vadd.xlane.f32.xlu1 %v2487_v17  ;;  %v2496_v33 = vsel %vm654_vm14, %v2458_v1, 0.0 }
0x105b   :  { %v2306_v19 = vadd.f32 %v4469_v6, %v2305_v43  ;;  %v3361_v21 = vpop.f32.mrb[34].mxu0  ;;  %v2490_v23 = vsel %vm654_vm14, %v2456_v15, 0.0 }
0x105c   :  { %v2422_v20 = vmax.f32 %v2314_v18, 0.0  ;;  %v2317_v26 = vadd.f32 %v3361_v21, %v4469_v6  ;;  %v2308_v60 = vpop.f32.mrb[35].mxu0 }
0x105d   :  { %v2420_v31 = vmax.f32 %v2306_v19, 0.0  ;;  %v2309_v32 = vadd.f32 %v4469_v6, %v2308_v60  ;;  %2491 = vadd.xlane.f32.xlu0 %v2490_v23 }
0x105e   :  { %v2461_v36 = vmul.f32 %v4472_v22, %v2422_v20  ;;  %v2423_v37 = vmax.f32 %v2317_v26, 0.0  ;;  %2497 = vadd.xlane.f32.xlu1 %v2496_v33 }
0x105f   :  { %v2421_v39 = vmax.f32 %v2309_v32, 0.0  ;;  %v2459_v58 = vmul.f32 %v4472_v22, %v2420_v31 }
0x1060   :  { %v2462_v47 = vmul.f32 %v4472_v22, %v2423_v37  ;;  %v2505_v54 = vsel %vm654_vm14, %v2461_v36, 0.0 }
0x1061   :  { %v3364_v24 = vpop.f32.mrb[36].mxu0  ;;  %2506 = vadd.xlane.f32.xlu0 %v2505_v54  ;;  %v2460_v35 = vmul.f32 %v4472_v22, %v2421_v39  ;;  %v2499_v13 = vsel %vm654_vm14, %v2459_v58, 0.0 }
0x1062   :  { %v2330_v53 = vadd.f32 %v3364_v24, %v4469_v6  ;;  %v2321_v34 = vpop.f32.mrb[37].mxu0  ;;  %v2508_v40 = vsel %vm654_vm14, %v2462_v47, 0.0 }
0x1063   :  { %v2322_v55 = vadd.f32 %v4469_v6, %v2321_v34  ;;  %v3365_v48 = vpop.f32.mrb[38].mxu0  ;;  %2509 = vadd.xlane.f32.xlu1 %v2508_v40  ;;  %v2502_v57 = vsel %vm654_vm14, %v2460_v35, 0.0 }
0x1064   :  { %v2426_v44 = vmax.f32 %v2330_v53, 0.0  ;;  %v2333_v46 = vadd.f32 %v3365_v48, %v4469_v6  ;;  %v2324_v45 = vpop.f32.mrb[39].mxu0 }
0x1065   :  { %v2424_v41 = vmax.f32 %v2322_v55, 0.0  ;;  %v2325_v51 = vadd.f32 %v4469_v6, %v2324_v45  ;;  %2500 = vadd.xlane.f32.xlu0 %v2499_v13 }
0x1066   :  { %v2465_v52 = vmul.f32 %v4472_v22, %v2426_v44  ;;  %v2427_v42 = vmax.f32 %v2333_v46, 0.0 }
0x1067   :  { %v2425_v59 = vmax.f32 %v2325_v51, 0.0  ;;  %2503 = vadd.xlane.f32.xlu1 %v2502_v57  ;;  %v2463_v49 = vmul.f32 %v4472_v22, %v2424_v41 }
0x1068   :  { %v2466_v61 = vmul.f32 %v4472_v22, %v2427_v42  ;;  %v2517_v8 = vsel %vm654_vm14, %v2465_v52, 0.0 }
0x1069   :  { %v3368_v62 = vpop.f32.mrb[40].mxu0  ;;  %2518 = vadd.xlane.f32.xlu0 %v2517_v8  ;;  %v2464_v50 = vmul.f32 %v4472_v22, %v2425_v59  ;;  %v2511_v9 = vsel %vm654_vm14, %v2463_v49, 0.0 }
0x106a   :  { %v2346_v63 = vadd.f32 %v3368_v62, %v4469_v6  ;;  %v2337_v0 = vpop.f32.mrb[41].mxu0  ;;  %v2520_v28 = vsel %vm654_vm14, %v2466_v61, 0.0 }
0x106b   :  { %v2338_v2 = vadd.f32 %v4469_v6, %v2337_v0  ;;  %v3369_v3 = vpop.f32.mrb[42].mxu0  ;;  %2521 = vadd.xlane.f32.xlu1 %v2520_v28  ;;  %v2514_v11 = vsel %vm654_vm14, %v2464_v50, 0.0 }
0x106c   :  { %v2430_v56 = vmax.f32 %v2346_v63, 0.0  ;;  %v2349_v38 = vadd.f32 %v3369_v3, %v4469_v6  ;;  %v2340_v4 = vpop.f32.mrb[43].mxu0 }
0x106d   :  { %v2428_v5 = vmax.f32 %v2338_v2, 0.0  ;;  %v2341_v7 = vadd.f32 %v4469_v6, %v2340_v4  ;;  %2512 = vadd.xlane.f32.xlu0 %v2511_v9 }
0x106e   :  { %v2469_v25 = vmul.f32 %v4472_v22, %v2430_v56  ;;  %v2431_v10 = vmax.f32 %v2349_v38, 0.0 }
0x106f   :  { %v2429_v12 = vmax.f32 %v2341_v7, 0.0  ;;  %2515 = vadd.xlane.f32.xlu1 %v2514_v11  ;;  %v2467_v14 = vmul.f32 %v4472_v22, %v2428_v5 }
0x1070   :  { %v2470_v29 = vmul.f32 %v4472_v22, %v2431_v10  ;;  %v2529_v1 = vsel %vm654_vm14, %v2469_v25, 0.0 }
0x1071   :  { %v3372_v15 = vpop.f32.mrb[44].mxu0  ;;  %2530 = vadd.xlane.f32.xlu0 %v2529_v1  ;;  %v2468_v16 = vmul.f32 %v4472_v22, %v2429_v12  ;;  %v2523_v60 = vsel %vm654_vm14, %v2467_v14, 0.0 }
0x1072   :  { %v2362_v17 = vadd.f32 %v3372_v15, %v4469_v6  ;;  %v2353_v18 = vpop.f32.mrb[45].mxu0  ;;  %v2532_v43 = vsel %vm654_vm14, %v2470_v29, 0.0 }
0x1073   :  { %v2354_v19 = vadd.f32 %v4469_v6, %v2353_v18  ;;  %v3373_v21 = vpop.f32.mrb[46].mxu0  ;;  %2533 = vadd.xlane.f32.xlu1 %v2532_v43  ;;  %v2526_v37 = vsel %vm654_vm14, %v2468_v16, 0.0 }
0x1074   :  { %v2434_v23 = vmax.f32 %v2362_v17, 0.0  ;;  %v2365_v20 = vadd.f32 %v3373_v21, %v4469_v6  ;;  %v2356_v26 = vpop.f32.mrb[47].mxu0 }
0x1075   :  { %v2432_v31 = vmax.f32 %v2354_v19, 0.0  ;;  %v2357_v32 = vadd.f32 %v4469_v6, %v2356_v26  ;;  %2524 = vadd.xlane.f32.xlu0 %v2523_v60 }
0x1076   :  { %v2473_v33 = vmul.f32 %v4472_v22, %v2434_v23  ;;  %v2435_v36 = vmax.f32 %v2365_v20, 0.0 }
0x1077   :  { %v2433_v39 = vmax.f32 %v2357_v32, 0.0  ;;  %2527 = vadd.xlane.f32.xlu1 %v2526_v37  ;;  %v2471_v58 = vmul.f32 %v4472_v22, %v2432_v31 }
0x1078   :  { %v2474_v47 = vmul.f32 %v4472_v22, %v2435_v36  ;;  %v2541_v54 = vsel %vm654_vm14, %v2473_v33, 0.0 }
0x1079   :  { %v3376_v24 = vpop.f32.mrb[48].mxu0  ;;  %2542 = vadd.xlane.f32.xlu0 %v2541_v54  ;;  %v2472_v35 = vmul.f32 %v4472_v22, %v2433_v39  ;;  %v2535_v13 = vsel %vm654_vm14, %v2471_v58, 0.0 }
0x107a   :  { %v2378_v53 = vadd.f32 %v3376_v24, %v4469_v6  ;;  %v2369_v34 = vpop.f32.mrb[49].mxu0  ;;  %v2544_v40 = vsel %vm654_vm14, %v2474_v47, 0.0 }
0x107b   :  { %v2370_v55 = vadd.f32 %v4469_v6, %v2369_v34  ;;  %v3377_v48 = vpop.f32.mrb[50].mxu0  ;;  %2545 = vadd.xlane.f32.xlu1 %v2544_v40  ;;  %v2538_v57 = vsel %vm654_vm14, %v2472_v35, 0.0  ;;  %v3081_v34 = vld [vmem:[#allocation2] ss:$0 sm:$0xff] }
0x107c   :  { %v2438_v44 = vmax.f32 %v2378_v53, 0.0  ;;  %v2381_v46 = vadd.f32 %v3377_v48, %v4469_v6  ;;  %v2372_v45 = vpop.f32.mrb[51].mxu0 }
0x107d   :  { %v2436_v41 = vmax.f32 %v2370_v55, 0.0  ;;  %v2373_v51 = vadd.f32 %v4469_v6, %v2372_v45  ;;  %2536 = vadd.xlane.f32.xlu0 %v2535_v13 }
0x107e   :  { %v2477_v52 = vmul.f32 %v4472_v22, %v2438_v44  ;;  %v2439_v42 = vmax.f32 %v2381_v46, 0.0 }
0x107f   :  { %v2437_v59 = vmax.f32 %v2373_v51, 0.0  ;;  %2539 = vadd.xlane.f32.xlu1 %v2538_v57  ;;  %v2475_v49 = vmul.f32 %v4472_v22, %v2436_v41 }
0x1080   :  { %v2478_v61 = vmul.f32 %v4472_v22, %v2439_v42  ;;  %v2553_v8 = vsel %vm654_vm14, %v2477_v52, 0.0 }
0x1081   :  { %v3380_v62 = vpop.f32.mrb[52].mxu0  ;;  %2554 = vadd.xlane.f32.xlu0 %v2553_v8  ;;  %v2476_v50 = vmul.f32 %v4472_v22, %v2437_v59  ;;  %v2547_v9 = vsel %vm654_vm14, %v2475_v49, 0.0 }
0x1082   :  { %v2394_v63 = vadd.f32 %v3380_v62, %v4469_v6  ;;  %v2385_v0 = vpop.f32.mrb[53].mxu0  ;;  %v2556_v28 = vsel %vm654_vm14, %v2478_v61, 0.0 }
0x1083   :  { %v2386_v2 = vadd.f32 %v4469_v6, %v2385_v0  ;;  %v3381_v3 = vpop.f32.mrb[54].mxu0  ;;  %2557 = vadd.xlane.f32.xlu1 %v2556_v28  ;;  %v2550_v11 = vsel %vm654_vm14, %v2476_v50, 0.0 }
0x1084   :  { %v2442_v56 = vmax.f32 %v2394_v63, 0.0  ;;  %v2397_v38 = vadd.f32 %v3381_v3, %v4469_v6  ;;  %v2388_v4 = vpop.f32.mrb[55].mxu0 }
0x1085   :  { %v2440_v5 = vmax.f32 %v2386_v2, 0.0  ;;  %v2389_v7 = vadd.f32 %v4469_v6, %v2388_v4  ;;  %2548 = vadd.xlane.f32.xlu0 %v2547_v9 }
0x1086   :  { %v2481_v25 = vmul.f32 %v4472_v22, %v2442_v56  ;;  %v2443_v10 = vmax.f32 %v2397_v38, 0.0 }
0x1087   :  { %v2441_v12 = vmax.f32 %v2389_v7, 0.0  ;;  %2551 = vadd.xlane.f32.xlu1 %v2550_v11  ;;  %v2479_v14 = vmul.f32 %v4472_v22, %v2440_v5 }
0x1088   :  { %v2482_v29 = vmul.f32 %v4472_v22, %v2443_v10  ;;  %v2565_v1 = vsel %vm654_vm14, %v2481_v25, 0.0 }
0x1089   :  { %v3384_v15 = vpop.f32.mrb[56].mxu0  ;;  %2566 = vadd.xlane.f32.xlu0 %v2565_v1  ;;  %v2480_v16 = vmul.f32 %v4472_v22, %v2441_v12  ;;  %v2559_v60 = vsel %vm654_vm14, %v2479_v14, 0.0 }
0x108a   :  { %v2410_v17 = vadd.f32 %v3384_v15, %v4469_v6  ;;  %v2401_v18 = vpop.f32.mrb[57].mxu0  ;;  %v2568_v43 = vsel %vm654_vm14, %v2482_v29, 0.0 }
0x108b   :  { %v2402_v19 = vadd.f32 %v4469_v6, %v2401_v18  ;;  %v3385_v21 = vpop.f32.mrb[58].mxu0  ;;  %2569 = vadd.xlane.f32.xlu1 %v2568_v43  ;;  %v2562_v36 = vsel %vm654_vm14, %v2480_v16, 0.0 }
0x108c   :  { %v2446_v23 = vmax.f32 %v2410_v17, 0.0  ;;  %v2413_v20 = vadd.f32 %v3385_v21, %v4469_v6  ;;  %v2404_v26 = vpop.f32.mrb[59].mxu0 }
0x108d   :  { %v2444_v31 = vmax.f32 %v2402_v19, 0.0  ;;  %v2405_v32 = vadd.f32 %v4469_v6, %v2404_v26  ;;  %2560 = vadd.xlane.f32.xlu0 %v2559_v60 }
0x108e   :  { %v2485_v33 = vmul.f32 %v4472_v22, %v2446_v23  ;;  %v2447_v37 = vmax.f32 %v2413_v20, 0.0 }
0x108f   :  { %v2445_v39 = vmax.f32 %v2405_v32, 0.0  ;;  %2563 = vadd.xlane.f32.xlu1 %v2562_v36  ;;  %v2483_v58 = vmul.f32 %v4472_v22, %v2444_v31 }
0x1090   :  { %v2577_v47 = vsel %vm654_vm14, %v2485_v33, 0.0  ;;  %v2486_v24 = vmul.f32 %v4472_v22, %v2447_v37 }
0x1091   :  { %v2484_v54 = vmul.f32 %v4472_v22, %v2445_v39  ;;  %2578 = vadd.xlane.f32.xlu0 %v2577_v47  ;;  %v2571_v6 = vsel %vm654_vm14, %v2483_v58, 0.0 }
0x1092   :  { %v2580_v53 = vsel %vm654_vm14, %v2486_v24, 0.0 }
0x1093   :  { %v2574_v35 = vsel %vm654_vm14, %v2484_v54, 0.0  ;;  %vm2995_vm14 = vcmask 1041409  }
0x1094   :  { %2575 = vadd.xlane.f32.xlu1 %v2574_v35 }
0x1095   :  { %2572 = vadd.xlane.f32.xlu0 %v2571_v6 }
0x1098   :  { %2581 = vadd.xlane.f32.xlu1 %v2580_v53 }
0x10ab   :  { %2590 = vperm.xlu0 %3422, %v3081_v34  }
0x10e6   :  { %v2495_v40 = vpop.xlane.xlu0 %2494 }
0x10e7   :  { %v2489_v44 = vpop.xlane.xlu1 %2488 }
0x10ea   :  { %v2492_v55 = vpop.xlane.xlu0 %2491 }
0x10eb   :  { %v2498_v13 = vpop.xlane.xlu1 %2497 }
0x10ee   :  { %v2507_v48 = vpop.xlane.xlu0 %2506 }
0x10f0   :  { %v2510_v22 = vpop.xlane.xlu1 %2509 }
0x10f2   :  { %v2501_v46 = vpop.xlane.xlu0 %2500 }
0x10f4   :  { %v2504_v42 = vpop.xlane.xlu1 %2503 }
0x10f6   :  { %v2519_v45 = vpop.xlane.xlu0 %2518 }
0x10f8   :  { %v2522_v59 = vpop.xlane.xlu1 %2521 }
0x10fa   :  { %v2513_v41 = vpop.xlane.xlu0 %2512 }
0x10fc   :  { %v2516_v8 = vpop.xlane.xlu1 %2515 }
0x10fe   :  { %v2531_v51 = vpop.xlane.xlu0 %2530 }
0x1100   :  { %v2534_v50 = vpop.xlane.xlu1 %2533 }
0x1102   :  { %v2525_v52 = vpop.xlane.xlu0 %2524 }
0x1104   :  { %v2528_v0 = vpop.xlane.xlu1 %2527 }
0x1106   :  { %v2543_v57 = vpop.xlane.xlu0 %2542 }
0x1108   :  { %v2546_v2 = vpop.xlane.xlu1 %2545 }
0x110a   :  { %v2537_v49 = vpop.xlane.xlu0 %2536 }
0x110c   :  { %v2540_v56 = vpop.xlane.xlu1 %2539 }
0x110e   :  { %v4569_v61 = vpop.xlane.xlu0 %2554 }
0x1110   :  { %v4583_v9 = vpop.xlane.xlu1 %2557 }
0x1112   :  { %v4571_v62 = vpop.xlane.xlu0 %2548 }
0x1114   :  { %v2552_v14 = vpop.xlane.xlu1 %2551 }
0x1116   :  { %v4573_v63 = vpop.xlane.xlu0 %2566 }
0x1118   :  { %v2570_v32 = vpop.xlane.xlu1 %2569 }
0x111a   :  { %v4575_v28 = vpop.xlane.xlu0 %2560 }
0x111e   :  { %v4577_v3 = vpop.xlane.xlu0 %2578 }
0x1122   :  { %v4579_v38 = vpop.xlane.xlu0 %2572 }
0x112a   :  { %v4581_v4 = vpop.permute.xlu0 %2590 }
0x112b   :  { %v2593_v5 = vadd.f32 %v4581_v4, %v2489_v44  ;;  %v2594_v7 = vadd.f32 %v4581_v4, %v2492_v55  ;;  %v2595_v25 = vadd.f32 %v4581_v4, %v2495_v40  ;;  %v2596_v10 = vadd.f32 %v4581_v4, %v2498_v13  ;;  %v2564_v55 = vpop.xlane.xlu1 %2563 }
0x112c   :  { %v2597_v11 = vadd.f32 %v4581_v4, %v2501_v46  ;;  %v2598_v12 = vadd.f32 %v4581_v4, %v2504_v42  ;;  %v2599_v29 = vadd.f32 %v4581_v4, %v2507_v48  ;;  %v2600_v17 = vadd.f32 %v4581_v4, %v2510_v22 }
0x112d   :  { %v3082_v1 = vmul.f32 -1.442695, %v2593_v5  ;;  %v3083_v15 = vmul.f32 -1.442695, %v2594_v7  ;;  %v3084_v16 = vmul.f32 -1.442695, %v2595_v25  ;;  %v2601_v43 = vadd.f32 %v4581_v4, %v2513_v41 }
0x112e   :  { %v3085_v18 = vmul.f32 -1.442695, %v2596_v10  ;;  %v3086_v19 = vmul.f32 -1.442695, %v2597_v11  ;;  %v2602_v21 = vadd.f32 %v4581_v4, %v2516_v8  ;;  %v3087_v23 = vmul.f32 -1.442695, %v2598_v12 }
0x112f   :  { %3537 = vpow2.f32 %v3082_v1  ;;  %v2603_v20 = vadd.f32 %v4581_v4, %v2519_v45  ;;  %v3088_v26 = vmul.f32 -1.442695, %v2599_v29  ;;  %v2604_v60 = vadd.f32 %v4581_v4, %v2522_v59 }
0x1130   :  { %3539 = vpow2.f32 %v3083_v15  ;;  %v3089_v31 = vmul.f32 -1.442695, %v2600_v17  ;;  %v2605_v33 = vadd.f32 %v4581_v4, %v2525_v52  ;;  %v3090_v36 = vmul.f32 -1.442695, %v2601_v43 }
0x1131   :  { %3541 = vpow2.f32 %v3084_v16  ;;  %v2606_v37 = vadd.f32 %v4581_v4, %v2528_v0  ;;  %v3091_v39 = vmul.f32 -1.442695, %v2602_v21  ;;  %v2607_v58 = vadd.f32 %v4581_v4, %v2531_v51 }
0x1132   :  { %3543 = vpow2.f32 %v3085_v18  ;;  %v3092_v47 = vmul.f32 -1.442695, %v2603_v20  ;;  %v2608_v54 = vadd.f32 %v4581_v4, %v2534_v50  ;;  %v3093_v24 = vmul.f32 -1.442695, %v2604_v60 }
0x1133   :  { %3545 = vpow2.f32 %v3086_v19  ;;  %v2609_v35 = vadd.f32 %v4581_v4, %v2537_v49  ;;  %v3094_v6 = vmul.f32 -1.442695, %v2605_v33  ;;  %v2610_v53 = vadd.f32 %v4581_v4, %v2540_v56  ;;  %v2576_v56 = vpop.xlane.xlu1 %2575 }
0x1134   :  { %3547 = vpow2.f32 %v3087_v23  ;;  %v3095_v34 = vmul.f32 -1.442695, %v2606_v37  ;;  %v2611_v48 = vadd.f32 %v4581_v4, %v2543_v57  ;;  %v3096_v44 = vmul.f32 -1.442695, %v2607_v58 }
0x1135   :  { %3549 = vpow2.f32 %v3088_v26  ;;  %v2612_v45 = vadd.f32 %v4581_v4, %v2546_v2  ;;  %v3097_v13 = vmul.f32 -1.442695, %v2608_v54  ;;  %v2613_v22 = vadd.f32 %v4581_v4, %v4571_v62 }
0x1136   :  { %3551 = vpow2.f32 %v3089_v31  ;;  %v3098_v51 = vmul.f32 -1.442695, %v2609_v35  ;;  %v2614_v42 = vadd.f32 %v4581_v4, %v2552_v14  ;;  %v3099_v57 = vmul.f32 -1.442695, %v2610_v53 }
0x1137   :  { %3553 = vpow2.f32 %v3090_v36  ;;  %v2615_v49 = vadd.f32 %v4581_v4, %v4569_v61  ;;  %v3100_v8 = vmul.f32 -1.442695, %v2611_v48  ;;  %v2616_v62 = vadd.f32 %v4581_v4, %v4583_v9 }
0x1138   :  { %3555 = vpow2.f32 %v3091_v39  ;;  %v3101_v0 = vmul.f32 -1.442695, %v2612_v45  ;;  %v2617_v5 = vadd.f32 %v4581_v4, %v4575_v28  ;;  %v3102_v7 = vmul.f32 -1.442695, %v2613_v22 }
0x1139   :  { %v4603_v40 = vpop.eup %3537  ;;  %3557 = vpow2.f32 %v3092_v47  ;;  %v2618_v61 = vadd.f32 %v4581_v4, %v2564_v55  ;;  %v3103_v10 = vmul.f32 -1.442695, %v2614_v42  ;;  %v2619_v12 = vadd.f32 %v4581_v4, %v4573_v63  ;;  %v2582_v63 = vpop.xlane.xlu1 %2581 }
0x113a   :  { %v4606_v46 = vpop.eup %3539  ;;  %3559 = vpow2.f32 %v3093_v24  ;;  %v3104_v9 = vmul.f32 -1.442695, %v2615_v49  ;;  %v2620_v29 = vadd.f32 %v4581_v4, %v2570_v32  ;;  %v3105_v1 = vmul.f32 -1.442695, %v2616_v62 }
0x113b   :  { %v4609_v41 = vpop.eup %3541  ;;  %3561 = vpow2.f32 %v3094_v6  ;;  %v2621_v28 = vadd.f32 %v4581_v4, %v4579_v38  ;;  %v3106_v16 = vmul.f32 -1.442695, %v2617_v5  ;;  %v2622_v18 = vadd.f32 %v4581_v4, %v2576_v56 }
0x113c   :  { %v4613_v52 = vpop.eup %3543  ;;  %3563 = vpow2.f32 %v3095_v34  ;;  %v3107_v43 = vmul.f32 -1.442695, %v2618_v61  ;;  %v2623_v21 = vadd.f32 %v4581_v4, %v4577_v3  ;;  %v3108_v23 = vmul.f32 -1.442695, %v2619_v12 }
0x113d   :  { %v4616_v59 = vpop.eup %3545  ;;  %3565 = vpow2.f32 %v3096_v44  ;;  %v2624_v26 = vadd.f32 %v4581_v4, %v2582_v63  ;;  %v3109_v60 = vmul.f32 -1.442695, %v2620_v29  ;;  %v3110_v31 = vmul.f32 -1.442695, %v2621_v28 }
0x113e   :  { %v4620_v50 = vpop.eup %3547  ;;  %3567 = vpow2.f32 %v3097_v13  ;;  %v3111_v33 = vmul.f32 -1.442695, %v2622_v18  ;;  %v3112_v37 = vmul.f32 -1.442695, %v2623_v21  ;;  %v2721_v4 = vadd.f32 1.0, %v4603_v40 }
0x113f   :  { %v4624_v2 = vpop.eup %3549  ;;  %3569 = vpow2.f32 %v3098_v51  ;;  %v3113_v3 = vmul.f32 -1.442695, %v2624_v26  ;;  %v2722_v54 = vadd.f32 1.0, %v4606_v46  ;;  %v2723_v35 = vadd.f32 1.0, %v4609_v41 }
0x1140   :  { %v3552_v25 = vpop.eup %3551  ;;  %3571 = vpow2.f32 %v3099_v57  ;;  %v2724_v53 = vadd.f32 1.0, %v4613_v52  ;;  %v2725_v55 = vadd.f32 1.0, %v4616_v59  ;;  %v2726_v48 = vadd.f32 1.0, %v4620_v50 }
0x1141   :  { %v3554_v11 = vpop.eup %3553  ;;  %3573 = vpow2.f32 %v3100_v8  ;;  %v2727_v46 = vadd.f32 1.0, %v4624_v2  ;;  %v2728_v13 = vadd.f32 1.0, %v3552_v25  ;;  %v2853_v22 = vadd.s32 4294967288, %v4013_v30 }
0x1142   :  { %v3556_v14 = vpop.eup %3555  ;;  %3575 = vpow2.f32 %v3101_v0  ;;  %v2729_v51 = vadd.f32 1.0, %v3554_v11  ;;  %v4674_v8 = vsub.s32 %v4013_v30, %v4005_v27 }
0x1143   :  { %v3558_v15 = vpop.eup %3557  ;;  %3577 = vpow2.f32 %v3102_v7  ;;  %v2730_v42 = vadd.f32 1.0, %v3556_v14  ;;  %v4679_v0 = vsub.s32 %v2853_v22, %v4005_v27 }
0x1144   :  { %v3560_v17 = vpop.eup %3559  ;;  %3579 = vpow2.f32 %v3103_v10  ;;  %v2731_v59 = vadd.f32 1.0, %v3558_v15 }
0x1145   :  { %v3562_v19 = vpop.eup %3561  ;;  %3581 = vpow2.f32 %v3104_v9  ;;  %v2732_v50 = vadd.f32 1.0, %v3560_v17 }
0x1146   :  { %v3564_v20 = vpop.eup %3563  ;;  %3583 = vpow2.f32 %v3105_v1  ;;  %v2733_v2 = vadd.f32 1.0, %v3562_v19 }
0x1147   :  { %v3566_v38 = vpop.eup %3565  ;;  %3585 = vpow2.f32 %v3106_v16  ;;  %v2734_v5 = vadd.f32 1.0, %v3564_v20 }
0x1148   :  { %v3568_v32 = vpop.eup %3567  ;;  %3587 = vpow2.f32 %v3107_v43  ;;  %v2735_v25 = vadd.f32 1.0, %v3566_v38 }
0x1149   :  { %v3570_v36 = vpop.eup %3569  ;;  %3589 = vpow2.f32 %v3108_v23  ;;  %v2736_v61 = vadd.f32 1.0, %v3568_v32 }
0x114a   :  { %v4638_v39 = vpop.eup %3571  ;;  %3591 = vpow2.f32 %v3109_v60  ;;  %v2737_v27 = vadd.f32 1.0, %v3570_v36 }
0x114b   :  { %v4640_v58 = vpop.eup %3573  ;;  %3593 = vpow2.f32 %v3110_v31  ;;  %v2738_v14 = vadd.f32 1.0, %v4638_v39 }
0x114c   :  { %v4643_v47 = vpop.eup %3575  ;;  %3595 = vpow2.f32 %v3111_v33  ;;  %v2739_v15 = vadd.f32 1.0, %v4640_v58 }
0x114d   :  { %v4646_v24 = vpop.eup %3577  ;;  %3597 = vpow2.f32 %v3112_v37  ;;  %v2740_v18 = vadd.f32 1.0, %v4643_v47 }
0x114e   :  { %v4649_v6 = vpop.eup %3579  ;;  %3599 = vpow2.f32 %v3113_v3  ;;  %v2741_v63 = vadd.f32 1.0, %v4646_v24 }
0x114f   :  { %v4652_v34 = vpop.eup %3581  ;;  %3601 = vrcp.f32 %v2721_v4  ;;  %v2742_v26 = vadd.f32 1.0, %v4649_v6 }
0x1150   :  { %v4655_v40 = vpop.eup %3583  ;;  %3603 = vrcp.f32 %v2722_v54  ;;  %v2743_v32 = vadd.f32 1.0, %v4652_v34 }
0x1151   :  { %v4658_v44 = vpop.eup %3585  ;;  %3605 = vrcp.f32 %v2723_v35  ;;  %v2744_v39 = vadd.f32 1.0, %v4655_v40 }
0x1152   :  { %v4661_v45 = vpop.eup %3587  ;;  %3607 = vrcp.f32 %v2724_v53  ;;  %v2745_v47 = vadd.f32 1.0, %v4658_v44 }
0x1153   :  { %v4663_v41 = vpop.eup %3589  ;;  %3609 = vrcp.f32 %v2725_v55  ;;  %v2746_v6 = vadd.f32 1.0, %v4661_v45 }
0x1154   :  { %v4666_v52 = vpop.eup %3591  ;;  %3611 = vrcp.f32 %v2726_v48  ;;  %v2747_v40 = vadd.f32 1.0, %v4663_v41 }
0x1155   :  { %v4668_v57 = vpop.eup %3593  ;;  %3613 = vrcp.f32 %v2727_v46 }
0x1156   :  { %v4670_v49 = vpop.eup %3595  ;;  %3615 = vrcp.f32 %v2728_v13  ;;  %v2748_v13 = vadd.f32 1.0, %v4666_v52 }
0x1157   :  { %v4676_v62 = vpop.eup %3597  ;;  %3617 = vrcp.f32 %v2729_v51 }
0x1158   :  { %v4681_v56 = vpop.eup %3599  ;;  %3619 = vrcp.f32 %v2730_v42  ;;  %v2749_v42 = vadd.f32 1.0, %v4668_v57 }
0x1159   :  { %v3602_v7 = vpop.eup %3601  ;;  %3621 = vrcp.f32 %v2731_v59 }
0x115a   :  { %v3604_v30 = vpop.eup %3603  ;;  %3623 = vrcp.f32 %v2732_v50  ;;  %v2852_v10 = vrot.slane %v3602_v7, %v4674_v8 }
0x115b   :  { %v3606_v11 = vpop.eup %3605  ;;  %3625 = vrcp.f32 %v2733_v2  ;;  %v2857_v12 = vrot.slane %v3604_v30, %v4679_v0  ;;  %v2750_v2 = vadd.f32 1.0, %v4670_v49 }
0x115c   :  { %v3608_v9 = vpop.eup %3607  ;;  %3627 = vrcp.f32 %v2734_v5  ;;  %v2863_v29 = vrot.slane %v3606_v11, %v4674_v8 }
0x115d   :  { %v3610_v1 = vpop.eup %3609  ;;  %3629 = vrcp.f32 %v2735_v25  ;;  %v2859_v28 = vsel %vm2858_vm0, %v2857_v12, %v2852_v10  ;;  %v2867_v16 = vrot.slane %v3608_v9, %v4679_v0  ;;  %v2751_v25 = vadd.f32 1.0, %v4676_v62 }
0x115e   :  { %v3612_v17 = vpop.eup %3611  ;;  %3631 = vrcp.f32 %v2736_v61  ;;  %v2872_v43 = vrot.slane %v3610_v1, %v4674_v8  ;;  %v2752_v10 = vadd.f32 1.0, %v4681_v56 }
0x115f   :  { %v3614_v19 = vpop.eup %3613  ;;  %3633 = vrcp.f32 %v2737_v27  ;;  %v2868_v21 = vsel %vm2858_vm0, %v2867_v16, %v2863_v29  ;;  %v2876_v23 = vrot.slane %v3612_v17, %v4679_v0 }
0x1160   :  { %v3616_v20 = vpop.eup %3615  ;;  %3635 = vrcp.f32 %v2738_v14  ;;  %v2881_v60 = vrot.slane %v3614_v19, %v4674_v8  ;;  %v2996_v38 = vsel %vm2995_vm14, %v2868_v21, %v2859_v28 }
0x1161   :  { %v3618_v31 = vpop.eup %3617  ;;  %3637 = vrcp.f32 %v2739_v15  ;;  %v2877_v33 = vsel %vm2858_vm0, %v2876_v23, %v2872_v43  ;;  %v2885_v36 = vrot.slane %v3616_v20, %v4679_v0 }
0x1162   :  { %v3620_v37 = vpop.eup %3619  ;;  %3639 = vrcp.f32 %v2740_v18  ;;  %v2890_v3 = vrot.slane %v3618_v31, %v4674_v8  ;;  %v2998_v58 = vsel %vm2997_vm15, %v2877_v33, %v2996_v38 }
0x1163   :  { %v3622_v4 = vpop.eup %3621  ;;  %3641 = vrcp.f32 %v2741_v63  ;;  %v2886_v54 = vsel %vm2858_vm0, %v2885_v36, %v2881_v60  ;;  %v2894_v24 = vrot.slane %v3620_v37, %v4679_v0 }
0x1164   :  { %v3624_v35 = vpop.eup %3623  ;;  %3643 = vrcp.f32 %v2742_v26  ;;  %v2899_v53 = vrot.slane %v3622_v4, %v4674_v8  ;;  %v3000_v34 = vsel %vm2999_vm1, %v2886_v54, %v2998_v58 }
0x1165   :  { %v3626_v55 = vpop.eup %3625  ;;  %3645 = vrcp.f32 %v2743_v32  ;;  %v2895_v48 = vsel %vm2858_vm0, %v2894_v24, %v2890_v3  ;;  %v2903_v44 = vrot.slane %v3624_v35, %v4679_v0 }
0x1166   :  { %v3628_v46 = vpop.eup %3627  ;;  %3647 = vrcp.f32 %v2744_v39  ;;  %v2908_v22 = vrot.slane %v3626_v55, %v4674_v8  ;;  %v3002_v45 = vsel %vm3001_vm8, %v2895_v48, %v3000_v34 }
0x1167   :  { %v3630_v51 = vpop.eup %3629  ;;  %3649 = vrcp.f32 %v2745_v47  ;;  %v2904_v59 = vsel %vm2858_vm0, %v2903_v44, %v2899_v53  ;;  %v2912_v41 = vrot.slane %v3628_v46, %v4679_v0 }
0x1168   :  { %v3632_v50 = vpop.eup %3631  ;;  %3651 = vrcp.f32 %v2746_v6  ;;  %v2917_v5 = vrot.slane %v3630_v51, %v4674_v8  ;;  %v3004_v52 = vsel %vm3003_vm9, %v2904_v59, %v3002_v45 }
0x1169   :  { %v3634_v7 = vpop.eup %3633  ;;  %3653 = vrcp.f32 %v2747_v40  ;;  %v2913_v30 = vsel %vm2858_vm0, %v2912_v41, %v2908_v22  ;;  %v2921_v57 = vrot.slane %v3632_v50, %v4679_v0 }
0x116a   :  { %v3636_v61 = vpop.eup %3635  ;;  %3655 = vrcp.f32 %v2748_v13  ;;  %v2926_v11 = vrot.slane %v3634_v7, %v4674_v8  ;;  %v3006_v49 = vsel %vm3005_vm10, %v2913_v30, %v3004_v52 }
0x116b   :  { %v3638_v27 = vpop.eup %3637  ;;  %3657 = vrcp.f32 %v2749_v42  ;;  %v2922_v12 = vsel %vm2858_vm0, %v2921_v57, %v2917_v5  ;;  %v2930_v9 = vrot.slane %v3636_v61, %v4679_v0 }
0x116c   :  { %v3640_v62 = vpop.eup %3639  ;;  %3659 = vrcp.f32 %v2750_v2  ;;  %v2935_v14 = vrot.slane %v3638_v27, %v4674_v8  ;;  %v3008_v29 = vsel %vm3007_vm11, %v2922_v12, %v3006_v49 }
0x116d   :  { %v3642_v1 = vpop.eup %3641  ;;  %3661 = vrcp.f32 %v2751_v25  ;;  %v2931_v56 = vsel %vm2858_vm0, %v2930_v9, %v2926_v11  ;;  %v2939_v15 = vrot.slane %v3640_v62, %v4679_v0  ;;  %3018 = vst.msk [vmem:[%s4784_s16] sm:$0xff] %vm285_vm7, %v3008_v29 }
0x116e   :  { %v3644_v28 = vpop.eup %3643  ;;  %3663 = vrcp.f32 %v2752_v10  ;;  %v2944_v16 = vrot.slane %v3642_v1, %v4674_v8 }
0x116f   :  { %v3646_v17 = vpop.eup %3645  ;;  %v2940_v18 = vsel %vm2858_vm0, %v2939_v15, %v2935_v14  ;;  %v2948_v43 = vrot.slane %v3644_v28, %v4679_v0 }
0x1170   :  { %v3648_v19 = vpop.eup %3647  ;;  %v2953_v63 = vrot.slane %v3646_v17, %v4674_v8  ;;  %v3009_v21 = vsel %vm2995_vm14, %v2940_v18, %v2931_v56 }
0x1171   :  { %v3650_v23 = vpop.eup %3649  ;;  %v2949_v20 = vsel %vm2858_vm0, %v2948_v43, %v2944_v16  ;;  %v2957_v26 = vrot.slane %v3648_v19, %v4679_v0 }
0x1172   :  { %v3652_v60 = vpop.eup %3651  ;;  %v2962_v38 = vrot.slane %v3650_v23, %v4674_v8  ;;  %v3010_v31 = vsel %vm2997_vm15, %v2949_v20, %v3009_v21 }
0x1173   :  { %v3654_v32 = vpop.eup %3653  ;;  %v2958_v33 = vsel %vm2858_vm0, %v2957_v26, %v2953_v63  ;;  %v2966_v36 = vrot.slane %v3652_v60, %v4679_v0 }
0x1174   :  { %v3656_v37 = vpop.eup %3655  ;;  %v2971_v39 = vrot.slane %v3654_v32, %v4674_v8  ;;  %v3011_v3 = vsel %vm2999_vm1, %v2958_v33, %v3010_v31 }
0x1175   :  { %v3658_v58 = vpop.eup %3657  ;;  %v2967_v4 = vsel %vm2858_vm0, %v2966_v36, %v2962_v38  ;;  %v2975_v47 = vrot.slane %v3656_v37, %v4679_v0 }
0x1176   :  { %v3660_v54 = vpop.eup %3659  ;;  %v2980_v24 = vrot.slane %v3658_v58, %v4674_v8  ;;  %v3012_v35 = vsel %vm3001_vm8, %v2967_v4, %v3011_v3 }
0x1177   :  { %v3662_v6 = vpop.eup %3661  ;;  %v2976_v53 = vsel %vm2858_vm0, %v2975_v47, %v2971_v39  ;;  %v2984_v34 = vrot.slane %v3660_v54, %v4679_v0 }
0x1178   :  { %v3664_v55 = vpop.eup %3663  ;;  %v2989_v40 = vrot.slane %v3662_v6, %v4674_v8  ;;  %v3013_v48 = vsel %vm3003_vm9, %v2976_v53, %v3012_v35 }
0x1179   :  { %v2985_v44 = vsel %vm2858_vm0, %v2984_v34, %v2980_v24  ;;  %v2993_v46 = vrot.slane %v3664_v55, %v4679_v0 }
0x117a   :  { %v3014_v13 = vsel %vm3005_vm10, %v2985_v44, %v3013_v48 }
0x117b   :  { %v2994_v22 = vsel %vm2858_vm0, %v2993_v46, %v2989_v40 }
0x117c   :  { %v3015_v45 = vsel %vm3007_vm11, %v2994_v22, %v3014_v13 }
0x117d   :  { %3019 = vst.msk [vmem:[%s4784_s16 + $0x8] sm:$0xff] %vm285_vm7, %v3015_v45 }
0x117e   :  { %3028 = vsyncpa [#allocation4], 1 }
0x117f   :  { %3029 = vsyncpa [#allocation6], 1 }
0x1180   :  { %3030 = vsyncpa [#allocation9], 1 }

</bundles_post_ra>
